<compile_context>
chip_gen: v5e
topology: v5e:2x2
jax: 0.10.0
libtpu: 0.0.40
codegen_flags: <defaults>
</compile_context>

<pallas_src>
import functools

import jax
import jax.numpy as jnp
import numpy as np
from jax.experimental import pallas as pl
from jax.experimental.pallas import tpu as pltpu

EPSILON = 1e-8


def painn_mixing_kernel(q_ref, mu_ref, wmix_ref, w1_ref, b1_ref, w2_ref,
                        b2_ref, q_out_ref, mu_out_ref, *, F, eps, fuse_w1):
    q = q_ref[...]                       # (tn, F)   native dtype
    mu = mu_ref[...]                     # (tn, 3F)  native dtype
    wmix = wmix_ref[...]                 # (F, 2F)

    # --- mu_channel_mix: Dense(F -> 2F, no bias) ----------------------------
    # Three lane-aligned 128-wide column slices of the (tn, 3F) tile, one
    # (tn,F)@(F,2F) MXU dot per vector component (f32 accumulation).
    mu_c = [mu[:, i * F:(i + 1) * F] for i in range(3)]
    mu_mix = [jnp.dot(mu_c[i], wmix, preferred_element_type=jnp.float32)
              for i in range(3)]
    mu_V = [m[:, :F] for m in mu_mix]    # (tn, F) f32 each
    mu_W = [m[:, F:] for m in mu_mix]    # (tn, F) f32 each

    # ||mu_V|| over the 3 vector components -> plain VPU FMAs + one EUP sqrt.
    vv = mu_V[0] * mu_V[0] + mu_V[1] * mu_V[1] + mu_V[2] * mu_V[2]
    mu_Vn = jnp.sqrt(vv + eps)           # (tn, F) f32

    # --- intraatomic_context_net: Dense(2F->F, SiLU); Dense(F->3F) ----------
    if fuse_w1:
        # Single K=2F dot (fills the 256-deep MXU on v6e/v7x).  The concat is
        # at a lane-aligned 128-wide boundary -> no cross-lane shuffle.
        ctx = jnp.concatenate([q, mu_Vn.astype(q.dtype)], axis=-1)   # (tn, 2F)
        h = (jnp.dot(ctx, w1_ref[...], preferred_element_type=jnp.float32)
             + b1_ref[...])
    else:
        # v5e path: two K=F dots exactly fill the 128-deep MXU.
        h = (jnp.dot(q, w1_ref[:F, :], preferred_element_type=jnp.float32)
             + jnp.dot(mu_Vn.astype(q.dtype), w1_ref[F:, :],
                       preferred_element_type=jnp.float32)
             + b1_ref[...])
    h = h * jax.nn.sigmoid(h)            # SiLU in f32 (EUP + VPU)
    x = (jnp.dot(h.astype(w2_ref.dtype), w2_ref[...],
                 preferred_element_type=jnp.float32)
         + b2_ref[...])                  # (tn, 3F) f32

    dq_intra = x[:, :F]
    dmu_intra = x[:, F:2 * F]
    dqmu_intra = x[:, 2 * F:]

    # sum over the vector components of mu_V * mu_W -> three VPU FMAs.
    vw = mu_V[0] * mu_W[0] + mu_V[1] * mu_W[1] + mu_V[2] * mu_W[2]

    q_out_ref[...] = (q.astype(jnp.float32) + dq_intra
                      + dqmu_intra * vw).astype(q_out_ref.dtype)
    for i in range(3):                   # three unmasked lane-dense stores
        mu_out_ref[:, i * F:(i + 1) * F] = (
            mu_c[i].astype(jnp.float32) + dmu_intra * mu_W[i]
        ).astype(mu_out_ref.dtype)


def painn_mixing(q, mu, params, *, tile_n=256, fuse_w1=True,
                 single_buffer_weights=False):
    """q: [N, 1, F], mu: [N, 3, F].  Returns (q', mu') with the same shapes.

    tile_n: atoms per grid step (sweep 256-512 for large N; keep >= 2 grid
        steps, even on v7x, so both TensorCores are busy; cap at 256 on v7x
        for F >= 256 -- 64 MiB VMEM).
    fuse_w1: True (default) = single K=2F dot for the first Dense (best on the
        256-deep v6e/v7x MXU); False = two K=F dots (best on v5e).
    single_buffer_weights: single-buffer the grid-constant weights/biases
        (pl.Buffered(1)); only matters for large F / tile_n.
    Feed q/mu/params in bf16 to halve HBM traffic (f32 accumulation inside).
    """
    N, one, F = q.shape
    assert one == 1 and mu.shape == (N, 3, F)
    wmix, w1, b1, w2, b2 = params

    # Free, row-major-contiguous reshapes -- no HBM transpose, no padding.
    q2 = q.reshape(N, F)
    mu2 = mu.reshape(N, 3 * F)

    # Ragged N handled by a partial last block (OOB writes are masked).
    grid = (pl.cdiv(N, tile_n),)

    def wspec(shape):
        if single_buffer_weights:
            return pl.BlockSpec(shape, lambda i: (0, 0),
                                pipeline_mode=pl.Buffered(1))
        return pl.BlockSpec(shape, lambda i: (0, 0))

    kernel = functools.partial(painn_mixing_kernel, F=F, eps=EPSILON,
                               fuse_w1=fuse_w1)

    q_out, mu_out = pl.pallas_call(
        kernel,
        out_shape=(jax.ShapeDtypeStruct((N, F), q.dtype),
                   jax.ShapeDtypeStruct((N, 3 * F), mu.dtype)),
        grid_spec=pltpu.PrefetchScalarGridSpec(
            num_scalar_prefetch=0,
            grid=grid,
            in_specs=[
                pl.BlockSpec((tile_n, F), lambda i: (i, 0)),       # q
                pl.BlockSpec((tile_n, 3 * F), lambda i: (i, 0)),   # mu
                wspec((F, 2 * F)),                                 # W_mix
                wspec((2 * F, F)),                                 # W1
                wspec((1, F)),                                     # b1
                wspec((F, 3 * F)),                                 # W2
                wspec((1, 3 * F)),                                 # b2
            ],
            out_specs=[
                pl.BlockSpec((tile_n, F), lambda i: (i, 0)),
                pl.BlockSpec((tile_n, 3 * F), lambda i: (i, 0)),
            ],
        ),
        # On v7x, pltpu.CORE_PARALLEL on the atom axis is worth trying too.
        compiler_params=pltpu.CompilerParams(
            dimension_semantics=("parallel",)),
    )(q2, mu2, wmix, w1, b1, w2, b2)

    return q_out.reshape(N, 1, F), mu_out.reshape(N, 3, F)


def painn_mixing_ref(q, mu, params):
    """Pure-JAX reference mirroring the PyTorch forward."""
    wmix, w1, b1, w2, b2 = params
    F = mu.shape[-1]
    mu_mix = jnp.einsum("nvf,fg->nvg", mu, wmix)
    mu_V, mu_W = mu_mix[..., :F], mu_mix[..., F:]
    mu_Vn = jnp.sqrt(jnp.sum(mu_V ** 2, axis=-2, keepdims=True) + EPSILON)
    ctx = jnp.concatenate([q, mu_Vn], axis=-1)
    h = ctx @ w1 + b1
    h = jax.nn.silu(h)
    x = h @ w2 + b2
    dq, dmu, dqmu = x[..., :F], x[..., F:2 * F], x[..., 2 * F:]
    dmu = dmu * mu_W
    dqmu = dqmu * jnp.sum(mu_V * mu_W, axis=1, keepdims=True)
    return q + dq + dqmu, mu + dmu


def init_params(key, F):
    """Deterministic synthetic parameters (shapes from PaiNNMixing.__init__)."""
    k = jax.random.split(key, 5)
    s_mix = 1.0 / np.sqrt(F)
    s1 = 1.0 / np.sqrt(2 * F)
    s2 = 1.0 / np.sqrt(F)
    wmix = jax.random.uniform(k[0], (F, 2 * F), jnp.float32, -s_mix, s_mix)
    w1 = jax.random.uniform(k[1], (2 * F, F), jnp.float32, -s1, s1)
    b1 = jax.random.uniform(k[2], (1, F), jnp.float32, -s1, s1)
    w2 = jax.random.uniform(k[3], (F, 3 * F), jnp.float32, -s2, s2)
    b2 = jax.random.uniform(k[4], (1, 3 * F), jnp.float32, -s2, s2)
    return (wmix, w1, b1, w2, b2)


if __name__ == "__main__":
    F = 128                # n_atom_basis (lane-aligned)
    N_ATOMS = 256          # number of atoms -> 2 grid steps at tile_n=128

    key = jax.random.PRNGKey(0)
    kq, kmu, kp = jax.random.split(key, 3)
    q = jax.random.normal(kq, (N_ATOMS, 1, F), jnp.float32)
    mu = jax.random.normal(kmu, (N_ATOMS, 3, F), jnp.float32)
    params = init_params(kp, F)

    # --- f32, divisible N (even grid -> both v7x TensorCores busy) ----------
    q_out, mu_out = painn_mixing(q, mu, params, tile_n=128)
    jax.block_until_ready((q_out, mu_out))
    q_r, mu_r = painn_mixing_ref(q, mu, params)
    np.testing.assert_allclose(np.asarray(q_out), np.asarray(q_r),
                               rtol=1e-5, atol=1e-5)
    np.testing.assert_allclose(np.asarray(mu_out), np.asarray(mu_r),
                               rtol=1e-5, atol=1e-5)

    # --- ragged N: partial last block, no pad/slice HBM passes --------------
    Nr = 200
    q_rg, mu_rg = q[:Nr], mu[:Nr]
    qo_rg, muo_rg = painn_mixing(q_rg, mu_rg, params, tile_n=128)
    jax.block_until_ready((qo_rg, muo_rg))
    q_rr, mu_rr = painn_mixing_ref(q_rg, mu_rg, params)
    np.testing.assert_allclose(np.asarray(qo_rg), np.asarray(q_rr),
                               rtol=1e-5, atol=1e-5)
    np.testing.assert_allclose(np.asarray(muo_rg), np.asarray(mu_rr),
                               rtol=1e-5, atol=1e-5)

    # --- bf16 storage: halves HBM traffic; f32 accumulation in-kernel -------
    q_b = q.astype(jnp.bfloat16)
    mu_b = mu.astype(jnp.bfloat16)
    params_b = tuple(p.astype(jnp.bfloat16) for p in params)
    qo_b, muo_b = painn_mixing(q_b, mu_b, params_b, tile_n=128)
    jax.block_until_ready((qo_b, muo_b))
    # Reference on the same bf16-rounded values, evaluated in f32.
    q_rb, mu_rb = painn_mixing_ref(
        q_b.astype(jnp.float32), mu_b.astype(jnp.float32),
        tuple(p.astype(jnp.float32) for p in params_b))
    np.testing.assert_allclose(np.asarray(qo_b.astype(jnp.float32)),
                               np.asarray(q_rb), rtol=5e-2, atol=5e-2)
    np.testing.assert_allclose(np.asarray(muo_b.astype(jnp.float32)),
                               np.asarray(mu_rb), rtol=5e-2, atol=5e-2)

    print("KERNEL_OK")
</pallas_src>

<mosaic_0001>
module attributes {stable_mosaic.version = 11 : i64} {
  func.func @painn_mixing_kernel(%arg0: i32, %arg1: memref<128x128xf32, #tpu.memory_space<vmem>>, %arg2: memref<128x384xf32, #tpu.memory_space<vmem>>, %arg3: memref<128x256xf32, #tpu.memory_space<vmem>>, %arg4: memref<256x128xf32, #tpu.memory_space<vmem>>, %arg5: memref<1x128xf32, #tpu.memory_space<vmem>>, %arg6: memref<128x384xf32, #tpu.memory_space<vmem>>, %arg7: memref<1x384xf32, #tpu.memory_space<vmem>>, %arg8: memref<128x128xf32, #tpu.memory_space<vmem>>, %arg9: memref<128x384xf32, #tpu.memory_space<vmem>>) attributes {dimension_semantics = [#tpu.dimension_semantics<parallel>], iteration_bounds = array<i64: 2>, scalar_prefetch = 0 : i64, scratch_operands = 0 : i64, tpu.core_type = #tpu.core_type<tc>, window_params = [{transform_indices = @transform_0, window_bounds = array<i64: 128, 128>}, {transform_indices = @transform_1, window_bounds = array<i64: 128, 384>}, {pipeline_mode = #tpu.pipeline_mode<synchronous>, transform_indices = @transform_2, window_bounds = array<i64: 128, 256>}, {pipeline_mode = #tpu.pipeline_mode<synchronous>, transform_indices = @transform_3, window_bounds = array<i64: 256, 128>}, {pipeline_mode = #tpu.pipeline_mode<synchronous>, transform_indices = @transform_4, window_bounds = array<i64: 1, 128>}, {pipeline_mode = #tpu.pipeline_mode<synchronous>, transform_indices = @transform_5, window_bounds = array<i64: 128, 384>}, {pipeline_mode = #tpu.pipeline_mode<synchronous>, transform_indices = @transform_6, window_bounds = array<i64: 1, 384>}, {transform_indices = @transform_7, window_bounds = array<i64: 128, 128>}, {transform_indices = @transform_8, window_bounds = array<i64: 128, 384>}]} {
    %c0 = arith.constant 0 : index
    %c0_0 = arith.constant 0 : index
    %0 = vector.load %arg1[%c0, %c0_0] : memref<128x128xf32, #tpu.memory_space<vmem>>, vector<128x128xf32>
    %c0_1 = arith.constant 0 : index
    %c0_2 = arith.constant 0 : index
    %1 = vector.load %arg2[%c0_1, %c0_2] : memref<128x384xf32, #tpu.memory_space<vmem>>, vector<128x384xf32>
    %c0_3 = arith.constant 0 : index
    %c0_4 = arith.constant 0 : index
    %2 = vector.load %arg3[%c0_3, %c0_4] : memref<128x256xf32, #tpu.memory_space<vmem>>, vector<128x256xf32>
    %3 = vector.extract_strided_slice %1 {offsets = [0, 0], sizes = [128, 128], strides = [1, 1]} : vector<128x384xf32> to vector<128x128xf32>
    %4 = vector.extract_strided_slice %1 {offsets = [0, 128], sizes = [128, 128], strides = [1, 1]} : vector<128x384xf32> to vector<128x128xf32>
    %5 = vector.extract_strided_slice %1 {offsets = [0, 256], sizes = [128, 128], strides = [1, 1]} : vector<128x384xf32> to vector<128x128xf32>
    %cst = arith.constant dense<0.000000e+00> : vector<128x256xf32>
    %6 = tpu.matmul %3, %2, %cst {dimension_numbers = #tpu.dot_dimension_numbers<[1], [0], [0], [1], [0, 0, 1, 1], [], []>} : vector<128x128xf32>, vector<128x256xf32>, vector<128x256xf32> -> vector<128x256xf32>
    %cst_5 = arith.constant dense<0.000000e+00> : vector<128x256xf32>
    %7 = tpu.matmul %4, %2, %cst_5 {dimension_numbers = #tpu.dot_dimension_numbers<[1], [0], [0], [1], [0, 0, 1, 1], [], []>} : vector<128x128xf32>, vector<128x256xf32>, vector<128x256xf32> -> vector<128x256xf32>
    %cst_6 = arith.constant dense<0.000000e+00> : vector<128x256xf32>
    %8 = tpu.matmul %5, %2, %cst_6 {dimension_numbers = #tpu.dot_dimension_numbers<[1], [0], [0], [1], [0, 0, 1, 1], [], []>} : vector<128x128xf32>, vector<128x256xf32>, vector<128x256xf32> -> vector<128x256xf32>
    %9 = vector.extract_strided_slice %6 {offsets = [0, 0], sizes = [128, 128], strides = [1, 1]} : vector<128x256xf32> to vector<128x128xf32>
    %10 = vector.extract_strided_slice %7 {offsets = [0, 0], sizes = [128, 128], strides = [1, 1]} : vector<128x256xf32> to vector<128x128xf32>
    %11 = vector.extract_strided_slice %8 {offsets = [0, 0], sizes = [128, 128], strides = [1, 1]} : vector<128x256xf32> to vector<128x128xf32>
    %12 = vector.extract_strided_slice %6 {offsets = [0, 128], sizes = [128, 128], strides = [1, 1]} : vector<128x256xf32> to vector<128x128xf32>
    %13 = vector.extract_strided_slice %7 {offsets = [0, 128], sizes = [128, 128], strides = [1, 1]} : vector<128x256xf32> to vector<128x128xf32>
    %14 = vector.extract_strided_slice %8 {offsets = [0, 128], sizes = [128, 128], strides = [1, 1]} : vector<128x256xf32> to vector<128x128xf32>
    %15 = arith.mulf %9, %9 : vector<128x128xf32>
    %16 = arith.mulf %10, %10 : vector<128x128xf32>
    %17 = arith.addf %15, %16 : vector<128x128xf32>
    %18 = arith.mulf %11, %11 : vector<128x128xf32>
    %19 = arith.addf %17, %18 : vector<128x128xf32>
    %cst_7 = arith.constant 9.99999993E-9 : f32
    %20 = vector.broadcast %cst_7 : f32 to vector<128x128xf32>
    %21 = arith.addf %19, %20 : vector<128x128xf32>
    %22 = math.sqrt %21 : vector<128x128xf32>
    %23 = tpu.concatenate %0, %22 in 1 : vector<128x128xf32>, vector<128x128xf32> -> vector<128x256xf32>
    %c0_8 = arith.constant 0 : index
    %c0_9 = arith.constant 0 : index
    %24 = vector.load %arg4[%c0_8, %c0_9] : memref<256x128xf32, #tpu.memory_space<vmem>>, vector<256x128xf32>
    %cst_10 = arith.constant dense<0.000000e+00> : vector<128x128xf32>
    %25 = tpu.matmul %23, %24, %cst_10 {dimension_numbers = #tpu.dot_dimension_numbers<[1], [0], [0], [1], [0, 0, 1, 1], [], []>} : vector<128x256xf32>, vector<256x128xf32>, vector<128x128xf32> -> vector<128x128xf32>
    %c0_11 = arith.constant 0 : index
    %c0_12 = arith.constant 0 : index
    %26 = vector.load %arg5[%c0_11, %c0_12] : memref<1x128xf32, #tpu.memory_space<vmem>>, vector<1x128xf32>
    %27 = vector.broadcast %26 : vector<1x128xf32> to vector<128x128xf32>
    %28 = arith.addf %25, %27 : vector<128x128xf32>
    %29 = arith.negf %28 : vector<128x128xf32>
    %30 = math.exp %29 : vector<128x128xf32>
    %cst_13 = arith.constant 1.000000e+00 : f32
    %31 = vector.broadcast %cst_13 : f32 to vector<128x128xf32>
    %32 = arith.addf %31, %30 : vector<128x128xf32>
    %33 = arith.divf %31, %32 : vector<128x128xf32>
    %34 = arith.mulf %28, %33 : vector<128x128xf32>
    %c0_14 = arith.constant 0 : index
    %c0_15 = arith.constant 0 : index
    %35 = vector.load %arg6[%c0_14, %c0_15] : memref<128x384xf32, #tpu.memory_space<vmem>>, vector<128x384xf32>
    %cst_16 = arith.constant dense<0.000000e+00> : vector<128x384xf32>
    %36 = tpu.matmul %34, %35, %cst_16 {dimension_numbers = #tpu.dot_dimension_numbers<[1], [0], [0], [1], [0, 0, 1, 1], [], []>} : vector<128x128xf32>, vector<128x384xf32>, vector<128x384xf32> -> vector<128x384xf32>
    %c0_17 = arith.constant 0 : index
    %c0_18 = arith.constant 0 : index
    %37 = vector.load %arg7[%c0_17, %c0_18] : memref<1x384xf32, #tpu.memory_space<vmem>>, vector<1x384xf32>
    %38 = vector.broadcast %37 : vector<1x384xf32> to vector<128x384xf32>
    %39 = arith.addf %36, %38 : vector<128x384xf32>
    %40 = vector.extract_strided_slice %39 {offsets = [0, 0], sizes = [128, 128], strides = [1, 1]} : vector<128x384xf32> to vector<128x128xf32>
    %41 = vector.extract_strided_slice %39 {offsets = [0, 128], sizes = [128, 128], strides = [1, 1]} : vector<128x384xf32> to vector<128x128xf32>
    %42 = vector.extract_strided_slice %39 {offsets = [0, 256], sizes = [128, 128], strides = [1, 1]} : vector<128x384xf32> to vector<128x128xf32>
    %43 = arith.mulf %9, %12 : vector<128x128xf32>
    %44 = arith.mulf %10, %13 : vector<128x128xf32>
    %45 = arith.addf %43, %44 : vector<128x128xf32>
    %46 = arith.mulf %11, %14 : vector<128x128xf32>
    %47 = arith.addf %45, %46 : vector<128x128xf32>
    %48 = arith.addf %0, %40 : vector<128x128xf32>
    %49 = arith.mulf %42, %47 : vector<128x128xf32>
    %50 = arith.addf %48, %49 : vector<128x128xf32>
    %c0_19 = arith.constant 0 : index
    %c0_20 = arith.constant 0 : index
    %51 = vector.load %arg8[%c0_19, %c0_20] : memref<128x128xf32, #tpu.memory_space<vmem>>, vector<128x128xf32>
    tpu.vector_store %arg8[%c0_19, %c0_20], %50 {strides = array<i32>} : memref<128x128xf32, #tpu.memory_space<vmem>>, vector<128x128xf32>,
    %52 = arith.mulf %41, %12 : vector<128x128xf32>
    %53 = arith.addf %3, %52 : vector<128x128xf32>
    %c0_21 = arith.constant 0 : index
    %c0_22 = arith.constant 0 : index
    %54 = vector.load %arg9[%c0_21, %c0_22] : memref<128x384xf32, #tpu.memory_space<vmem>>, vector<128x128xf32>
    tpu.vector_store %arg9[%c0_21, %c0_22], %53 {strides = array<i32>} : memref<128x384xf32, #tpu.memory_space<vmem>>, vector<128x128xf32>,
    %55 = arith.mulf %41, %13 : vector<128x128xf32>
    %56 = arith.addf %4, %55 : vector<128x128xf32>
    %c0_23 = arith.constant 0 : index
    %c128 = arith.constant 128 : index
    %57 = vector.load %arg9[%c0_23, %c128] : memref<128x384xf32, #tpu.memory_space<vmem>>, vector<128x128xf32>
    tpu.vector_store %arg9[%c0_23, %c128], %56 {strides = array<i32>} : memref<128x384xf32, #tpu.memory_space<vmem>>, vector<128x128xf32>,
    %58 = arith.mulf %41, %14 : vector<128x128xf32>
    %59 = arith.addf %5, %58 : vector<128x128xf32>
    %c0_24 = arith.constant 0 : index
    %c256 = arith.constant 256 : index
    %60 = vector.load %arg9[%c0_24, %c256] : memref<128x384xf32, #tpu.memory_space<vmem>>, vector<128x128xf32>
    tpu.vector_store %arg9[%c0_24, %c256], %59 {strides = array<i32>} : memref<128x384xf32, #tpu.memory_space<vmem>>, vector<128x128xf32>,
    return
  }
  func.func @transform_0(%arg0: i32) -> (i32, i32) {
    %c0_i32 = arith.constant 0 : i32
    %c0_i32_0 = arith.constant 0 : i32
    return %arg0, %c0_i32 : i32, i32
  }
  func.func @transform_1(%arg0: i32) -> (i32, i32) {
    %c0_i32 = arith.constant 0 : i32
    %c0_i32_0 = arith.constant 0 : i32
    return %arg0, %c0_i32 : i32, i32
  }
  func.func @transform_2(%arg0: i32) -> (i32, i32) {
    %c0_i32 = arith.constant 0 : i32
    %c0_i32_0 = arith.constant 0 : i32
    %c0_i32_1 = arith.constant 0 : i32
    return %c0_i32, %c0_i32_0 : i32, i32
  }
  func.func @transform_3(%arg0: i32) -> (i32, i32) {
    %c0_i32 = arith.constant 0 : i32
    %c0_i32_0 = arith.constant 0 : i32
    %c0_i32_1 = arith.constant 0 : i32
    return %c0_i32, %c0_i32_0 : i32, i32
  }
  func.func @transform_4(%arg0: i32) -> (i32, i32) {
    %c0_i32 = arith.constant 0 : i32
    %c0_i32_0 = arith.constant 0 : i32
    %c0_i32_1 = arith.constant 0 : i32
    return %c0_i32, %c0_i32_0 : i32, i32
  }
  func.func @transform_5(%arg0: i32) -> (i32, i32) {
    %c0_i32 = arith.constant 0 : i32
    %c0_i32_0 = arith.constant 0 : i32
    %c0_i32_1 = arith.constant 0 : i32
    return %c0_i32, %c0_i32_0 : i32, i32
  }
  func.func @transform_6(%arg0: i32) -> (i32, i32) {
    %c0_i32 = arith.constant 0 : i32
    %c0_i32_0 = arith.constant 0 : i32
    %c0_i32_1 = arith.constant 0 : i32
    return %c0_i32, %c0_i32_0 : i32, i32
  }
  func.func @transform_7(%arg0: i32) -> (i32, i32) {
    %c0_i32 = arith.constant 0 : i32
    %c0_i32_0 = arith.constant 0 : i32
    return %arg0, %c0_i32 : i32, i32
  }
  func.func @transform_8(%arg0: i32) -> (i32, i32) {
    %c0_i32 = arith.constant 0 : i32
    %c0_i32_0 = arith.constant 0 : i32
    return %arg0, %c0_i32 : i32, i32
  }
}

</mosaic_0001>

<bundles_post_ra>
// kernel: tpu_custom_call.1
= control target key start
LH: loop header
LB: loop body
LE: loop exit
PB: predicated region body
PF: predicated region fallthrough
CT: control target
= control target key end

     0   :  { %s4491_s0 = inlined_call_operand.hbm [shape: f32[256,128], index: 0, kind: input, shape index: {}]   ;;  %s4492_s1 = inlined_call_operand.hbm [shape: f32[256,384], index: 1, kind: input, shape index: {}]   ;;  %s4493_s2 = inlined_call_operand.hbm [shape: f32[128,256], index: 2, kind: input, shape index: {}]   ;;  %s4494_s3 = inlined_call_operand.hbm [shape: f32[256,128], index: 3, kind: input, shape index: {}]   ;;  %s4495_s4 = inlined_call_operand.vmem [shape: f32[1,128], index: 4, kind: input, shape index: {}]   ;;  %s4496_s5 = inlined_call_operand.hbm [shape: f32[128,384], index: 5, kind: input, shape index: {}]   ;;  %s4497_s6 = inlined_call_operand.vmem [shape: f32[1,384], index: 6, kind: input, shape index: {}]   ;;  %s4498_s7 = inlined_call_operand.hbm [shape: f32[256,128], index: 7, kind: output, shape index: {0}]   ;;  %s4499_s8 = inlined_call_operand.hbm [shape: f32[256,384], index: 8, kind: output, shape index: {1}]  }
   0x1   :  { %4565 = sst [smem:[#allocation81_spill]] %s4493_s2 }
   0x2   :  { %4566 = sst [smem:[#allocation82_spill]] %s4494_s3 }
   0x3   :  { %4567 = sst [smem:[#allocation83_spill]] %s4496_s5 }
   0x4   :  { %14 = vsyncpa [#allocation3], 0 }
   0x5   :  { %16 = vsyncpa [#allocation3 + $0x1], 0 }
   0x6   :  { %17 = vsyncpa [#allocation6], 0 }
   0x7   :  { %19 = vsyncpa [#allocation6 + $0x1], 0 }
   0x8   :  { %20 = vsyncpa [#allocation9], 0 }
   0x9   :  { %21 = vsyncpa [#allocation4], 0 }
   0xa   :  { %23 = vsyncpa [#allocation4 + $0x1], 0 }
   0xb   :  { %24 = vsyncpa [#allocation13], 0 }
   0xc   :  { %26 = vsyncpa [#allocation13 + $0x1], 0  ;;  %s3102_s27 = smov 0   ;;  %s3104_s28 = smov 0  }
   0xd   :  { %s3106_s29 = smov 0   ;;  %s3108_s30 = smov 0  }
   0xe LB: > { %4568 = sst [smem:[#allocation20_spill]] %s3030_s27  ;;  %s3123_s9 = sadd.s32 4294967295, %s3042_s30   ;;  %s3042_s30 = sphi %s3108_s30, %s4701_s30   ;;  %s3038_s29 = sphi %s3106_s29, %s4703_s29   ;;  %s3034_s28 = sphi %s3104_s28, %s4705_s28   ;;  %s3030_s27 = sphi %s3102_s27, %s4704_s27  }
   0xf   : > { %4569 = sst [smem:[#allocation21_spill]] %s3038_s29  ;;  %s2428_s10 = sadd.s32 4294967294, %s3042_s30  }
  0x10   : > { %4570 = sst [smem:[#allocation22_spill]] %s3042_s30  ;;  %p52_p0 = scmp.ne.s32.totalorder %s3034_s28, %s3030_s27 }
  0x11   : > { %p53_p1 = scmp.eq.s32.totalorder %s3123_s9, 0  ;;  %p207_p2 = scmp.eq.s32.totalorder %s3123_s9, 1 }
  0x12   : > { %p213_p3 = scmp.eq.s32.totalorder %s2428_s10, 1  ;;  %p2429_p5 = scmp.ge.s32.totalorder %s3042_s30, 1 }
  0x13   : > { %p3132_p4 = por %p53_p1, %p52_p0  ;;  %p246_p7 = scmp.lt.s32.totalorder %s3042_s30, 3 }
  0x14   : > { %p3137_p6 = por %p213_p3, %p52_p0  ;;  %s4574_s2 = sld [smem:[#allocation81_spill]] }
  0x15   : > { %p3145_p8 = pnand %p2429_p5, %p246_p7  ;;  %s3044_s17 = smov [#allocation7]  }
  0x16   : > { %s4572_s12 = scalar_select %p3137_p6, 1, 0 }
  0x17   : > { %p2544_p9 = pneg %p3145_p8  ;;  %s259_s18 = sshll.u32 %s3044_s17, 4  ;;  %s260_s18 = int_to_ptr.vmem [resolvable:$true] %s259_s18 }
  0x18   : > { %4573 = sst [smem:[#allocation23_spill]] %s4572_s12  ;;  %s3045_s23 = smov 256  }
  0x19   : > { %p3153_p10 = pnand %p2544_p9, %p53_p1  ;;  %s4577_s3 = sld [smem:[#allocation82_spill]] }
  0x1a   : > { %s257_s15 = sshll.u32 %s4574_s2, 4  ;;  %s3046_s24 = smov 16   ;;  %s258_s15 = int_to_ptr.hbm [resolvable:$true] %s257_s15 }
  0x1b   : > { %2547 = dma.hbm_to_vmem [thread:$0]  (!%p3153_p10), %s258_s15, 4096, %s260_s18, [#allocation6], %s3045_s23, %s3045_s23, %s3046_s24  }
  0x1c   : > { %s3047_s25 = smov [#allocation8]   ;;  %s4502_s10 = smov 128  }
  0x1d   : > { %s273_s26 = sshll.u32 %s3047_s25, 4  ;;  %s4503_s13 = smov 8   ;;  %s274_s26 = int_to_ptr.vmem [resolvable:$true] %s273_s26 }
  0x1e   : > { %s4578_s5 = sld [smem:[#allocation83_spill]]  ;;  %s3050_s18 = smov [#allocation10]  }
  0x1f   : > { %s271_s22 = sshll.u32 %s4577_s3, 4  ;;  %s290_s20 = sshll.u32 %s3050_s18, 4  ;;  %s272_s22 = int_to_ptr.hbm [resolvable:$true] %s271_s22  ;;  %s291_s20 = int_to_ptr.vmem [resolvable:$true] %s290_s20 }
  0x20   : > { %2550 = dma.hbm_to_vmem [thread:$0]  (!%p3153_p10), %s272_s22, 4096, %s274_s26, [#allocation9], %s4502_s10, %s4502_s10, %s4503_s13  }
  0x21   : > { %s4500_s21 = smov 384   ;;  %s4501_s23 = smov 24  }
  0x22   : > { %s3177_s22 = sadd.s32 1, %s3042_s30   ;;  %s39_s25 = sadd.s32 1, %s3038_s29 }
  0x23   : > { %4579 = sst [smem:[#allocation24_spill]] %s3177_s22  ;;  %s36_s24 = ssub.s32 %s3042_s30, %s3177_s22 }
  0x24   : > { %s288_s15 = sshll.u32 %s4578_s5, 4  ;;  %p37_p12 = scmp.eq.s32.totalorder %s36_s24, 0  ;;  %s289_s15 = int_to_ptr.hbm [resolvable:$true] %s288_s15 }
  0x25   : > { %2553 = dma.hbm_to_vmem [thread:$0]  (!%p3153_p10), %s289_s15, 6144, %s291_s20, [#allocation9], %s4500_s21, %s4500_s21, %s4501_s23  }
  0x26   : > { %p46_p13 = scmp.ne.s32.totalorder %s3038_s29, %s3034_s28  ;;  %p47_p0 = scmp.eq.s32.totalorder %s3042_s30, 0 }
  0x27   : > { %p2571_p3 = scmp.lt.s32.totalorder %s3042_s30, 2  ;;  %s3196_s14 = sand.u32 1, %s3038_s29  }
  0x28   : > { %s3187_s26 = scalar_select %p37_p12, %s3038_s29, %s39_s25  }
  0x29   : > { %p48_p5 = por %p47_p0, %p46_p13  ;;  %p3191_p7 = por %p207_p2, %p46_p13 }
  0x2a   : > { %4580 = sst [smem:[#allocation25_spill]] %s3187_s26  ;;  %s2470_s17 = sshll.u32 %s3042_s30, 7 }
  0x2b   : > { %s2434_s15 = sshll.u32 %s3196_s14, 7  ;;  %s316_s24 = scalar_lea.hbm %s4491_s0, %s2470_s17 }
  0x2c   : > { %s317_s21 = sshll.u32 %s316_s24, 4  ;;  %s311_s25 = scalar_lea.vmem [#allocation2], %s2434_s15  ;;  %s318_s21 = int_to_ptr.hbm [resolvable:$true] %s317_s21 }
  0x2d   : > { %s319_s23 = sshll.u32 %s311_s25, 4  ;;  %p3205_p2 = pnand %p2571_p3, %p48_p5  ;;  %s320_s23 = int_to_ptr.vmem [resolvable:$true] %s319_s23 }
  0x2e   : > { %s329_s13 = sand.u32 1, %s3042_s30   ;;  %s2520_s2 = smul.u32 384, %s3196_s14 }
  0x2f   : > { %s2521_s3 = smul.u32 384, %s3042_s30  ;;  %s308_s5 = scalar_lea.sflag [#allocation3], %s3196_s14 }
  0x30   : > { %s2872_s26 = sshra.s32 %s318_s21, 4  ;;  %p2876_p10 = pneg %p3205_p2  ;;  %s2873_s26 = int_to_ptr.hbm [resolvable:$true] %s2872_s26 }
  0x31   : > { %s2874_s18 = scalar_lea.hbm %s2873_s26, 128  ;;  %s2879_s20 = scalar_lea.hbm %s4491_s0, 256 }
  0x32   : > { %p2875_p9 = scmp.ne.s32.totalorder %s2873_s26, %s2874_s18  ;;  %p2880_p0 = scmp.lt.s32.totalorder %s2873_s26, %s4491_s0 }
  0x33   : > { %p2881_p3 = scmp.lt.s32.totalorder %s2879_s20, %s2874_s18 }
  0x34   : > { %p2877_p12 = pnand %p2876_p10, %p2875_p9 }
  0x35   : > { %p2882_p5 = por %p2881_p3, %p2880_p0 }
  0x36   : > { %p2878_p13 = pneg %p2877_p12 }
  0x38   : > { %p2883_p11 = pnand %p2882_p5, %p2878_p13 }
  0x3a   : > { %2886 = shalt.err (!%p2883_p11)
}
  0x3b   : > { %s4583_s14 = smov 8   ;;  %s4584_s29 = smov 128  }
  0x3c   : > { %2557 = dma.hbm_to_vmem [thread:$0]  (!%p3205_p2), %s318_s21, 2048, %s320_s23, %s308_s5, %s4584_s29, %s4584_s29, %s4583_s14  }
  0x3d   : > { %s339_s17 = scalar_lea.hbm %s4492_s1, %s2521_s3  ;;  %s333_s12 = scalar_lea.vmem [#allocation5], %s2520_s2 }
  0x3e   : > { %s340_s15 = sshll.u32 %s339_s17, 4  ;;  %s342_s27 = sshll.u32 %s333_s12, 4  ;;  %s341_s15 = int_to_ptr.hbm [resolvable:$true] %s340_s15  ;;  %s343_s27 = int_to_ptr.vmem [resolvable:$true] %s342_s27 }
  0x3f   : > { %s330_s26 = scalar_lea.sflag [#allocation6], %s329_s13  ;;  %s2902_s18 = sshra.s32 %s341_s15, 4  ;;  %s2903_s18 = int_to_ptr.hbm [resolvable:$true] %s2902_s18 }
  0x40   : > { %s2904_s20 = scalar_lea.hbm %s2903_s18, 384  ;;  %s2909_s29 = scalar_lea.hbm %s4492_s1, 768 }
  0x41   : > { %p2905_p11 = scmp.ne.s32.totalorder %s2903_s18, %s2904_s20  ;;  %p2910_p13 = scmp.lt.s32.totalorder %s2903_s18, %s4492_s1 }
  0x42   : > { %p2911_p0 = scmp.lt.s32.totalorder %s2909_s29, %s2904_s20 }
  0x43   : > { %p2907_p9 = pnand %p2905_p11, %p2876_p10 }
  0x44   : > { %p2912_p3 = por %p2911_p0, %p2910_p13 }
  0x45   : > { %p2908_p12 = pneg %p2907_p9 }
  0x47   : > { %p2913_p5 = pnand %p2912_p3, %p2908_p12 }
  0x49   : > { %2916 = shalt.err (!%p2913_p5)
}
  0x4a   : > { %s4585_s2 = smov 24   ;;  %s4586_s12 = smov 384  }
  0x4b   : > { %2560 = dma.hbm_to_vmem [thread:$0]  (!%p3205_p2), %s341_s15, 6144, %s343_s27, %s330_s26, %s4586_s12, %s4586_s12, %s4585_s2  }
  0x4c   : > { %354 = sbr.rel (%p3145_p8) target bundleno = 810 (0x32a), region = 48 }
  0x51   : > { %s3249_s13 = sand.u32 1, %s3034_s28  }
  0x52   : > { %s2441_s21 = sshll.u32 %s3249_s13, 7  ;;  %s357_s23 = scalar_lea.sflag [#allocation3], %s3249_s13 }
  0x53   : > { %s3255_s22 = scalar_lea.vmem [#allocation2], %s2441_s21 }
  0x54   : > { %3005 = dma.done.wait (%p3132_p4), %s357_s23, 2048  }
  0x55   : > { %3007 = vsyncadd (%p3132_p4), %s357_s23, 4294965248  ;;  %s366_s27 = sand.u32 1, %s3123_s9   ;;  %s2522_s16 = smul.u32 384, %s3249_s13 }
  0x56   : > { %s367_s10 = scalar_lea.sflag [#allocation6], %s366_s27 }
  0x57   : > { %s3265_s25 = scalar_lea.vmem [#allocation5], %s2522_s16 }
  0x58   : > { %3009 = dma.done.wait (%p3132_p4), %s367_s10, 6144  }
  0x59   : > { %3011 = vsyncadd (%p3132_p4), %s367_s10, 4294961152 }
  0x5a   : > { %3013 = dma.done.wait (%p53_p1), [#allocation6], 4096  }
  0x5b   : > { %3015 = vsyncadd (%p53_p1), [#allocation6], 4294963200 }
  0x5c   : > { %3017 = dma.done.wait (%p53_p1), [#allocation9], 10240  }
  0x5d   : > { %3019 = vsyncadd (%p53_p1), [#allocation9], 4294957056  ;;  %v3279_v0 = vld [vmem:[#allocation7 + $0xf0] sm:$0xff]  ;;  %v3281_v1 = vld [vmem:[#allocation7 + $0xf8] sm:$0xff]  ;;  %s4119_s26 = scalar_lea.vmem [#allocation12], %s2522_s16  ;;  %s4141_s18 = scalar_lea.vmem [#allocation11], %s2441_s21 }
  0x5e   : > { %v3283_v2 = vld [vmem:[#allocation7 + $0xe0] sm:$0xff]  ;;  %529 = vmatpush.msra.mxu0 %v3279_v0  ;;  %2472 = vmatpush.msra.mxu3 %v3279_v0  ;;  %v3287_v3 = vld [vmem:[#allocation7 + $0xe8] sm:$0xff]  ;;  %v3290_v4 = vld [vmem:[#allocation7 + $0xd0] sm:$0xff]  ;;  %s2523_s20 = smul.u32 384, %s3123_s9  ;;  %s2471_s30 = sshll.u32 %s3123_s9, 7 }
  0x5f   : > { %2488 = vmatpush.msra.mxu1 %v3281_v1  ;;  %2504 = vmatpush.msra.mxu2 %v3279_v0  ;;  %v3295_v5 = vld [vmem:[#allocation7 + $0xd8] sm:$0xff]  ;;  %v3298_v6 = vld [vmem:[#allocation7 + $0xc0] sm:$0xff]  ;;  %v3303_v7 = vld [vmem:[#allocation7 + $0xc8] sm:$0xff]  ;;  %s2268_s3 = sshll.u32 %s4119_s26, 4  ;;  %s4430_s21 = scalar_lea.hbm %s4498_s7, %s2471_s30  ;;  %s4436_s3 = int_to_ptr.vmem [resolvable:$true] %s2268_s3 }
  0x60   : > { %530 = vmatpush.msra.mxu0 %v3283_v2  ;;  %2473 = vmatpush.msra.mxu3 %v3283_v2  ;;  %v3306_v8 = vld [vmem:[#allocation7 + $0xb0] sm:$0xff]  ;;  %v3311_v9 = vld [vmem:[#allocation7 + $0xb8] sm:$0xff]  ;;  %v3314_v10 = vld [vmem:[#allocation7 + $0xa0] sm:$0xff]  ;;  %s2267_s29 = scalar_lea.hbm %s4499_s8, %s2523_s20  ;;  %s2250_s23 = sshll.u32 %s4141_s18, 4  ;;  %s2251_s23 = int_to_ptr.vmem [resolvable:$true] %s2250_s23 }
  0x61   : > { %2489 = vmatpush.msra.mxu1 %v3287_v3  ;;  %2505 = vmatpush.msra.mxu2 %v3283_v2  ;;  %v3319_v11 = vld [vmem:[#allocation7 + $0xa8] sm:$0xff]  ;;  %v3322_v12 = vld [vmem:[#allocation7 + $0x90] sm:$0xff]  ;;  %v3327_v13 = vld [vmem:[#allocation7 + $0x98] sm:$0xff]  ;;  %s2270_s2 = sshll.u32 %s2267_s29, 4  ;;  %s2252_s27 = sshll.u32 %s4430_s21, 4  ;;  %s4438_s2 = int_to_ptr.hbm [resolvable:$true] %s2270_s2  ;;  %s2253_s27 = int_to_ptr.hbm [resolvable:$true] %s2252_s27 }
  0x62   : > { %531 = vmatpush.msra.mxu0 %v3290_v4  ;;  %2474 = vmatpush.msra.mxu3 %v3290_v4  ;;  %v3330_v14 = vld [vmem:[#allocation7 + $0x80] sm:$0xff]  ;;  %v3335_v15 = vld [vmem:[#allocation7 + $0x88] sm:$0xff]  ;;  %v3338_v16 = vld [vmem:[#allocation7 + $0x70] sm:$0xff]  ;;  %s2238_s16 = scalar_lea.sflag [#allocation13], %s3249_s13  ;;  %s2946_s10 = sshra.s32 %s4438_s2, 4  ;;  %s2947_s10 = int_to_ptr.hbm [resolvable:$true] %s2946_s10 }
  0x63   : > { %2490 = vmatpush.msra.mxu1 %v3295_v5  ;;  %2506 = vmatpush.msra.mxu2 %v3290_v4  ;;  %v3343_v17 = vld [vmem:[#allocation7 + $0x78] sm:$0xff]  ;;  %v3346_v18 = vld [vmem:[#allocation7 + $0x60] sm:$0xff]  ;;  %v3351_v19 = vld [vmem:[#allocation7 + $0x68] sm:$0xff]  ;;  %s2952_s17 = scalar_lea.hbm %s4499_s8, 768  ;;  %p2953_p2 = scmp.lt.s32.totalorder %s2947_s10, %s4499_s8 }
  0x64   : > { %532 = vmatpush.msra.mxu0 %v3298_v6  ;;  %2475 = vmatpush.msra.mxu3 %v3298_v6  ;;  %v3354_v20 = vld [vmem:[#allocation7 + $0x50] sm:$0xff]  ;;  %v3359_v21 = vld [vmem:[#allocation7 + $0x58] sm:$0xff]  ;;  %v3362_v22 = vld [vmem:[#allocation7 + $0x40] sm:$0xff] }
  0x65   : > { %2491 = vmatpush.msra.mxu1 %v3303_v7  ;;  %2507 = vmatpush.msra.mxu2 %v3298_v6  ;;  %v3367_v23 = vld [vmem:[#allocation7 + $0x48] sm:$0xff]  ;;  %v3370_v24 = vld [vmem:[#allocation7 + $0x30] sm:$0xff]  ;;  %v3375_v25 = vld [vmem:[#allocation7 + $0x38] sm:$0xff] }
  0x66   : > { %533 = vmatpush.msra.mxu0 %v3306_v8  ;;  %2476 = vmatpush.msra.mxu3 %v3306_v8  ;;  %v3378_v26 = vld [vmem:[#allocation7 + $0x20] sm:$0xff]  ;;  %v3383_v27 = vld [vmem:[#allocation7 + $0x28] sm:$0xff]  ;;  %v3386_v28 = vld [vmem:[#allocation7 + $0x10] sm:$0xff] }
  0x67   : > { %2492 = vmatpush.msra.mxu1 %v3311_v9  ;;  %2508 = vmatpush.msra.mxu2 %v3306_v8  ;;  %v3391_v29 = vld [vmem:[#allocation7 + $0x18] sm:$0xff]  ;;  %v3394_v30 = vld [vmem:[#allocation7] sm:$0xff]  ;;  %v3399_v31 = vld [vmem:[#allocation7 + $0x8] sm:$0xff] }
  0x68   : > { %534 = vmatpush.msra.mxu0 %v3314_v10  ;;  %2477 = vmatpush.msra.mxu3 %v3314_v10  ;;  %v3402_v32 = vld [vmem:[%s3265_s25] sm:$0xff]  ;;  %v3412_v34 = vld [vmem:[%s3265_s25 + $0x68] sm:$0xff]  ;;  %v3422_v35 = vld [vmem:[%s3265_s25 + $0x18] sm:$0xff] }
  0x69   : > { %2493 = vmatpush.msra.mxu1 %v3319_v11  ;;  %2509 = vmatpush.msra.mxu2 %v3314_v10  ;;  %v461_v33 = vld [vmem:[%s3265_s25 + $0x60] sm:$0xff]  ;;  %v464_v36 = vld [vmem:[%s3265_s25 + $0x78] sm:$0xff]  ;;  %v3441_v38 = vld [vmem:[%s3265_s25 + $0x30] sm:$0xff] }
  0x6a   : > { %535 = vmatpush.msra.mxu0 %v3322_v12  ;;  %2478 = vmatpush.msra.mxu3 %v3322_v12  ;;  %v3430_v37 = vld [vmem:[%s3265_s25 + $0x80] sm:$0xff]  ;;  %v467_v39 = vld [vmem:[%s3265_s25 + $0x90] sm:$0xff]  ;;  %v3449_v40 = vld [vmem:[%s3265_s25 + $0x98] sm:$0xff] }
  0x6b   : > { %2494 = vmatpush.msra.mxu1 %v3327_v13  ;;  %2510 = vmatpush.msra.mxu2 %v3322_v12  ;;  %v458_v41 = vld [vmem:[%s3265_s25 + $0x48] sm:$0xff]  ;;  %v3465_v43 = vld [vmem:[%s3265_s25 + $0xb0] sm:$0xff]  ;;  %v473_v44 = vld [vmem:[%s3265_s25 + $0xc0] sm:$0xff] }
  0x6c   : > { %536 = vmatpush.msra.mxu0 %v3330_v14  ;;  %2479 = vmatpush.msra.mxu3 %v3330_v14  ;;  %v470_v42 = vld [vmem:[%s3265_s25 + $0xa8] sm:$0xff]  ;;  %v476_v46 = vld [vmem:[%s3265_s25 + $0xd8] sm:$0xff]  ;;  %v3497_v47 = vld [vmem:[%s3265_s25 + $0xe0] sm:$0xff] }
  0x6d   : > { %2495 = vmatpush.msra.mxu1 %v3335_v15  ;;  %2511 = vmatpush.msra.mxu2 %v3330_v14  ;;  %v3481_v45 = vld [vmem:[%s3265_s25 + $0xc8] sm:$0xff]  ;;  %v479_v48 = vld [vmem:[%s3265_s25 + $0xf0] sm:$0xff]  ;;  %v3510_v49 = vld [vmem:[%s3265_s25 + $0xf8] sm:$0xff] }
  0x6e   : > { %537 = vmatpush.msra.mxu0 %v3338_v16  ;;  %2480 = vmatpush.msra.mxu3 %v3338_v16  ;;  %v482_v50 = vld [vmem:[%s3265_s25 + $0x108] sm:$0xff]  ;;  %v3520_v51 = vld [vmem:[%s3265_s25 + $0x110] sm:$0xff]  ;;  %v485_v53 = vld [vmem:[%s3265_s25 + $0x120] sm:$0xff] }
  0x6f   : > { %2496 = vmatpush.msra.mxu1 %v3343_v17  ;;  %2512 = vmatpush.msra.mxu2 %v3338_v16  ;;  %v450_v52 = vld [vmem:[%s3265_s25 + $0x8] sm:$0xff]  ;;  %v453_v55 = vld [vmem:[%s3265_s25 + $0x20] sm:$0xff]  ;;  %v488_v56 = vld [vmem:[%s3265_s25 + $0x138] sm:$0xff] }
  0x70   : > { %538 = vmatpush.msra.mxu0 %v3346_v18  ;;  %2481 = vmatpush.msra.mxu3 %v3346_v18  ;;  %v3530_v54 = vld [vmem:[%s3265_s25 + $0x128] sm:$0xff]  ;;  %v3540_v57 = vld [vmem:[%s3265_s25 + $0x140] sm:$0xff]  ;;  %v456_v58 = vld [vmem:[%s3265_s25 + $0x38] sm:$0xff] }
  0x71   : > { %2497 = vmatpush.msra.mxu1 %v3351_v19  ;;  %2513 = vmatpush.msra.mxu2 %v3346_v18  ;;  %v491_v59 = vld [vmem:[%s3265_s25 + $0x150] sm:$0xff]  ;;  %v3550_v60 = vld [vmem:[%s3265_s25 + $0x158] sm:$0xff]  ;;  %v494_v62 = vld [vmem:[%s3265_s25 + $0x168] sm:$0xff] }
  0x72   : > { %539 = vmatpush.msra.mxu0 %v3354_v20  ;;  %2482 = vmatpush.msra.mxu3 %v3354_v20  ;;  %v459_v61 = vld [vmem:[%s3265_s25 + $0x50] sm:$0xff] }
  0x73   : > { %2498 = vmatpush.msra.mxu1 %v3359_v21  ;;  %2514 = vmatpush.msra.mxu2 %v3354_v20  ;;  %v3560_v63 = vld [vmem:[%s3265_s25 + $0x170] sm:$0xff] }
  0x74   : > { %540 = vmatpush.msra.mxu0 %v3362_v22  ;;  %2483 = vmatpush.msra.mxu3 %v3362_v22 }
  0x75   : > { %2499 = vmatpush.msra.mxu1 %v3367_v23  ;;  %2515 = vmatpush.msra.mxu2 %v3362_v22 }
  0x76   : > { %541 = vmatpush.msra.mxu0 %v3370_v24  ;;  %2484 = vmatpush.msra.mxu3 %v3370_v24 }
  0x77   : > { %2500 = vmatpush.msra.mxu1 %v3375_v25  ;;  %2516 = vmatpush.msra.mxu2 %v3370_v24 }
  0x78   : > { %542 = vmatpush.msra.mxu0 %v3378_v26  ;;  %2485 = vmatpush.msra.mxu3 %v3378_v26 }
  0x79   : > { %2501 = vmatpush.msra.mxu1 %v3383_v27  ;;  %2517 = vmatpush.msra.mxu2 %v3378_v26 }
  0x7a   : > { %543 = vmatpush.msra.mxu0 %v3386_v28  ;;  %2486 = vmatpush.msra.mxu3 %v3386_v28 }
  0x7b   : > { %2502 = vmatpush.msra.mxu1 %v3391_v29  ;;  %2518 = vmatpush.msra.mxu2 %v3386_v28 }
  0x7c   : > { %544 = vmatpush.msra.mxu0 %v3394_v30  ;;  %2487 = vmatpush.msra.mxu3 %v3394_v30 }
  0x7d   : > { %2503 = vmatpush.msra.mxu1 %v3399_v31  ;;  %545 = vmatmul.f32.vlgmr.msra.gmra.mxu0 %v3402_v32 }
  0x7e   : > { %557 = vmatmul.f32.vlgmr.msra.gmra.mxu3 %v461_v33  ;;  %594 = vmatpush.msrb.mxu0 %v3281_v1 }
  0x7f   : > { %622 = vmatmul.f32.vlgmr.msra.gmra.mxu1 %v461_v33  ;;  %2519 = vmatpush.msra.mxu2 %v3394_v30  ;;  %v1216_v33 = vld [vmem:[#allocation8 + $0x48] sm:$0xff] }
  0x80   : > { %595 = vmatpush.msrb.mxu0 %v3287_v3  ;;  %687 = vmatmul.f32.vlgmr.msra.gmra.mxu2 %v3412_v34 }
  0x81   : > { %724 = vmatpush.msrb.mxu3 %v3281_v1  ;;  %854 = vmatpush.msrb.mxu1 %v3281_v1  ;;  %v451_v1 = vld [vmem:[%s3265_s25 + $0x10] sm:$0xff] }
  0x82   : > { %596 = vmatpush.msrb.mxu0 %v3295_v5 }
  0x83   : > { %725 = vmatpush.msrb.mxu3 %v3287_v3  ;;  %855 = vmatpush.msrb.mxu1 %v3287_v3  ;;  %v454_v3 = vld [vmem:[%s3265_s25 + $0x28] sm:$0xff] }
  0x84   : > { %597 = vmatpush.msrb.mxu0 %v3303_v7 }
  0x85   : > { %548 = vmatmul.f32.gmra.mxu0 %v3422_v35  ;;  %726 = vmatpush.msrb.mxu3 %v3295_v5 }
  0x86   : > { %560 = vmatmul.f32.gmra.mxu3 %v464_v36  ;;  %598 = vmatpush.msrb.mxu0 %v3311_v9 }
  0x87   : > { %625 = vmatmul.f32.gmra.mxu1 %v464_v36  ;;  %727 = vmatpush.msrb.mxu3 %v3303_v7 }
  0x88   : > { %599 = vmatpush.msrb.mxu0 %v3319_v11  ;;  %690 = vmatmul.f32.gmra.mxu2 %v3430_v37 }
  0x89   : > { %728 = vmatpush.msrb.mxu3 %v3311_v9  ;;  %856 = vmatpush.msrb.mxu1 %v3295_v5  ;;  %v457_v5 = vld [vmem:[%s3265_s25 + $0x40] sm:$0xff] }
  0x8a   : > { %600 = vmatpush.msrb.mxu0 %v3327_v13 }
  0x8b   : > { %729 = vmatpush.msrb.mxu3 %v3319_v11  ;;  %857 = vmatpush.msrb.mxu1 %v3303_v7  ;;  %v460_v7 = vld [vmem:[%s3265_s25 + $0x58] sm:$0xff] }
  0x8c   : > { %601 = vmatpush.msrb.mxu0 %v3335_v15 }
  0x8d   : > { %551 = vmatmul.f32.gmra.mxu0 %v3441_v38  ;;  %730 = vmatpush.msrb.mxu3 %v3327_v13 }
  0x8e   : > { %563 = vmatmul.f32.gmra.mxu3 %v467_v39  ;;  %602 = vmatpush.msrb.mxu0 %v3343_v17 }
  0x8f   : > { %628 = vmatmul.f32.gmra.mxu1 %v467_v39  ;;  %731 = vmatpush.msrb.mxu3 %v3335_v15  ;;  %v1214_v39 = vld [vmem:[#allocation8 + $0x38] sm:$0xff] }
  0x90   : > { %603 = vmatpush.msrb.mxu0 %v3351_v19  ;;  %693 = vmatmul.f32.gmra.mxu2 %v3449_v40 }
  0x91   : > { %732 = vmatpush.msrb.mxu3 %v3343_v17  ;;  %858 = vmatpush.msrb.mxu1 %v3311_v9  ;;  %v1234_v9 = vld [vmem:[#allocation8 + $0xd8] sm:$0xff] }
  0x92   : > { %604 = vmatpush.msrb.mxu0 %v3359_v21 }
  0x93   : > { %859 = vmatpush.msrb.mxu1 %v3319_v11  ;;  %733 = vmatpush.msrb.mxu3 %v3351_v19  ;;  %v463_v11 = vld [vmem:[%s3265_s25 + $0x70] sm:$0xff] }
  0x94   : > { %605 = vmatpush.msrb.mxu0 %v3367_v23 }
  0x95   : > { %554 = vmatmul.f32.gmra.mxu0 %v458_v41  ;;  %860 = vmatpush.msrb.mxu1 %v3327_v13  ;;  %v1233_v13 = vld [vmem:[#allocation8 + $0xd0] sm:$0xff] }
  0x96   : > { %566 = vmatmul.f32.gmra.mxu3 %v470_v42  ;;  %606 = vmatpush.msrb.mxu0 %v3375_v25 }
  0x97   : > { %631 = vmatmul.f32.gmra.mxu1 %v470_v42  ;;  %734 = vmatpush.msrb.mxu3 %v3359_v21 }
  0x98   : > { %607 = vmatpush.msrb.mxu0 %v3383_v27  ;;  %696 = vmatmul.f32.gmra.mxu2 %v3465_v43 }
  0x99   : > { %861 = vmatpush.msrb.mxu1 %v3335_v15  ;;  %735 = vmatpush.msrb.mxu3 %v3367_v23 }
  0x9a   : > { %608 = vmatpush.msrb.mxu0 %v3391_v29 }
  0x9b   : > { %862 = vmatpush.msrb.mxu1 %v3343_v17  ;;  %736 = vmatpush.msrb.mxu3 %v3375_v25  ;;  %v1220_v17 = vld [vmem:[#allocation8 + $0x68] sm:$0xff] }
  0x9c   : > { %609 = vmatpush.msrb.mxu0 %v3399_v31 }
  0x9d   : > { %610 = vmatmul.f32.vlgmr.msrb.gmra.mxu0 %v3402_v32  ;;  %863 = vmatpush.msrb.mxu1 %v3351_v19  ;;  %v1232_v19 = vld [vmem:[#allocation8 + $0xc8] sm:$0xff]  ;;  %v475_v32 = vld [vmem:[%s3265_s25 + $0xd0] sm:$0xff] }
  0x9e   : > { %569 = vmatmul.f32.gmra.mxu3 %v473_v44  ;;  %659 = vmatpush.msra.mxu0 %v3279_v0 }
  0x9f   : > { %634 = vmatmul.f32.gmra.mxu1 %v473_v44  ;;  %737 = vmatpush.msrb.mxu3 %v3383_v27  ;;  %v1213_v44 = vld [vmem:[#allocation8 + $0x30] sm:$0xff] }
  0xa0   : > { %660 = vmatpush.msra.mxu0 %v3283_v2  ;;  %699 = vmatmul.f32.gmra.mxu2 %v3481_v45 }
  0xa1   : > { %864 = vmatpush.msrb.mxu1 %v3359_v21  ;;  %738 = vmatpush.msrb.mxu3 %v3391_v29 }
  0xa2   : > { %661 = vmatpush.msra.mxu0 %v3290_v4 }
  0xa3   : > { %865 = vmatpush.msrb.mxu1 %v3367_v23  ;;  %739 = vmatpush.msrb.mxu3 %v3399_v31  ;;  %v1218_v23 = vld [vmem:[#allocation8 + $0x58] sm:$0xff] }
  0xa4   : > { %662 = vmatpush.msra.mxu0 %v3298_v6 }
  0xa5   : > { %613 = vmatmul.f32.gmra.mxu0 %v3422_v35  ;;  %866 = vmatpush.msrb.mxu1 %v3375_v25  ;;  %v1229_v35 = vld [vmem:[#allocation8 + $0xb0] sm:$0xff] }
  0xa6   : > { %572 = vmatmul.f32.gmra.mxu3 %v476_v46  ;;  %663 = vmatpush.msra.mxu0 %v3306_v8 }
  0xa7   : > { %637 = vmatmul.f32.gmra.mxu1 %v476_v46 }
  0xa8   : > { %664 = vmatpush.msra.mxu0 %v3314_v10  ;;  %702 = vmatmul.f32.gmra.mxu2 %v3497_v47 }
  0xa9   : > { %867 = vmatpush.msrb.mxu1 %v3383_v27  ;;  %v472_v27 = vld [vmem:[%s3265_s25 + $0xb8] sm:$0xff] }
  0xaa   : > { %665 = vmatpush.msra.mxu0 %v3322_v12 }
  0xab   : > { %868 = vmatpush.msrb.mxu1 %v3391_v29  ;;  %v1230_v29 = vld [vmem:[#allocation8 + $0xb8] sm:$0xff] }
  0xac   : > { %666 = vmatpush.msra.mxu0 %v3330_v14 }
  0xad   : > { %616 = vmatmul.f32.gmra.mxu0 %v3441_v38  ;;  %869 = vmatpush.msrb.mxu1 %v3399_v31  ;;  %v478_v38 = vld [vmem:[%s3265_s25 + $0xe8] sm:$0xff] }
  0xae   : > { %575 = vmatmul.f32.gmra.mxu3 %v479_v48  ;;  %667 = vmatpush.msra.mxu0 %v3338_v16 }
  0xaf   : > { %640 = vmatmul.f32.gmra.mxu1 %v479_v48  ;;  %v484_v48 = vld [vmem:[%s3265_s25 + $0x118] sm:$0xff] }
  0xb0   : > { %668 = vmatpush.msra.mxu0 %v3346_v18  ;;  %705 = vmatmul.f32.gmra.mxu2 %v3510_v49 }
  0xb2   : > { %669 = vmatpush.msra.mxu0 %v3354_v20 }
  0xb4   : > { %670 = vmatpush.msra.mxu0 %v3362_v22 }
  0xb5   : > { %619 = vmatmul.f32.gmra.mxu0 %v458_v41 }
  0xb6   : > { %578 = vmatmul.f32.gmra.mxu3 %v482_v50  ;;  %671 = vmatpush.msra.mxu0 %v3370_v24 }
  0xb7   : > { %643 = vmatmul.f32.gmra.mxu1 %v482_v50  ;;  %v1212_v50 = vld [vmem:[#allocation8 + $0x28] sm:$0xff] }
  0xb8   : > { %672 = vmatpush.msra.mxu0 %v3378_v26  ;;  %708 = vmatmul.f32.gmra.mxu2 %v3520_v51 }
  0xba   : > { %673 = vmatpush.msra.mxu0 %v3386_v28 }
  0xbc   : > { %674 = vmatpush.msra.mxu0 %v3394_v30 }
  0xbd   : > { %675 = vmatmul.f32.vlgmr.msra.gmra.mxu0 %v450_v52 }
  0xbe   : > { %581 = vmatmul.f32.gmra.mxu3 %v485_v53  ;;  %789 = vmatpush.msrb.mxu0 %v3279_v0  ;;  %v1238_v0 = vld [vmem:[#allocation8 + $0xf8] sm:$0xff] }
  0xbf   : > { %646 = vmatmul.f32.gmra.mxu1 %v485_v53  ;;  %1308 = vmatpush.msra.mxu3 %v1238_v0  ;;  %v1226_v53 = vld [vmem:[#allocation8 + $0x98] sm:$0xff]  ;;  %v490_v0 = vld [vmem:[%s3265_s25 + $0x148] sm:$0xff] }
  0xc0   : > { %790 = vmatpush.msrb.mxu0 %v3283_v2  ;;  %711 = vmatmul.f32.gmra.mxu2 %v3530_v54  ;;  %v1237_v2 = vld [vmem:[#allocation8 + $0xf0] sm:$0xff] }
  0xc1   : > { %1309 = vmatpush.msra.mxu3 %v1237_v2  ;;  %v1209_v2 = vld [vmem:[#allocation8 + $0x10] sm:$0xff] }
  0xc2   : > { %791 = vmatpush.msrb.mxu0 %v3290_v4  ;;  %v1236_v4 = vld [vmem:[#allocation8 + $0xe8] sm:$0xff] }
  0xc3   : > { %1310 = vmatpush.msra.mxu3 %v1236_v4 }
  0xc4   : > { %792 = vmatpush.msrb.mxu0 %v3298_v6  ;;  %v1235_v6 = vld [vmem:[#allocation8 + $0xe0] sm:$0xff] }
  0xc5   : > { %678 = vmatmul.f32.gmra.mxu0 %v453_v55  ;;  %1311 = vmatpush.msra.mxu3 %v1235_v6  ;;  %v1208_v6 = vld [vmem:[#allocation8 + $0x8] sm:$0xff] }
  0xc6   : > { %584 = vmatmul.f32.gmra.mxu3 %v488_v56  ;;  %793 = vmatpush.msrb.mxu0 %v3306_v8  ;;  %v1222_v8 = vld [vmem:[#allocation8 + $0x78] sm:$0xff] }
  0xc7   : > { %649 = vmatmul.f32.gmra.mxu1 %v488_v56  ;;  %1243 = vmatpush.msrb.mxu2 %v1222_v8  ;;  %v1223_v8 = vld [vmem:[#allocation8 + $0x80] sm:$0xff] }
  0xc8   : > { %794 = vmatpush.msrb.mxu0 %v3314_v10  ;;  %714 = vmatmul.f32.gmra.mxu2 %v3540_v57 }
  0xc9   : > { %1312 = vmatpush.msra.mxu3 %v1234_v9 }
  0xca   : > { %795 = vmatpush.msrb.mxu0 %v3322_v12  ;;  %v1221_v12 = vld [vmem:[#allocation8 + $0x70] sm:$0xff] }
  0xcb   : > { %1244 = vmatpush.msrb.mxu2 %v1221_v12  ;;  %1313 = vmatpush.msra.mxu3 %v1233_v13  ;;  %v496_v12 = vld [vmem:[%s3265_s25 + $0x178] sm:$0xff]  ;;  %v433_v13 = vld [vmem:[%s3255_s22] sm:$0xff] }
  0xcc   : > { %796 = vmatpush.msrb.mxu0 %v3330_v14 }
  0xcd   : > { %681 = vmatmul.f32.gmra.mxu0 %v456_v58  ;;  %1245 = vmatpush.msrb.mxu2 %v1220_v17 }
  0xce   : > { %587 = vmatmul.f32.gmra.mxu3 %v491_v59  ;;  %797 = vmatpush.msrb.mxu0 %v3338_v16  ;;  %v466_v16 = vld [vmem:[%s3265_s25 + $0x88] sm:$0xff] }
  0xcf   : > { %652 = vmatmul.f32.gmra.mxu1 %v491_v59  ;;  %1314 = vmatpush.msra.mxu3 %v1232_v19  ;;  %v1210_v59 = vld [vmem:[#allocation8 + $0x18] sm:$0xff] }
  0xd0   : > { %798 = vmatpush.msrb.mxu0 %v3346_v18  ;;  %717 = vmatmul.f32.gmra.mxu2 %v3550_v60  ;;  %v1219_v18 = vld [vmem:[#allocation8 + $0x60] sm:$0xff] }
  0xd1   : > { %1246 = vmatpush.msrb.mxu2 %v1219_v18 }
  0xd2   : > { %799 = vmatpush.msrb.mxu0 %v3354_v20 }
  0xd3   : > { %1247 = vmatpush.msrb.mxu2 %v1218_v23 }
  0xd4   : > { %800 = vmatpush.msrb.mxu0 %v3362_v22  ;;  %v469_v22 = vld [vmem:[%s3265_s25 + $0xa0] sm:$0xff] }
  0xd5   : > { %684 = vmatmul.f32.gmra.mxu0 %v459_v61 }
  0xd6   : > { %590 = vmatmul.f32.gmra.mxu3 %v494_v62  ;;  %801 = vmatpush.msrb.mxu0 %v3370_v24  ;;  %v1231_v24 = vld [vmem:[#allocation8 + $0xc0] sm:$0xff] }
  0xd7   : > { %655 = vmatmul.f32.gmra.mxu1 %v494_v62  ;;  %1315 = vmatpush.msra.mxu3 %v1231_v24  ;;  %v434_v24 = vld [vmem:[%s3255_s22 + $0x8] sm:$0xff] }
  0xd8   : > { %802 = vmatpush.msrb.mxu0 %v3378_v26  ;;  %720 = vmatmul.f32.gmra.mxu2 %v3560_v63 }
  0xd9   : > { %1316 = vmatpush.msra.mxu3 %v1230_v29 }
  0xda   : > { %803 = vmatpush.msrb.mxu0 %v3386_v28  ;;  %v1217_v28 = vld [vmem:[#allocation8 + $0x50] sm:$0xff] }
  0xdb   : > { %1248 = vmatpush.msrb.mxu2 %v1217_v28  ;;  %1317 = vmatpush.msra.mxu3 %v1229_v35 }
  0xdc   : > { %804 = vmatpush.msrb.mxu0 %v3394_v30 }
  0xdd   : > { %805 = vmatmul.f32.vlgmr.msrb.gmra.mxu0 %v451_v1  ;;  %1249 = vmatpush.msrb.mxu2 %v1216_v33 }
  0xde   : > { %740 = vmatmul.f32.vlgmr.msrb.gmra.mxu3 %v450_v52  ;;  %v1211_v52 = vld [vmem:[#allocation8 + $0x20] sm:$0xff] }
  0xdf   : > { %870 = vmatmul.f32.vlgmr.msrb.gmra.mxu1 %v451_v1 }
  0xe5   : > { %808 = vmatmul.f32.gmra.mxu0 %v454_v3 }
  0xe6   : > { %743 = vmatmul.f32.gmra.mxu3 %v453_v55 }
  0xe7   : > { %873 = vmatmul.f32.gmra.mxu1 %v454_v3  ;;  %v1224_v3 = vld [vmem:[#allocation8 + $0x88] sm:$0xff] }
  0xed   : > { %811 = vmatmul.f32.gmra.mxu0 %v457_v5 }
  0xee   : > { %746 = vmatmul.f32.gmra.mxu3 %v456_v58  ;;  %v487_v58 = vld [vmem:[%s3265_s25 + $0x130] sm:$0xff] }
  0xef   : > { %876 = vmatmul.f32.gmra.mxu1 %v457_v5  ;;  %v493_v5 = vld [vmem:[%s3265_s25 + $0x160] sm:$0xff] }
  0xf5   : > { %814 = vmatmul.f32.gmra.mxu0 %v460_v7 }
  0xf6   : > { %749 = vmatmul.f32.gmra.mxu3 %v459_v61  ;;  %v1225_v61 = vld [vmem:[#allocation8 + $0x90] sm:$0xff] }
  0xf7   : > { %879 = vmatmul.f32.gmra.mxu1 %v460_v7 }
  0xfa   : > { %v3571_v10 = vpop.f32.mrf.mxu0 }
  0xfb   : > { %v919_v17 = vmul.f32 %v3571_v10, %v3571_v10 }
  0xfd   : > { %817 = vmatmul.f32.gmra.mxu0 %v463_v11 }
  0xfe   : > { %752 = vmatmul.f32.gmra.mxu3 %v3412_v34  ;;  %v1215_v34 = vld [vmem:[#allocation8 + $0x40] sm:$0xff] }
  0xff   : > { %882 = vmatmul.f32.gmra.mxu1 %v463_v11  ;;  %1250 = vmatpush.msrb.mxu2 %v1215_v34 }
 0x101   : > { %v3575_v14 = vpop.f32.mrf.mxu3  ;;  %1251 = vmatpush.msrb.mxu2 %v1214_v39 }
 0x102   : > { %v3577_v15 = vpop.f32.mrf.mxu0 }
 0x103   : > { %1252 = vmatpush.msrb.mxu2 %v1213_v44 }
 0x105   : > { %820 = vmatmul.f32.gmra.mxu0 %v466_v16  ;;  %1253 = vmatpush.msrb.mxu2 %v1212_v50 }
 0x106   : > { %755 = vmatmul.f32.gmra.mxu3 %v3430_v37 }
 0x107   : > { %885 = vmatmul.f32.gmra.mxu1 %v466_v16  ;;  %1254 = vmatpush.msrb.mxu2 %v1211_v52 }
 0x109   : > { %v3581_v20 = vpop.f32.mrf.mxu3  ;;  %1255 = vmatpush.msrb.mxu2 %v1210_v59 }
 0x10a   : > { %v3583_v21 = vpop.f32.mrf.mxu0 }
 0x10b   : > { %1256 = vmatpush.msrb.mxu2 %v1209_v2  ;;  %v921_v52 = vmul.f32 %v3583_v21, %v3583_v21 }
 0x10d   : > { %823 = vmatmul.f32.gmra.mxu0 %v469_v22  ;;  %1257 = vmatpush.msrb.mxu2 %v1208_v6 }
 0x10e   : > { %758 = vmatmul.f32.gmra.mxu3 %v3449_v40  ;;  %v1228_v40 = vld [vmem:[#allocation8 + $0xa8] sm:$0xff] }
 0x10f   : > { %888 = vmatmul.f32.gmra.mxu1 %v469_v22  ;;  %1318 = vmatpush.msra.mxu3 %v1228_v40  ;;  %v435_v40 = vld [vmem:[%s3255_s22 + $0x10] sm:$0xff] }
 0x111   : > { %v3587_v25 = vpop.f32.mrf.mxu3 }
 0x112   : > { %4587 = vst [vmem:[#allocation26_spill] sm:$0xff] %v3587_v25  ;;  %v3589_v26 = vpop.f32.mrf.mxu0 }
 0x115   : > { %826 = vmatmul.f32.gmra.mxu0 %v472_v27 }
 0x116   : > { %761 = vmatmul.f32.gmra.mxu3 %v3465_v43  ;;  %v481_v43 = vld [vmem:[%s3265_s25 + $0x100] sm:$0xff] }
 0x117   : > { %891 = vmatmul.f32.gmra.mxu1 %v472_v27  ;;  %v3661_v27 = vpop.f32.mrf.mxu2 }
 0x119   : > { %v3593_v30 = vpop.f32.mrf.mxu3 }
 0x11a   : > { %4588 = vst [vmem:[#allocation27_spill] sm:$0xff] %v3593_v30  ;;  %v3595_v31 = vpop.f32.mrf.mxu0 }
 0x11d   : > { %829 = vmatmul.f32.gmra.mxu0 %v475_v32 }
 0x11e   : > { %764 = vmatmul.f32.gmra.mxu3 %v3481_v45  ;;  %v1227_v45 = vld [vmem:[#allocation8 + $0xa0] sm:$0xff] }
 0x11f   : > { %894 = vmatmul.f32.gmra.mxu1 %v475_v32  ;;  %1319 = vmatpush.msra.mxu3 %v1227_v45  ;;  %v920_v32 = vmul.f32 %v3577_v15, %v3577_v15 }
 0x121   : > { %v3599_v36 = vpop.f32.mrf.mxu3  ;;  %1320 = vmatpush.msra.mxu3 %v1226_v53 }
 0x122   : > { %4589 = vst [vmem:[#allocation28_spill] sm:$0xff] %v3599_v36  ;;  %v3601_v37 = vpop.f32.mrf.mxu0 }
 0x123   : > { %1321 = vmatpush.msra.mxu3 %v1225_v61 }
 0x125   : > { %832 = vmatmul.f32.gmra.mxu0 %v478_v38  ;;  %1322 = vmatpush.msra.mxu3 %v1224_v3 }
 0x126   : > { %767 = vmatmul.f32.gmra.mxu3 %v3497_v47 }
 0x127   : > { %897 = vmatmul.f32.gmra.mxu1 %v478_v38  ;;  %1323 = vmatpush.msra.mxu3 %v1223_v8 }
 0x129   : > { %v3605_v41 = vpop.f32.mrf.mxu3 }
 0x12a   : > { %4590 = vst [vmem:[#allocation29_spill] sm:$0xff] %v3605_v41  ;;  %v3607_v42 = vpop.f32.mrf.mxu0 }
 0x12d   : > { %835 = vmatmul.f32.gmra.mxu0 %v481_v43 }
 0x12e   : > { %770 = vmatmul.f32.gmra.mxu3 %v3510_v49  ;;  %v3617_v49 = vpop.f32.mrf.mxu1 }
 0x12f   : > { %900 = vmatmul.f32.gmra.mxu1 %v481_v43 }
 0x131   : > { %v3611_v46 = vpop.f32.mrf.mxu3 }
 0x132   : > { %4591 = vst [vmem:[#allocation30_spill] sm:$0xff] %v3611_v46  ;;  %v3613_v47 = vpop.f32.mrf.mxu0 }
 0x135   : > { %838 = vmatmul.f32.gmra.mxu0 %v484_v48 }
 0x136   : > { %773 = vmatmul.f32.gmra.mxu3 %v3520_v51  ;;  %v3630_v1 = vpop.f32.mrf.mxu1 }
 0x137   : > { %903 = vmatmul.f32.gmra.mxu1 %v484_v48  ;;  %v3676_v48 = vpop.f32.mrf.mxu2 }
 0x139   : > { %v3619_v55 = vpop.f32.mrf.mxu3 }
 0x13a   : > { %4592 = vst [vmem:[#allocation31_spill] sm:$0xff] %v3619_v55  ;;  %v3621_v56 = vpop.f32.mrf.mxu0 }
 0x13d   : > { %841 = vmatmul.f32.gmra.mxu0 %v487_v58 }
 0x13e   : > { %776 = vmatmul.f32.gmra.mxu3 %v3530_v54  ;;  %v3638_v7 = vpop.f32.mrf.mxu1 }
 0x13f   : > { %906 = vmatmul.f32.gmra.mxu1 %v487_v58  ;;  %4595 = vst [vmem:[#allocation34_spill] sm:$0xff] %v3638_v7 }
 0x141   : > { %v3625_v51 = vpop.f32.mrf.mxu3 }
 0x142   : > { %4593 = vst [vmem:[#allocation32_spill] sm:$0xff] %v3625_v51  ;;  %v3627_v62 = vpop.f32.mrf.mxu0 }
 0x143   : > { %v936_v28 = vmul.f32 %v3627_v62, %v3627_v62 }
 0x145   : > { %844 = vmatmul.f32.gmra.mxu0 %v490_v0  ;;  %v952_v35 = vadd.f32 %v936_v28, %v920_v32 }
 0x146   : > { %779 = vmatmul.f32.gmra.mxu3 %v3540_v57  ;;  %v1207_v57 = vld [vmem:[#allocation8] sm:$0xff]  ;;  %v3648_v16 = vpop.f32.mrf.mxu1 }
 0x147   : > { %909 = vmatmul.f32.gmra.mxu1 %v490_v0  ;;  %1258 = vmatpush.msrb.mxu2 %v1207_v57  ;;  %4597 = vst [vmem:[#allocation36_spill] sm:$0xff] %v3648_v16  ;;  %v926_v16 = vmul.f32 %v3593_v30, %v3593_v30 }
 0x148   : > { %1259 = vmatmul.f32.vlgmr.msrb.gmra.mxu2 %v433_v13 }
 0x149   : > { %v3633_v54 = vpop.f32.mrf.mxu3 }
 0x14a   : > { %4594 = vst [vmem:[#allocation33_spill] sm:$0xff] %v3633_v54  ;;  %v3635_v4 = vpop.f32.mrf.mxu0 }
 0x14b   : > { %v937_v44 = vmul.f32 %v3635_v4, %v3635_v4 }
 0x14d   : > { %847 = vmatmul.f32.gmra.mxu0 %v493_v5  ;;  %v953_v61 = vadd.f32 %v937_v44, %v921_v52 }
 0x14e   : > { %782 = vmatmul.f32.gmra.mxu3 %v3550_v60  ;;  %v935_v60 = vmul.f32 %v3621_v56, %v3621_v56 }
 0x14f   : > { %912 = vmatmul.f32.gmra.mxu1 %v493_v5  ;;  %v436_v5 = vld [vmem:[%s3255_s22 + $0x18] sm:$0xff] }
 0x150   : > { %v951_v22 = vadd.f32 %v935_v60, %v919_v17  ;;  %1262 = vmatmul.f32.gmra.mxu2 %v434_v24  ;;  %v922_v17 = vmul.f32 %v3589_v26, %v3589_v26 }
 0x151   : > { %v3641_v9 = vpop.f32.mrf.mxu3 }
 0x152   : > { %4596 = vst [vmem:[#allocation35_spill] sm:$0xff] %v3641_v9  ;;  %v3643_v11 = vpop.f32.mrf.mxu0 }
 0x153   : > { %v938_v8 = vmul.f32 %v3643_v11, %v3643_v11 }
 0x155   : > { %850 = vmatmul.f32.gmra.mxu0 %v496_v12  ;;  %v954_v32 = vadd.f32 %v938_v8, %v922_v17 }
 0x156   : > { %785 = vmatmul.f32.gmra.mxu3 %v3560_v63 }
 0x157   : > { %915 = vmatmul.f32.gmra.mxu1 %v496_v12 }
 0x158   : > { %1265 = vmatmul.f32.gmra.mxu2 %v435_v40 }
 0x159   : > { %v3654_v18 = vpop.f32.mrf.mxu3 }
 0x15a   : > { %4598 = vst [vmem:[#allocation37_spill] sm:$0xff] %v3654_v18  ;;  %v3656_v19 = vpop.f32.mrf.mxu0 }
 0x15b   : > { %v967_v23 = vmul.f32 %v3656_v19, %v3656_v19 }
 0x15d   : > { %v983_v63 = vadd.f32 %v967_v23, %v951_v22  ;;  %v3696_v23 = vpop.f32.mrf.mxu2 }
 0x15e   : > { %4599 = vst [vmem:[#allocation38_spill] sm:$0xff] %v3696_v23 }
 0x15f   : > { %v999_v29 = vadd.f32 1e-08, %v983_v63 }
 0x160   : > { %1268 = vmatmul.f32.gmra.mxu2 %v436_v5 }
 0x161   : > { %v3667_v33 = vpop.f32.mrf.mxu3  ;;  %2622 = vrsqrt.f32 %v999_v29  ;;  %vm1022_vm0 = vcmp.eq.f32.partialorder %v999_v29, inf  ;;  %vm1024_vm1 = vcmp.eq.f32.partialorder %v999_v29, 0.0 }
 0x162   : > { %v3669_v34 = vpop.f32.mrf.mxu0 }
 0x163   : > { %v968_v38 = vmul.f32 %v3669_v34, %v3669_v34 }
 0x165   : > { %v984_v39 = vadd.f32 %v968_v38, %v952_v35  ;;  %v1025_v38 = vand.u32 2147483648, %v999_v29 }
 0x167   : > { %v2623_v43 = vpop.eup %2622  ;;  %v1000_v45 = vadd.f32 1e-08, %v984_v39 }
 0x168   : > { %v1016_v50 = vmul.f32 %v2623_v43, %v999_v29 }
 0x169   : > { %v3680_v53 = vpop.f32.mrf.mxu3  ;;  %2624 = vrsqrt.f32 %v1000_v45  ;;  %vm1034_vm2 = vcmp.eq.f32.partialorder %v1000_v45, inf  ;;  %vm1036_vm3 = vcmp.eq.f32.partialorder %v1000_v45, 0.0 }
 0x16a   : > { %v3682_v58 = vpop.f32.mrf.mxu0  ;;  %v1017_v59 = vmul.f32 %v2623_v43, %v1016_v50  ;;  %v437_v50 = vld [vmem:[%s3255_s22 + $0x20] sm:$0xff] }
 0x16b   : > { %v969_v0 = vmul.f32 %v3682_v58, %v3682_v58  ;;  %1271 = vmatmul.f32.gmra.mxu2 %v437_v50  ;;  %v940_v50 = vmul.f32 %v3676_v48, %v3676_v48 }
 0x16c   : > { %v1018_v2 = vmul.f32 0.5, %v1017_v59 }
 0x16d   : > { %v985_v3 = vadd.f32 %v969_v0, %v953_v61  ;;  %v923_v61 = vmul.f32 %v3575_v14, %v3575_v14  ;;  %v939_v0 = vmul.f32 %v3661_v27, %v3661_v27 }
 0x16e   : > { %v1019_v6 = vsub.f32 1.5, %v1018_v2 }
 0x16f   : > { %v2625_v57 = vpop.eup %2624  ;;  %v3689_v12 = vadd.f32 1e-08, %v985_v3 }
 0x170   : > { %v1020_v13 = vmul.f32 %v2623_v43, %v1019_v6  ;;  %v1028_v60 = vmul.f32 %v2625_v57, %v1000_v45 }
 0x171   : > { %v3693_v22 = vpop.f32.mrf.mxu3  ;;  %2626 = vrsqrt.f32 %v3689_v12  ;;  %vm1046_vm4 = vcmp.eq.f32.partialorder %v3689_v12, inf  ;;  %vm1048_vm5 = vcmp.eq.f32.partialorder %v3689_v12, 0.0 }
 0x172   : > { %v3698_v63 = vpop.f32.mrf.mxu0  ;;  %v1021_v24 = vmul.f32 %v1020_v13, %v999_v29  ;;  %v1029_v28 = vmul.f32 %v2625_v57, %v1028_v60  ;;  %v955_v60 = vadd.f32 %v939_v0, %v923_v61  ;;  %v1740_v61 = vld [vmem:[#allocation10 + $0x178] sm:$0xff] }
 0x173   : > { %v970_v35 = vmul.f32 %v3698_v63, %v3698_v63  ;;  %1879 = vmatpush.msra.mxu2 %v1740_v61 }
 0x174   : > { %v1023_v39 = vsel %vm1022_vm0, %v999_v29, %v1021_v24  ;;  %v1030_v40 = vmul.f32 0.5, %v1029_v28  ;;  %v1037_v24 = vand.u32 2147483648, %v1000_v45  ;;  %v3717_v28 = vpop.f32.mrf.mxu2 }
 0x175   : > { %v986_v43 = vadd.f32 %v970_v35, %v954_v32  ;;  %v1026_v44 = vsel %vm1024_vm1, %v1025_v38, %v1023_v39  ;;  %4600 = vst [vmem:[#allocation39_spill] sm:$0xff] %v3717_v28  ;;  %v438_v39 = vld [vmem:[%s3255_s22 + $0x28] sm:$0xff] }
 0x176   : > { %1324 = vmatmul.f32.vlgmr.msra.gmra.mxu3 %v1026_v44  ;;  %v1031_v52 = vsub.f32 1.5, %v1030_v40  ;;  %1274 = vmatmul.f32.gmra.mxu2 %v438_v39  ;;  %v924_v44 = vmul.f32 %v3581_v20, %v3581_v20 }
 0x177   : > { %v2627_v59 = vpop.eup %2626  ;;  %v3707_v2 = vadd.f32 1e-08, %v986_v43 }
 0x178   : > { %v1032_v3 = vmul.f32 %v2625_v57, %v1031_v52  ;;  %v1040_v5 = vmul.f32 %v2627_v59, %v3689_v12 }
 0x179   : > { %v3710_v29 = vpop.f32.mrf.mxu3  ;;  %2628 = vrsqrt.f32 %v3707_v2  ;;  %vm1058_vm6 = vcmp.eq.f32.partialorder %v3707_v2, inf  ;;  %vm1060_vm7 = vcmp.eq.f32.partialorder %v3707_v2, 0.0 }
 0x17a   : > { %v3713_v6 = vpop.f32.mrf.mxu0  ;;  %v1033_v8 = vmul.f32 %v1032_v3, %v1000_v45  ;;  %v1041_v13 = vmul.f32 %v2627_v59, %v1040_v5 }
 0x17b   : > { %v971_v17 = vmul.f32 %v3713_v6, %v3713_v6 }
 0x17c   : > { %v1035_v57 = vsel %vm1034_vm2, %v1000_v45, %v1033_v8  ;;  %v1042_v32 = vmul.f32 0.5, %v1041_v13  ;;  %v956_v13 = vadd.f32 %v940_v50, %v924_v44  ;;  %v3740_v44 = vpop.f32.mrf.mxu2 }
 0x17d   : > { %v987_v35 = vadd.f32 %v971_v17, %v955_v60  ;;  %v1038_v38 = vsel %vm1036_vm3, %v1037_v24, %v1035_v57  ;;  %4602 = vst [vmem:[#allocation41_spill] sm:$0xff] %v3740_v44 }
 0x17e   : > { %1327 = vmatmul.f32.gmra.mxu3 %v1038_v38  ;;  %v1043_v40 = vsub.f32 1.5, %v1042_v32  ;;  %v1738_v32 = vld [vmem:[#allocation10 + $0x168] sm:$0xff] }
 0x17f   : > { %v2629_v43 = vpop.eup %2628  ;;  %v3724_v52 = vadd.f32 1e-08, %v987_v35  ;;  %v1739_v35 = vld [vmem:[#allocation10 + $0x170] sm:$0xff]  ;;  %1749 = vmatpush.msra.mxu0 %v1738_v32 }
 0x180   : > { %v1044_v0 = vmul.f32 %v2627_v59, %v1043_v40  ;;  %v1052_v45 = vmul.f32 %v2629_v43, %v3707_v2  ;;  %v1049_v59 = vand.u32 2147483648, %v3689_v12  ;;  %1814 = vmatpush.msra.mxu1 %v1739_v35  ;;  %v439_v40 = vld [vmem:[%s3255_s22 + $0x30] sm:$0xff]  ;;  %v1061_v35 = vand.u32 2147483648, %v3707_v2 }
 0x181   : > { %2630 = vrsqrt.f32 %v3724_v52  ;;  %v3731_v60 = vpop.f32.mrf.mxu3  ;;  %1277 = vmatmul.f32.gmra.mxu2 %v439_v40  ;;  %v1736_v40 = vld [vmem:[#allocation10 + $0x158] sm:$0xff]  ;;  %vm1070_vm8 = vcmp.eq.f32.partialorder %v3724_v52, inf  ;;  %vm1072_vm9 = vcmp.eq.f32.partialorder %v3724_v52, 0.0 }
 0x182   : > { %v3728_v3 = vpop.f32.mrf.mxu0  ;;  %v1045_v5 = vmul.f32 %v1044_v0, %v3689_v12  ;;  %v1053_v8 = vmul.f32 %v2629_v43, %v1052_v45  ;;  %v925_v0 = vmul.f32 %v3587_v25, %v3587_v25  ;;  %1815 = vmatpush.msra.mxu1 %v1736_v40 }
 0x183   : > { %4601 = vst [vmem:[#allocation40_spill] sm:$0xff] %v3728_v3  ;;  %v972_v17 = vmul.f32 %v3728_v3, %v3728_v3 }
 0x184   : > { %v1047_v24 = vsel %vm1046_vm4, %v3689_v12, %v1045_v5  ;;  %v1054_v57 = vmul.f32 0.5, %v1053_v8  ;;  %v941_v12 = vmul.f32 %v3696_v23, %v3696_v23  ;;  %v1737_v5 = vld [vmem:[#allocation10 + $0x160] sm:$0xff] }
 0x185   : > { %v988_v38 = vadd.f32 %v972_v17, %v956_v13  ;;  %v1050_v39 = vsel %vm1048_vm5, %v1049_v59, %v1047_v24  ;;  %1880 = vmatpush.msra.mxu2 %v1737_v5 }
 0x186   : > { %1330 = vmatmul.f32.gmra.mxu3 %v1050_v39  ;;  %v1055_v50 = vsub.f32 1.5, %v1054_v57  ;;  %v957_v57 = vadd.f32 %v941_v12, %v925_v0  ;;  %v1735_v39 = vld [vmem:[#allocation10 + $0x150] sm:$0xff]  ;;  %v440_v0 = vld [vmem:[%s3255_s22 + $0x38] sm:$0xff] }
 0x187   : > { %v2631_v61 = vpop.eup %2630  ;;  %v3746_v45 = vadd.f32 1e-08, %v988_v38  ;;  %1750 = vmatpush.msra.mxu0 %v1735_v39 }
 0x188   : > { %v1056_v8 = vmul.f32 %v2629_v43, %v1055_v50  ;;  %v1064_v13 = vmul.f32 %v2631_v61, %v3724_v52 }
 0x189   : > { %2632 = vrsqrt.f32 %v3746_v45  ;;  %v3759_v50 = vpop.f32.mrf.mxu3  ;;  %1280 = vmatmul.f32.gmra.mxu2 %v440_v0  ;;  %v1732_v0 = vld [vmem:[#allocation10 + $0x138] sm:$0xff]  ;;  %vm1082_vm10 = vcmp.eq.f32.partialorder %v3746_v45, inf  ;;  %vm1084_vm11 = vcmp.eq.f32.partialorder %v3746_v45, 0.0 }
 0x18a   : > { %v3750_v17 = vpop.f32.mrf.mxu0  ;;  %v1057_v59 = vmul.f32 %v1056_v8, %v3707_v2  ;;  %v1065_v24 = vmul.f32 %v2631_v61, %v1064_v13  ;;  %1751 = vmatpush.msra.mxu0 %v1732_v0 }
 0x18b   : > { %4603 = vst [vmem:[#allocation42_spill] sm:$0xff] %v3750_v17  ;;  %v973_v32 = vmul.f32 %v3750_v17, %v3750_v17  ;;  %v3768_v17 = vpop.f32.mrf.mxu2 }
 0x18c   : > { %v1059_v43 = vsel %vm1058_vm6, %v3707_v2, %v1057_v59  ;;  %v1066_v38 = vmul.f32 0.5, %v1065_v24  ;;  %v942_v2 = vmul.f32 %v3717_v28, %v3717_v28  ;;  %v1734_v24 = vld [vmem:[#allocation10 + $0x148] sm:$0xff]  ;;  %4604 = vst [vmem:[#allocation43_spill] sm:$0xff] %v3768_v17 }
 0x18d   : > { %v989_v5 = vadd.f32 %v973_v32, %v957_v57  ;;  %v1062_v8 = vsel %vm1060_vm7, %v1061_v35, %v1059_v43  ;;  %1881 = vmatpush.msra.mxu2 %v1734_v24 }
 0x18e   : > { %1333 = vmatmul.f32.gmra.mxu3 %v1062_v8  ;;  %v1067_v12 = vsub.f32 1.5, %v1066_v38  ;;  %v958_v39 = vadd.f32 %v942_v2, %v926_v16 }
 0x18f   : > { %v2633_v13 = vpop.eup %2632  ;;  %v3766_v59 = vadd.f32 1e-08, %v989_v5  ;;  %v1073_v5 = vand.u32 2147483648, %v3724_v52 }
 0x190   : > { %v1068_v57 = vmul.f32 %v2631_v61, %v1067_v12  ;;  %v1076_v32 = vmul.f32 %v2633_v13, %v3746_v45  ;;  %v1733_v12 = vld [vmem:[#allocation10 + $0x140] sm:$0xff] }
 0x191   : > { %2634 = vrsqrt.f32 %v3766_v59  ;;  %1816 = vmatpush.msra.mxu1 %v1733_v12  ;;  %vm1094_vm12 = vcmp.eq.f32.partialorder %v3766_v59, inf  ;;  %vm1096_vm13 = vcmp.eq.f32.partialorder %v3766_v59, 0.0 }
 0x192   : > { %v3772_v35 = vpop.f32.mrf.mxu0  ;;  %v1069_v43 = vmul.f32 %v1068_v57, %v3724_v52  ;;  %v1077_v38 = vmul.f32 %v2633_v13, %v1076_v32  ;;  %v441_v57 = vld [vmem:[%s3255_s22 + $0x40] sm:$0xff]  ;;  %v927_v32 = vmul.f32 %v3599_v36, %v3599_v36 }
 0x193   : > { %4605 = vst [vmem:[#allocation44_spill] sm:$0xff] %v3772_v35  ;;  %v974_v40 = vmul.f32 %v3772_v35, %v3772_v35  ;;  %1283 = vmatmul.f32.gmra.mxu2 %v441_v57  ;;  %v3786_v35 = vpop.f32.mrf.mxu3 }
 0x194   : > { %v1071_v61 = vsel %vm1070_vm8, %v3724_v52, %v1069_v43  ;;  %v1078_v8 = vmul.f32 0.5, %v1077_v38  ;;  %v943_v43 = vmul.f32 %v3740_v44, %v3740_v44  ;;  %4606 = vst [vmem:[#allocation45_spill] sm:$0xff] %v3786_v35  ;;  %v1731_v38 = vld [vmem:[#allocation10 + $0x130] sm:$0xff] }
 0x195   : > { %v990_v24 = vadd.f32 %v974_v40, %v958_v39  ;;  %v1074_v30 = vsel %vm1072_vm9, %v1073_v5, %v1071_v61  ;;  %1882 = vmatpush.msra.mxu2 %v1731_v38  ;;  %v1730_v38 = vld [vmem:[#allocation10 + $0x128] sm:$0xff] }
 0x196   : > { %1336 = vmatmul.f32.gmra.mxu3 %v1074_v30  ;;  %v1079_v16 = vsub.f32 1.5, %v1078_v8  ;;  %v3792_v30 = vpop.f32.mrf.mxu2  ;;  %v959_v0 = vadd.f32 %v943_v43, %v927_v32  ;;  %1817 = vmatpush.msra.mxu1 %v1730_v38 }
 0x197   : > { %v2635_v2 = vpop.eup %2634  ;;  %v3788_v52 = vadd.f32 1e-08, %v990_v24  ;;  %4607 = vst [vmem:[#allocation46_spill] sm:$0xff] %v3792_v30 }
 0x198   : > { %v1080_v39 = vmul.f32 %v2633_v13, %v1079_v16  ;;  %v1088_v40 = vmul.f32 %v2635_v2, %v3766_v59  ;;  %v1085_v13 = vand.u32 2147483648, %v3746_v45  ;;  %v1729_v16 = vld [vmem:[#allocation10 + $0x120] sm:$0xff] }
 0x199   : > { %2636 = vrsqrt.f32 %v3788_v52  ;;  %1752 = vmatpush.msra.mxu0 %v1729_v16  ;;  %vm1106_vm14 = vcmp.eq.f32.partialorder %v3788_v52, inf  ;;  %vm1108_vm15 = vcmp.eq.f32.partialorder %v3788_v52, 0.0 }
 0x19a   : > { %v3794_v5 = vpop.f32.mrf.mxu0  ;;  %v1081_v61 = vmul.f32 %v1080_v39, %v3746_v45  ;;  %v1089_v8 = vmul.f32 %v2635_v2, %v1088_v40  ;;  %v442_v39 = vld [vmem:[%s3255_s22 + $0x48] sm:$0xff]  ;;  %v928_v40 = vmul.f32 %v3605_v41, %v3605_v41 }
 0x19b   : > { %4608 = vst [vmem:[#allocation47_spill] sm:$0xff] %v3794_v5  ;;  %v975_v12 = vmul.f32 %v3794_v5, %v3794_v5  ;;  %1286 = vmatmul.f32.gmra.mxu2 %v442_v39 }
 0x19c   : > { %v1083_v24 = vsel %vm1082_vm10, %v3746_v45, %v1081_v61  ;;  %v1090_v57 = vmul.f32 0.5, %v1089_v8  ;;  %v944_v61 = vmul.f32 %v3768_v17, %v3768_v17  ;;  %v1728_v45 = vld [vmem:[#allocation10 + $0x118] sm:$0xff] }
 0x19d   : > { %v991_v36 = vadd.f32 %v975_v12, %v959_v0  ;;  %v1086_v44 = vsel %vm1084_vm11, %v1085_v13, %v1083_v24  ;;  %1883 = vmatpush.msra.mxu2 %v1728_v45  ;;  %v3811_v12 = vpop.f32.mrf.mxu3  ;;  %v1727_v45 = vld [vmem:[#allocation10 + $0x110] sm:$0xff] }
 0x19e   : > { %1339 = vmatmul.f32.gmra.mxu3 %v1086_v44  ;;  %v1091_v32 = vsub.f32 1.5, %v1090_v57  ;;  %4609 = vst [vmem:[#allocation48_spill] sm:$0xff] %v3811_v12  ;;  %v960_v57 = vadd.f32 %v944_v61, %v928_v40  ;;  %v3821_v16 = vpop.f32.mrf.mxu2  ;;  %1818 = vmatpush.msra.mxu1 %v1727_v45  ;;  %v443_v40 = vld [vmem:[%s3255_s22 + $0x50] sm:$0xff] }
 0x19f   : > { %v2637_v43 = vpop.eup %2636  ;;  %v3808_v5 = vadd.f32 1e-08, %v991_v36  ;;  %4611 = vst [vmem:[#allocation50_spill] sm:$0xff] %v3821_v16 }
 0x1a0   : > { %v1092_v8 = vmul.f32 %v2635_v2, %v1091_v32  ;;  %v1100_v0 = vmul.f32 %v2637_v43, %v3788_v52  ;;  %v1097_v2 = vand.u32 2147483648, %v3766_v59  ;;  %v1726_v32 = vld [vmem:[#allocation10 + $0x108] sm:$0xff] }
 0x1a1   : > { %2638 = vrsqrt.f32 %v3808_v5  ;;  %1753 = vmatpush.msra.mxu0 %v1726_v32  ;;  %vm1118_vm0 = vcmp.eq.f32.partialorder %v3808_v5, inf  ;;  %vm1120_vm1 = vcmp.eq.f32.partialorder %v3808_v5, 0.0 }
 0x1a2   : > { %v3814_v44 = vpop.f32.mrf.mxu0  ;;  %v1093_v13 = vmul.f32 %v1092_v8, %v3766_v59  ;;  %v1101_v24 = vmul.f32 %v2637_v43, %v1100_v0 }
 0x1a3   : > { %4610 = vst [vmem:[#allocation49_spill] sm:$0xff] %v3814_v44  ;;  %v976_v36 = vmul.f32 %v3814_v44, %v3814_v44  ;;  %1289 = vmatmul.f32.gmra.mxu2 %v443_v40  ;;  %v929_v44 = vmul.f32 %v3611_v46, %v3611_v46 }
 0x1a4   : > { %v1095_v38 = vsel %vm1094_vm12, %v3766_v59, %v1093_v13  ;;  %v1102_v39 = vmul.f32 0.5, %v1101_v24  ;;  %v945_v13 = vmul.f32 %v3792_v30, %v3792_v30  ;;  %v1725_v59 = vld [vmem:[#allocation10 + $0x100] sm:$0xff]  ;;  %v930_v30 = vmul.f32 %v3619_v55, %v3619_v55 }
 0x1a5   : > { %v992_v8 = vadd.f32 %v976_v36, %v960_v57  ;;  %v1098_v41 = vsel %vm1096_vm13, %v1097_v2, %v1095_v38  ;;  %1884 = vmatpush.msra.mxu2 %v1725_v59  ;;  %v3833_v36 = vpop.f32.mrf.mxu1  ;;  %v3839_v32 = vpop.f32.mrf.mxu3  ;;  %v1724_v59 = vld [vmem:[#allocation10 + $0xf8] sm:$0xff] }
 0x1a6   : > { %1342 = vmatmul.f32.gmra.mxu3 %v1098_v41  ;;  %v1103_v61 = vsub.f32 1.5, %v1102_v39  ;;  %4612 = vst [vmem:[#allocation51_spill] sm:$0xff] %v3833_v36  ;;  %v961_v39 = vadd.f32 %v945_v13, %v929_v44  ;;  %1819 = vmatpush.msra.mxu1 %v1724_v59  ;;  %v444_v44 = vld [vmem:[%s3255_s22 + $0x58] sm:$0xff]  ;;  %v3848_v13 = vpop.f32.mrf.mxu2 }
 0x1a7   : > { %v2639_v0 = vpop.eup %2638  ;;  %v3830_v17 = vadd.f32 1e-08, %v992_v8  ;;  %4614 = vst [vmem:[#allocation53_spill] sm:$0xff] %v3839_v32 }
 0x1a8   : > { %v1104_v24 = vmul.f32 %v2637_v43, %v1103_v61  ;;  %v1112_v57 = vmul.f32 %v2639_v0, %v3808_v5  ;;  %v1109_v43 = vand.u32 2147483648, %v3788_v52  ;;  %v1723_v61 = vld [vmem:[#allocation10 + $0xf0] sm:$0xff]  ;;  %4615 = vst [vmem:[#allocation54_spill] sm:$0xff] %v3848_v13 }
 0x1a9   : > { %2640 = vrsqrt.f32 %v3830_v17  ;;  %1754 = vmatpush.msra.mxu0 %v1723_v61  ;;  %vm1130_vm2 = vcmp.eq.f32.partialorder %v3830_v17, inf  ;;  %vm1132_vm3 = vcmp.eq.f32.partialorder %v3830_v17, 0.0 }
 0x1aa   : > { %v3836_v41 = vpop.f32.mrf.mxu0  ;;  %v1105_v2 = vmul.f32 %v1104_v24, %v3788_v52  ;;  %v1113_v38 = vmul.f32 %v2639_v0, %v1112_v57 }
 0x1ab   : > { %4613 = vst [vmem:[#allocation52_spill] sm:$0xff] %v3836_v41  ;;  %v977_v45 = vmul.f32 %v3836_v41, %v3836_v41  ;;  %1292 = vmatmul.f32.gmra.mxu2 %v444_v44 }
 0x1ac   : > { %v1107_v8 = vsel %vm1106_vm14, %v3788_v52, %v1105_v2  ;;  %v1114_v40 = vmul.f32 0.5, %v1113_v38  ;;  %v946_v52 = vmul.f32 %v3821_v16, %v3821_v16  ;;  %v1722_v38 = vld [vmem:[#allocation10 + $0xe8] sm:$0xff]  ;;  %v931_v16 = vmul.f32 %v3625_v51, %v3625_v51 }
 0x1ad   : > { %v993_v24 = vadd.f32 %v977_v45, %v961_v39  ;;  %v1110_v46 = vsel %vm1108_vm15, %v1109_v43, %v1107_v8  ;;  %1885 = vmatpush.msra.mxu2 %v1722_v38  ;;  %v1721_v38 = vld [vmem:[#allocation10 + $0xe0] sm:$0xff] }
 0x1ae   : > { %1345 = vmatmul.f32.gmra.mxu3 %v1110_v46  ;;  %v1115_v57 = vsub.f32 1.5, %v1114_v40  ;;  %v3861_v40 = vpop.f32.mrf.mxu1  ;;  %v962_v61 = vadd.f32 %v946_v52, %v930_v30  ;;  %1820 = vmatpush.msra.mxu1 %v1721_v38  ;;  %v445_v30 = vld [vmem:[%s3255_s22 + $0x60] sm:$0xff]  ;;  %v1133_v38 = vand.u32 2147483648, %v3830_v17 }
 0x1af   : > { %v2641_v41 = vpop.eup %2640  ;;  %v3854_v2 = vadd.f32 1e-08, %v993_v24  ;;  %4617 = vst [vmem:[#allocation56_spill] sm:$0xff] %v3861_v40  ;;  %v3878_v40 = vpop.f32.mrf.mxu2 }
 0x1b0   : > { %v1116_v39 = vmul.f32 %v2639_v0, %v1115_v57  ;;  %v1124_v45 = vmul.f32 %v2641_v41, %v3830_v17  ;;  %v1121_v0 = vand.u32 2147483648, %v3808_v5  ;;  %v1720_v57 = vld [vmem:[#allocation10 + $0xd8] sm:$0xff]  ;;  %4619 = vst [vmem:[#allocation58_spill] sm:$0xff] %v3878_v40 }
 0x1b1   : > { %2642 = vrsqrt.f32 %v3854_v2  ;;  %1755 = vmatpush.msra.mxu0 %v1720_v57  ;;  %vm1142_vm4 = vcmp.eq.f32.partialorder %v3854_v2, inf  ;;  %vm1144_vm5 = vcmp.eq.f32.partialorder %v3854_v2, 0.0 }
 0x1b2   : > { %v3858_v43 = vpop.f32.mrf.mxu0  ;;  %v1117_v46 = vmul.f32 %v1116_v39, %v3808_v5  ;;  %v1125_v8 = vmul.f32 %v2641_v41, %v1124_v45  ;;  %v3869_v39 = vpop.f32.mrf.mxu3 }
 0x1b3   : > { %4616 = vst [vmem:[#allocation55_spill] sm:$0xff] %v3858_v43  ;;  %v978_v59 = vmul.f32 %v3858_v43, %v3858_v43  ;;  %1295 = vmatmul.f32.gmra.mxu2 %v445_v30  ;;  %v1717_v30 = vld [vmem:[#allocation10 + $0xc0] sm:$0xff] }
 0x1b4   : > { %v1119_v24 = vsel %vm1118_vm0, %v3808_v5, %v1117_v46  ;;  %v1126_v44 = vmul.f32 0.5, %v1125_v8  ;;  %4618 = vst [vmem:[#allocation57_spill] sm:$0xff] %v3869_v39  ;;  %v947_v5 = vmul.f32 %v3848_v13, %v3848_v13  ;;  %v1719_v8 = vld [vmem:[#allocation10 + $0xd0] sm:$0xff]  ;;  %1756 = vmatpush.msra.mxu0 %v1717_v30  ;;  %v1713_v39 = vld [vmem:[#allocation10 + $0xa0] sm:$0xff] }
 0x1b5   : > { %v994_v45 = vadd.f32 %v978_v59, %v962_v61  ;;  %v1122_v55 = vsel %vm1120_vm1, %v1121_v0, %v1119_v24  ;;  %1886 = vmatpush.msra.mxu2 %v1719_v8  ;;  %v1716_v8 = vld [vmem:[#allocation10 + $0xb8] sm:$0xff]  ;;  %v1715_v13 = vld [vmem:[#allocation10 + $0xb0] sm:$0xff] }
 0x1b6   : > { %1348 = vmatmul.f32.gmra.mxu3 %v1122_v55  ;;  %v1127_v52 = vsub.f32 1.5, %v1126_v44  ;;  %v963_v44 = vadd.f32 %v947_v5, %v931_v16  ;;  %v3891_v51 = vpop.f32.mrf.mxu1  ;;  %v446_v16 = vld [vmem:[%s3255_s22 + $0x68] sm:$0xff] }
 0x1b7   : > { %v2643_v43 = vpop.eup %2642  ;;  %v3876_v46 = vadd.f32 1e-08, %v994_v45  ;;  %4621 = vst [vmem:[#allocation60_spill] sm:$0xff] %v3891_v51  ;;  %1887 = vmatpush.msra.mxu2 %v1716_v8 }
 0x1b8   : > { %v1128_v61 = vmul.f32 %v2641_v41, %v1127_v52  ;;  %v1136_v59 = vmul.f32 %v2643_v43, %v3854_v2  ;;  %v1718_v52 = vld [vmem:[#allocation10 + $0xc8] sm:$0xff] }
 0x1b9   : > { %2644 = vrsqrt.f32 %v3876_v46  ;;  %1821 = vmatpush.msra.mxu1 %v1718_v52  ;;  %1888 = vmatpush.msra.mxu2 %v1713_v39  ;;  %vm1154_vm6 = vcmp.eq.f32.partialorder %v3876_v46, inf  ;;  %vm1156_vm7 = vcmp.eq.f32.partialorder %v3876_v46, 0.0 }
 0x1ba   : > { %v3882_v55 = vpop.f32.mrf.mxu0  ;;  %v1129_v0 = vmul.f32 %v1128_v61, %v3830_v17  ;;  %v1137_v24 = vmul.f32 %v2643_v43, %v1136_v59  ;;  %v3898_v36 = vpop.f32.mrf.mxu3 }
 0x1bb   : > { %4620 = vst [vmem:[#allocation59_spill] sm:$0xff] %v3882_v55  ;;  %v979_v57 = vmul.f32 %v3882_v55, %v3882_v55  ;;  %v1714_v55 = vld [vmem:[#allocation10 + $0xa8] sm:$0xff]  ;;  %1298 = vmatmul.f32.gmra.mxu2 %v446_v16  ;;  %1822 = vmatpush.msra.mxu1 %v1715_v13 }
 0x1bc   : > { %v1131_v41 = vsel %vm1130_vm2, %v3830_v17, %v1129_v0  ;;  %v1138_v45 = vmul.f32 0.5, %v1137_v24  ;;  %v932_v17 = vmul.f32 %v3633_v54, %v3633_v54  ;;  %v948_v24 = vmul.f32 %v3878_v40, %v3878_v40  ;;  %4622 = vst [vmem:[#allocation61_spill] sm:$0xff] %v3898_v36  ;;  %1757 = vmatpush.msra.mxu0 %v1714_v55  ;;  %v447_v55 = vld [vmem:[%s3255_s22 + $0x70] sm:$0xff] }
 0x1bd   : > { %v995_v61 = vadd.f32 %v979_v57, %v963_v44  ;;  %v1134_v59 = vsel %vm1132_vm3, %v1133_v38, %v1131_v41  ;;  %v3904_v41 = vpop.f32.mrf.mxu2 }
 0x1be   : > { %1351 = vmatmul.f32.gmra.mxu3 %v1134_v59  ;;  %v1139_v5 = vsub.f32 1.5, %v1138_v45  ;;  %4623 = vst [vmem:[#allocation62_spill] sm:$0xff] %v3904_v41  ;;  %v964_v8 = vadd.f32 %v948_v24, %v932_v17  ;;  %v1710_v17 = vld [vmem:[#allocation10 + $0x88] sm:$0xff]  ;;  %v3916_v54 = vpop.f32.mrf.mxu1 }
 0x1bf   : > { %v2645_v0 = vpop.eup %2644  ;;  %v3900_v44 = vadd.f32 1e-08, %v995_v61  ;;  %4625 = vst [vmem:[#allocation64_spill] sm:$0xff] %v3916_v54  ;;  %1889 = vmatpush.msra.mxu2 %v1710_v17 }
 0x1c0   : > { %v1140_v57 = vmul.f32 %v2643_v43, %v1139_v5  ;;  %v1148_v38 = vmul.f32 %v2645_v0, %v3876_v46  ;;  %v1145_v43 = vand.u32 2147483648, %v3854_v2 }
 0x1c1   : > { %2646 = vrsqrt.f32 %v3900_v44  ;;  %vm1166_vm8 = vcmp.eq.f32.partialorder %v3900_v44, inf  ;;  %vm1168_vm9 = vcmp.eq.f32.partialorder %v3900_v44, 0.0 }
 0x1c2   : > { %v3906_v45 = vpop.f32.mrf.mxu0  ;;  %v1141_v30 = vmul.f32 %v1140_v57, %v3854_v2  ;;  %v1149_v52 = vmul.f32 %v2645_v0, %v1148_v38  ;;  %v1711_v57 = vld [vmem:[#allocation10 + $0x90] sm:$0xff]  ;;  %v1712_v38 = vld [vmem:[#allocation10 + $0x98] sm:$0xff] }
 0x1c3   : > { %4624 = vst [vmem:[#allocation63_spill] sm:$0xff] %v3906_v45  ;;  %v980_v61 = vmul.f32 %v3906_v45, %v3906_v45  ;;  %v933_v45 = vmul.f32 %v3641_v9, %v3641_v9  ;;  %1301 = vmatmul.f32.gmra.mxu2 %v447_v55  ;;  %1758 = vmatpush.msra.mxu0 %v1711_v57  ;;  %v448_v57 = vld [vmem:[%s3255_s22 + $0x78] sm:$0xff] }
 0x1c4   : > { %v1143_v13 = vsel %vm1142_vm4, %v3854_v2, %v1141_v30  ;;  %v1150_v39 = vmul.f32 0.5, %v1149_v52  ;;  %v949_v30 = vmul.f32 %v3904_v41, %v3904_v41  ;;  %1823 = vmatpush.msra.mxu1 %v1712_v38  ;;  %v934_v9 = vmul.f32 %v3654_v18, %v3654_v18 }
 0x1c5   : > { %v996_v59 = vadd.f32 %v980_v61, %v964_v8  ;;  %v1146_v16 = vsel %vm1144_vm5, %v1145_v43, %v1143_v13  ;;  %v3925_v8 = vpop.f32.mrf.mxu3 }
 0x1c6   : > { %1354 = vmatmul.f32.gmra.mxu3 %v1146_v16  ;;  %v1151_v5 = vsub.f32 1.5, %v1150_v39  ;;  %4626 = vst [vmem:[#allocation65_spill] sm:$0xff] %v3925_v8  ;;  %v965_v39 = vadd.f32 %v949_v30, %v933_v45  ;;  %v1708_v45 = vld [vmem:[#allocation10 + $0x78] sm:$0xff]  ;;  %v1709_v30 = vld [vmem:[#allocation10 + $0x80] sm:$0xff] }
 0x1c7   : > { %v2647_v24 = vpop.eup %2646  ;;  %v3922_v40 = vadd.f32 1e-08, %v996_v59  ;;  %v3935_v59 = vpop.f32.mrf.mxu2  ;;  %1759 = vmatpush.msra.mxu0 %v1708_v45  ;;  %1824 = vmatpush.msra.mxu1 %v1709_v30 }
 0x1c8   : > { %v1152_v2 = vmul.f32 %v2645_v0, %v1151_v5  ;;  %v1160_v52 = vmul.f32 %v2647_v24, %v3900_v44  ;;  %v1157_v0 = vand.u32 2147483648, %v3876_v46  ;;  %4628 = vst [vmem:[#allocation67_spill] sm:$0xff] %v3935_v59  ;;  %v950_v41 = vmul.f32 %v3935_v59, %v3935_v59 }
 0x1c9   : > { %2648 = vrsqrt.f32 %v3922_v40  ;;  %vm1178_vm10 = vcmp.eq.f32.partialorder %v3922_v40, inf  ;;  %vm1180_vm11 = vcmp.eq.f32.partialorder %v3922_v40, 0.0 }
 0x1ca   : > { %v3928_v61 = vpop.f32.mrf.mxu0  ;;  %v1153_v43 = vmul.f32 %v1152_v2, %v3876_v46  ;;  %v1161_v13 = vmul.f32 %v2647_v24, %v1160_v52  ;;  %v1707_v52 = vld [vmem:[#allocation10 + $0x70] sm:$0xff] }
 0x1cb   : > { %4627 = vst [vmem:[#allocation66_spill] sm:$0xff] %v3928_v61  ;;  %v981_v55 = vmul.f32 %v3928_v61, %v3928_v61  ;;  %1304 = vmatmul.f32.gmra.mxu2 %v448_v57 }
 0x1cc   : > { %v1155_v16 = vsel %vm1154_vm6, %v3876_v46, %v1153_v43  ;;  %v1162_v5 = vmul.f32 0.5, %v1161_v13  ;;  %v1705_v46 = vld [vmem:[#allocation10 + $0x60] sm:$0xff]  ;;  %v1706_v43 = vld [vmem:[#allocation10 + $0x68] sm:$0xff]  ;;  %1890 = vmatpush.msra.mxu2 %v1707_v52 }
 0x1cd   : > { %v997_v38 = vadd.f32 %v981_v55, %v965_v39  ;;  %v1158_v17 = vsel %vm1156_vm7, %v1157_v0, %v1155_v16  ;;  %v3945_v55 = vpop.f32.mrf.mxu1  ;;  %1760 = vmatpush.msra.mxu0 %v1705_v46  ;;  %1825 = vmatpush.msra.mxu1 %v1706_v43  ;;  %v3950_v57 = vpop.f32.mrf.mxu3 }
 0x1ce   : > { %1357 = vmatmul.f32.gmra.mxu3 %v1158_v17  ;;  %v1163_v2 = vsub.f32 1.5, %v1162_v5  ;;  %4629 = vst [vmem:[#allocation68_spill] sm:$0xff] %v3945_v55  ;;  %v1169_v17 = vand.u32 2147483648, %v3900_v44 }
 0x1cf   : > { %v2649_v61 = vpop.eup %2648  ;;  %v1013_v54 = vadd.f32 1e-08, %v997_v38  ;;  %v966_v38 = vadd.f32 %v950_v41, %v934_v9  ;;  %4631 = vst [vmem:[#allocation70_spill] sm:$0xff] %v3950_v57 }
 0x1d0   : > { %v1164_v13 = vmul.f32 %v2647_v24, %v1163_v2  ;;  %v1172_v39 = vmul.f32 %v2649_v61, %v3922_v40 }
 0x1d1   : > { %2650 = vrsqrt.f32 %v1013_v54  ;;  %vm1190_vm12 = vcmp.eq.f32.partialorder %v1013_v54, inf  ;;  %vm1192_vm13 = vcmp.eq.f32.partialorder %v1013_v54, 0.0 }
 0x1d2   : > { %v3947_v0 = vpop.f32.mrf.mxu0  ;;  %v1165_v16 = vmul.f32 %v1164_v13, %v3900_v44  ;;  %v1173_v5 = vmul.f32 %v2649_v61, %v1172_v39  ;;  %v1260_v39 = vpop.f32.mrf.mxu2 }
 0x1d3   : > { %4630 = vst [vmem:[#allocation69_spill] sm:$0xff] %v3947_v0  ;;  %v982_v24 = vmul.f32 %v3947_v0, %v3947_v0 }
 0x1d4   : > { %v1167_v2 = vsel %vm1166_vm8, %v3900_v44, %v1165_v16  ;;  %v1174_v45 = vmul.f32 0.5, %v1173_v5  ;;  %v1181_v44 = vand.u32 2147483648, %v3922_v40 }
 0x1d5   : > { %v998_v30 = vadd.f32 %v982_v24, %v966_v38  ;;  %v1170_v52 = vsel %vm1168_vm9, %v1169_v17, %v1167_v2  ;;  %v3959_v59 = vpop.f32.mrf.mxu1  ;;  %v3965_v38 = vpop.f32.mrf.mxu3 }
 0x1d6   : > { %1360 = vmatmul.f32.gmra.mxu3 %v1170_v52  ;;  %v1175_v46 = vsub.f32 1.5, %v1174_v45  ;;  %4632 = vst [vmem:[#allocation71_spill] sm:$0xff] %v3959_v59 }
 0x1d7   : > { %v2651_v43 = vpop.eup %2650  ;;  %v1014_v9 = vadd.f32 1e-08, %v998_v30  ;;  %4633 = vst [vmem:[#allocation72_spill] sm:$0xff] %v3965_v38 }
 0x1d8   : > { %v1176_v41 = vmul.f32 %v2649_v61, %v1175_v46  ;;  %v1184_v13 = vmul.f32 %v2651_v43, %v1013_v54 }
 0x1d9   : > { %2652 = vrsqrt.f32 %v1014_v9  ;;  %vm1202_vm14 = vcmp.eq.f32.partialorder %v1014_v9, inf  ;;  %vm1204_vm15 = vcmp.eq.f32.partialorder %v1014_v9, 0.0 }
 0x1da   : > { %v1177_v0 = vmul.f32 %v1176_v41, %v3922_v40  ;;  %v1185_v18 = vmul.f32 %v2651_v43, %v1184_v13  ;;  %v1263_v30 = vpop.f32.mrf.mxu2  ;;  %v1193_v41 = vand.u32 2147483648, %v1013_v54 }
 0x1dc   : > { %v1179_v16 = vsel %vm1178_vm10, %v3922_v40, %v1177_v0  ;;  %v1186_v5 = vmul.f32 0.5, %v1185_v18 }
 0x1dd   : > { %v1182_v61 = vsel %vm1180_vm11, %v1181_v44, %v1179_v16  ;;  %v3967_v0 = vpop.f32.mrf.mxu1  ;;  %v3969_v38 = vpop.f32.mrf.mxu3 }
 0x1de   : > { %1363 = vmatmul.f32.gmra.mxu3 %v1182_v61  ;;  %v1187_v24 = vsub.f32 1.5, %v1186_v5  ;;  %4634 = vst [vmem:[#allocation73_spill] sm:$0xff] %v3967_v0 }
 0x1df   : > { %v2653_v17 = vpop.eup %2652  ;;  %4635 = vst [vmem:[#allocation74_spill] sm:$0xff] %v3969_v38 }
 0x1e0   : > { %v1188_v2 = vmul.f32 %v2651_v43, %v1187_v24  ;;  %v1196_v45 = vmul.f32 %v2653_v17, %v1014_v9  ;;  %v1205_v43 = vand.u32 2147483648, %v1014_v9 }
 0x1e2   : > { %v1189_v52 = vmul.f32 %v1188_v2, %v1013_v54  ;;  %v1197_v46 = vmul.f32 %v2653_v17, %v1196_v45  ;;  %v1266_v16 = vpop.f32.mrf.mxu2  ;;  %v3978_v45 = vld [vmem:[%s4495_s4] ss:$0 sm:$0xff] }
 0x1e4   : > { %v1191_v13 = vsel %vm1190_vm12, %v1013_v54, %v1189_v52  ;;  %v1198_v59 = vmul.f32 0.5, %v1197_v46  ;;  %v1704_v52 = vld [vmem:[#allocation10 + $0x58] sm:$0xff]  ;;  %v1703_v46 = vld [vmem:[#allocation10 + $0x50] sm:$0xff] }
 0x1e5   : > { %v1194_v40 = vsel %vm1192_vm13, %v1193_v41, %v1191_v13  ;;  %v3971_v2 = vpop.f32.mrf.mxu1  ;;  %v3973_v54 = vpop.f32.mrf.mxu3  ;;  %1891 = vmatpush.msra.mxu2 %v1704_v52  ;;  %v1261_v41 = vadd.f32 %v3978_v45, %v1260_v39  ;;  %1826 = vmatpush.msra.mxu1 %v1703_v46  ;;  %v1699_v13 = vld [vmem:[#allocation10 + $0x30] sm:$0xff]  ;;  %v1694_v39 = vld [vmem:[#allocation10 + $0x8] sm:$0xff] }
 0x1e6   : > { %1366 = vmatmul.f32.gmra.mxu3 %v1194_v40  ;;  %v1199_v18 = vsub.f32 1.5, %v1198_v59  ;;  %4636 = vst [vmem:[#allocation75_spill] sm:$0xff] %v3971_v2  ;;  %v1700_v40 = vld [vmem:[#allocation10 + $0x38] sm:$0xff]  ;;  %v1695_v52 = vld [vmem:[#allocation10 + $0x10] sm:$0xff] }
 0x1e7   : > { %4637 = vst [vmem:[#allocation76_spill] sm:$0xff] %v3973_v54  ;;  %1827 = vmatpush.msra.mxu1 %v1700_v40 }
 0x1e8   : > { %v1200_v44 = vmul.f32 %v2653_v17, %v1199_v18  ;;  %v1702_v17 = vld [vmem:[#allocation10 + $0x48] sm:$0xff] }
 0x1e9   : > { %1761 = vmatpush.msra.mxu0 %v1702_v17  ;;  %v1698_v18 = vld [vmem:[#allocation10 + $0x28] sm:$0xff]  ;;  %v1693_v17 = vld [vmem:[#allocation10] sm:$0xff] }
 0x1ea   : > { %v1201_v5 = vmul.f32 %v1200_v44, %v1014_v9  ;;  %v1269_v59 = vpop.f32.mrf.mxu2  ;;  %v1696_v44 = vld [vmem:[#allocation10 + $0x18] sm:$0xff] }
 0x1eb   : > { %1762 = vmatpush.msra.mxu0 %v1699_v13  ;;  %v1270_v38 = vadd.f32 %v3978_v45, %v1269_v59 }
 0x1ec   : > { %v1203_v61 = vsel %vm1202_vm14, %v1014_v9, %v1201_v5  ;;  %v1701_v9 = vld [vmem:[#allocation10 + $0x40] sm:$0xff] }
 0x1ed   : > { %v1206_v24 = vsel %vm1204_vm15, %v1205_v43, %v1203_v61  ;;  %1892 = vmatpush.msra.mxu2 %v1701_v9  ;;  %v1697_v5 = vld [vmem:[#allocation10 + $0x20] sm:$0xff]  ;;  %v3981_v43 = vpop.f32.mrf.mxu1  ;;  %1763 = vmatpush.msra.mxu0 %v1696_v44  ;;  %v1264_v9 = vadd.f32 %v3978_v45, %v1263_v30 }
 0x1ee   : > { %1369 = vmatmul.f32.gmra.mxu3 %v1206_v24  ;;  %1828 = vmatpush.msra.mxu1 %v1697_v5  ;;  %v1267_v5 = vadd.f32 %v3978_v45, %v1266_v16 }
 0x1ef   : > { %1893 = vmatpush.msra.mxu2 %v1698_v18  ;;  %1764 = vmatpush.msra.mxu0 %v1693_v17 }
 0x1f0   : > { %1829 = vmatpush.msra.mxu1 %v1694_v39 }
 0x1f1   : > { %1894 = vmatpush.msra.mxu2 %v1695_v52 }
 0x1f2   : > { %v1272_v2 = vpop.f32.mrf.mxu2 }
 0x1f5   : > { %v3986_v54 = vpop.f32.mrf.mxu1 }
 0x1f9   : > { %v1325_v61 = vpop.f32.mrf.mxu3 }
 0x1fa   : > { %v1326_v24 = vadd.f32 %v1325_v61, %v1261_v41  ;;  %v1275_v61 = vpop.f32.mrf.mxu2 }
 0x1fc   : > { %v2446_v46 = vmul.f32 -1.442695, %v1326_v24 }
 0x1fe   : > { %2654 = vpow2.f32 %v2446_v46 }
 0x201   : > { %v1328_v13 = vpop.f32.mrf.mxu3 }
 0x202   : > { %v3984_v40 = vadd.f32 %v1328_v13, %v1264_v9  ;;  %v3993_v9 = vpop.f32.mrf.mxu1 }
 0x204   : > { %v2655_v18 = vpop.eup %2654  ;;  %v2447_v41 = vmul.f32 -1.442695, %v3984_v40 }
 0x205   : > { %v1421_v44 = vadd.f32 1.0, %v2655_v18 }
 0x206   : > { %2656 = vpow2.f32 %v2447_v41  ;;  %v3996_v41 = vpop.f32.mrf.mxu2 }
 0x207   : > { %2658 = vrcp.f32 %v1421_v44  ;;  %v1448_v16 = vand.u32 2147483648, %v1421_v44  ;;  %vm1442_vm1 = vweird.f32 %v1421_v44 }
 0x209   : > { %v1331_v52 = vpop.f32.mrf.mxu3 }
 0x20a   : > { %v3990_v17 = vadd.f32 %v1331_v52, %v1267_v5  ;;  %v1446_v5 = vand.u32 2147483647, %v1421_v44 }
 0x20c   : > { %v2657_v39 = vpop.eup %2656  ;;  %v2448_v30 = vmul.f32 -1.442695, %v3990_v17  ;;  %vm1447_vm3 = vcmp.eq.f32.partialorder %v1446_v5, 8.507059e+37 }
 0x20d   : > { %v2659_v46 = vpop.eup %2658  ;;  %v1422_v13 = vadd.f32 1.0, %v2657_v39 }
 0x20e   : > { %v1438_v0 = vmul.f32 %v2659_v46, %v1421_v44  ;;  %2660 = vpow2.f32 %v2448_v30  ;;  %vm1443_vm0 = vweird.f32 %v2659_v46  ;;  %v1449_v30 = vor.u32 1.1754944e-38, %v1448_v16 }
 0x20f   : > { %2662 = vrcp.f32 %v1422_v13  ;;  %vm1444_vm2 = vmor %vm1442_vm1, %vm1443_vm0  ;;  %v1461_v25 = vand.u32 2147483647, %v1422_v13  ;;  %vm1457_vm5 = vweird.f32 %v1422_v13 }
 0x210   : > { %v1439_v18 = vsub.f32 1.0, %v1438_v0  ;;  %v1273_v0 = vadd.f32 %v3978_v45, %v1272_v2 }
 0x211   : > { %v1334_v55 = vpop.f32.mrf.mxu3  ;;  %vm1462_vm7 = vcmp.eq.f32.partialorder %v1461_v25, 8.507059e+37 }
 0x212   : > { %v1440_v57 = vmul.f32 %v2659_v46, %v1439_v18  ;;  %v3998_v52 = vadd.f32 %v1334_v55, %v1270_v38  ;;  %v4002_v18 = vpop.f32.mrf.mxu1 }
 0x214   : > { %v2661_v8 = vpop.eup %2660  ;;  %v1441_v51 = vadd.f32 %v2659_v46, %v1440_v57  ;;  %v2449_v39 = vmul.f32 -1.442695, %v3998_v52  ;;  %v1463_v57 = vand.u32 2147483648, %v1422_v13 }
 0x215   : > { %v2663_v36 = vpop.eup %2662  ;;  %v1423_v59 = vadd.f32 1.0, %v2661_v8  ;;  %v4006_v8 = vpop.f32.mrf.mxu2 }
 0x216   : > { %v1445_v32 = vsel %vm1444_vm2, %v2659_v46, %v1441_v51  ;;  %v1453_v12 = vmul.f32 %v2663_v36, %v1422_v13  ;;  %2664 = vpow2.f32 %v2449_v39  ;;  %vm1458_vm4 = vweird.f32 %v2663_v36 }
 0x217   : > { %v1450_v28 = vsel %vm1447_vm3, %v1449_v30, %v1445_v32  ;;  %2666 = vrcp.f32 %v1423_v59  ;;  %vm1459_vm6 = vmor %vm1457_vm5, %vm1458_vm4  ;;  %vm1472_vm9 = vweird.f32 %v1423_v59 }
 0x218   : > { %v1677_v55 = vmul.f32 %v1450_v28, %v1326_v24  ;;  %v1454_v38 = vsub.f32 1.0, %v1453_v12  ;;  %v1464_v28 = vor.u32 1.1754944e-38, %v1463_v57  ;;  %v1276_v24 = vadd.f32 %v3978_v45, %v1275_v61 }
 0x219   : > { %v1337_v44 = vpop.f32.mrf.mxu3 }
 0x21a   : > { %v1455_v7 = vmul.f32 %v2663_v36, %v1454_v38  ;;  %v4004_v35 = vadd.f32 %v1337_v44, %v1273_v0  ;;  %1765 = vmatmul.f32.vlgmr.msra.gmra.mxu0 %v1677_v55  ;;  %1830 = vmatmul.f32.vlgmr.msra.gmra.mxu1 %v1677_v55  ;;  %v1476_v44 = vand.u32 2147483647, %v1423_v59 }
 0x21b   : > { %1895 = vmatmul.f32.vlgmr.msra.gmra.mxu2 %v1677_v55  ;;  %v4011_v55 = vpop.f32.mrf.mxu1 }
 0x21c   : > { %v2665_v51 = vpop.eup %2664  ;;  %v1456_v2 = vadd.f32 %v2663_v36, %v1455_v7  ;;  %v2450_v32 = vmul.f32 -1.442695, %v4004_v35  ;;  %v1478_v7 = vand.u32 2147483648, %v1423_v59  ;;  %vm1477_vm11 = vcmp.eq.f32.partialorder %v1476_v44, 8.507059e+37 }
 0x21d   : > { %v2667_v46 = vpop.eup %2666  ;;  %v1424_v12 = vadd.f32 1.0, %v2665_v51  ;;  %v1284_v51 = vpop.f32.mrf.mxu2 }
 0x21e   : > { %v1460_v16 = vsel %vm1459_vm6, %v2663_v36, %v1456_v2  ;;  %v1468_v5 = vmul.f32 %v2667_v46, %v1423_v59  ;;  %2668 = vpow2.f32 %v2450_v32  ;;  %vm1473_vm8 = vweird.f32 %v2667_v46 }
 0x21f   : > { %v1465_v39 = vsel %vm1462_vm7, %v1464_v28, %v1460_v16  ;;  %2670 = vrcp.f32 %v1424_v12  ;;  %vm1474_vm10 = vmor %vm1472_vm9, %vm1473_vm8  ;;  %v1479_v2 = vor.u32 1.1754944e-38, %v1478_v7  ;;  %v1279_v28 = vadd.f32 %v3978_v45, %v3996_v41 }
 0x220   : > { %v1678_v30 = vmul.f32 %v1465_v39, %v3984_v40  ;;  %v1469_v0 = vsub.f32 1.0, %v1468_v5  ;;  %v1493_v59 = vand.u32 2147483648, %v1424_v12  ;;  %vm1487_vm13 = vweird.f32 %v1424_v12 }
 0x221   : > { %v1340_v13 = vpop.f32.mrf.mxu3 }
 0x222   : > { %v1470_v38 = vmul.f32 %v2667_v46, %v1469_v0  ;;  %v4013_v57 = vadd.f32 %v1340_v13, %v1276_v24  ;;  %1768 = vmatmul.f32.gmra.mxu0 %v1678_v30  ;;  %1833 = vmatmul.f32.gmra.mxu1 %v1678_v30 }
 0x223   : > { %1898 = vmatmul.f32.gmra.mxu2 %v1678_v30  ;;  %v4021_v7 = vpop.f32.mrf.mxu1 }
 0x224   : > { %v2669_v25 = vpop.eup %2668  ;;  %v1471_v36 = vadd.f32 %v2667_v46, %v1470_v38  ;;  %v2451_v61 = vmul.f32 -1.442695, %v4013_v57  ;;  %v1491_v38 = vand.u32 2147483647, %v1424_v12 }
 0x225   : > { %v2671_v40 = vpop.eup %2670  ;;  %v1425_v32 = vadd.f32 1.0, %v2669_v25 }
 0x226   : > { %v1475_v16 = vsel %vm1474_vm10, %v2667_v46, %v1471_v36  ;;  %v1483_v24 = vmul.f32 %v2671_v40, %v1424_v12  ;;  %2672 = vpow2.f32 %v2451_v61  ;;  %vm1488_vm12 = vweird.f32 %v2671_v40 }
 0x227   : > { %v1480_v5 = vsel %vm1477_vm11, %v1479_v2, %v1475_v16  ;;  %2674 = vrcp.f32 %v1425_v32  ;;  %vm1489_vm14 = vmor %vm1487_vm13, %vm1488_vm12  ;;  %v1282_v61 = vadd.f32 %v3978_v45, %v4006_v8  ;;  %vm1492_vm15 = vcmp.eq.f32.partialorder %v1491_v38, 8.507059e+37  ;;  %v1287_v16 = vpop.f32.mrf.mxu2 }
 0x228   : > { %v1679_v39 = vmul.f32 %v1480_v5, %v3990_v17  ;;  %v1484_v30 = vsub.f32 1.0, %v1483_v24  ;;  %v1494_v17 = vor.u32 1.1754944e-38, %v1493_v59  ;;  %v1508_v12 = vand.u32 2147483648, %v1425_v32 }
 0x229   : > { %v1343_v0 = vpop.f32.mrf.mxu3  ;;  %vm1502_vm1 = vweird.f32 %v1425_v32 }
 0x22a   : > { %v1485_v13 = vmul.f32 %v2671_v40, %v1484_v30  ;;  %v4019_v23 = vadd.f32 %v1343_v0, %v1279_v28  ;;  %1771 = vmatmul.f32.gmra.mxu0 %v1679_v39  ;;  %1836 = vmatmul.f32.gmra.mxu1 %v1679_v39 }
 0x22b   : > { %1901 = vmatmul.f32.gmra.mxu2 %v1679_v39 }
 0x22c   : > { %v2673_v41 = vpop.eup %2672  ;;  %v1486_v46 = vadd.f32 %v2671_v40, %v1485_v13  ;;  %v2452_v44 = vmul.f32 -1.442695, %v4019_v23  ;;  %v1506_v13 = vand.u32 2147483647, %v1425_v32 }
 0x22d   : > { %v2675_v25 = vpop.eup %2674  ;;  %v1426_v36 = vadd.f32 1.0, %v2673_v41 }
 0x22e   : > { %v1490_v2 = vsel %vm1489_vm14, %v2671_v40, %v1486_v46  ;;  %v1498_v28 = vmul.f32 %v2675_v25, %v1425_v32  ;;  %2676 = vpow2.f32 %v2452_v44  ;;  %vm1503_vm0 = vweird.f32 %v2675_v25  ;;  %v4030_v46 = vpop.f32.mrf.mxu1 }
 0x22f   : > { %v1495_v24 = vsel %vm1492_vm15, %v1494_v17, %v1490_v2  ;;  %2678 = vrcp.f32 %v1426_v36  ;;  %4638 = vst [vmem:[#allocation77_spill] sm:$0xff] %v4030_v46  ;;  %vm1504_vm2 = vmor %vm1502_vm1, %vm1503_vm0  ;;  %v1285_v17 = vadd.f32 %v3978_v45, %v1284_v51  ;;  %vm1507_vm3 = vcmp.eq.f32.partialorder %v1506_v13, 8.507059e+37  ;;  %v1290_v32 = vpop.f32.mrf.mxu2 }
 0x230   : > { %v1680_v5 = vmul.f32 %v1495_v24, %v3998_v52  ;;  %v1499_v39 = vsub.f32 1.0, %v1498_v28  ;;  %v1509_v52 = vor.u32 1.1754944e-38, %v1508_v12  ;;  %v1521_v46 = vand.u32 2147483647, %v1426_v36 }
 0x231   : > { %v1346_v30 = vpop.f32.mrf.mxu3  ;;  %vm1517_vm5 = vweird.f32 %v1426_v36 }
 0x232   : > { %v1500_v0 = vmul.f32 %v2675_v25, %v1499_v39  ;;  %v4027_v59 = vadd.f32 %v1346_v30, %v1282_v61  ;;  %1774 = vmatmul.f32.gmra.mxu0 %v1680_v5  ;;  %1839 = vmatmul.f32.gmra.mxu1 %v1680_v5  ;;  %v1523_v39 = vand.u32 2147483648, %v1426_v36  ;;  %vm1522_vm7 = vcmp.eq.f32.partialorder %v1521_v46, 8.507059e+37 }
 0x233   : > { %1904 = vmatmul.f32.gmra.mxu2 %v1680_v5 }
 0x234   : > { %v2677_v8 = vpop.eup %2676  ;;  %v1501_v40 = vadd.f32 %v2675_v25, %v1500_v0  ;;  %v2453_v38 = vmul.f32 -1.442695, %v4027_v59 }
 0x235   : > { %v2679_v41 = vpop.eup %2678  ;;  %v1427_v44 = vadd.f32 1.0, %v2677_v8 }
 0x236   : > { %v1505_v2 = vsel %vm1504_vm2, %v2675_v25, %v1501_v40  ;;  %v1513_v61 = vmul.f32 %v2679_v41, %v1426_v36  ;;  %2680 = vpow2.f32 %v2453_v38  ;;  %vm1518_vm4 = vweird.f32 %v2679_v41 }
 0x237   : > { %v1510_v28 = vsel %vm1507_vm3, %v1509_v52, %v1505_v2  ;;  %2682 = vrcp.f32 %v1427_v44  ;;  %vm1519_vm6 = vmor %vm1517_vm5, %vm1518_vm4  ;;  %v1288_v40 = vadd.f32 %v3978_v45, %v1287_v16  ;;  %v1538_v36 = vand.u32 2147483648, %v1427_v44  ;;  %v1293_v16 = vpop.f32.mrf.mxu2 }
 0x238   : > { %v1681_v24 = vmul.f32 %v1510_v28, %v4004_v35  ;;  %v1514_v5 = vsub.f32 1.0, %v1513_v61  ;;  %v1524_v35 = vor.u32 1.1754944e-38, %v1523_v39  ;;  %vm1532_vm9 = vweird.f32 %v1427_v44 }
 0x239   : > { %v1349_v30 = vpop.f32.mrf.mxu3 }
 0x23a   : > { %v1515_v0 = vmul.f32 %v2679_v41, %v1514_v5  ;;  %v4034_v3 = vadd.f32 %v1349_v30, %v1285_v17  ;;  %1777 = vmatmul.f32.gmra.mxu0 %v1681_v24  ;;  %1842 = vmatmul.f32.gmra.mxu1 %v1681_v24  ;;  %v4038_v17 = vpop.f32.mrf.mxu1  ;;  %v1536_v30 = vand.u32 2147483647, %v1427_v44 }
 0x23b   : > { %1907 = vmatmul.f32.gmra.mxu2 %v1681_v24 }
 0x23c   : > { %v2681_v51 = vpop.eup %2680  ;;  %v1516_v25 = vadd.f32 %v2679_v41, %v1515_v0  ;;  %v2454_v12 = vmul.f32 -1.442695, %v4034_v3  ;;  %vm1537_vm11 = vcmp.eq.f32.partialorder %v1536_v30, 8.507059e+37 }
 0x23d   : > { %v2683_v13 = vpop.eup %2682  ;;  %v1428_v8 = vadd.f32 1.0, %v2681_v51 }
 0x23e   : > { %v1520_v38 = vsel %vm1519_vm6, %v2679_v41, %v1516_v25  ;;  %v1528_v52 = vmul.f32 %v2683_v13, %v1427_v44  ;;  %2684 = vpow2.f32 %v2454_v12  ;;  %vm1533_vm8 = vweird.f32 %v2683_v13 }
 0x23f   : > { %v1525_v2 = vsel %vm1522_vm7, %v1524_v35, %v1520_v38  ;;  %2686 = vrcp.f32 %v1428_v8  ;;  %vm1534_vm10 = vmor %vm1532_vm9, %vm1533_vm8  ;;  %v1291_v12 = vadd.f32 %v3978_v45, %v1290_v32  ;;  %v1553_v44 = vand.u32 2147483648, %v1428_v8 }
 0x240   : > { %v1682_v61 = vmul.f32 %v1525_v2, %v4013_v57  ;;  %v1529_v28 = vsub.f32 1.0, %v1528_v52  ;;  %v1539_v57 = vor.u32 1.1754944e-38, %v1538_v36  ;;  %vm1547_vm13 = vweird.f32 %v1428_v8 }
 0x241   : > { %v1352_v24 = vpop.f32.mrf.mxu3 }
 0x242   : > { %v1530_v5 = vmul.f32 %v2683_v13, %v1529_v28  ;;  %v4041_v39 = vadd.f32 %v1352_v24, %v1288_v40  ;;  %1780 = vmatmul.f32.gmra.mxu0 %v1682_v61  ;;  %1845 = vmatmul.f32.gmra.mxu1 %v1682_v61 }
 0x243   : > { %1910 = vmatmul.f32.gmra.mxu2 %v1682_v61  ;;  %v4046_v61 = vpop.f32.mrf.mxu1 }
 0x244   : > { %v2685_v41 = vpop.eup %2684  ;;  %v1531_v46 = vadd.f32 %v2683_v13, %v1530_v5  ;;  %v2455_v0 = vmul.f32 -1.442695, %v4041_v39  ;;  %4639 = vst [vmem:[#allocation78_spill] sm:$0xff] %v4046_v61  ;;  %v1551_v5 = vand.u32 2147483647, %v1428_v8 }
 0x245   : > { %v2687_v51 = vpop.eup %2686  ;;  %v1429_v25 = vadd.f32 1.0, %v2685_v41  ;;  %v1296_v41 = vpop.f32.mrf.mxu2 }
 0x246   : > { %v1535_v35 = vsel %vm1534_vm10, %v2683_v13, %v1531_v46  ;;  %v1543_v38 = vmul.f32 %v2687_v51, %v1428_v8  ;;  %2688 = vpow2.f32 %v2455_v0  ;;  %vm1548_vm12 = vweird.f32 %v2687_v51 }
 0x247   : > { %v1540_v40 = vsel %vm1537_vm11, %v1539_v57, %v1535_v35  ;;  %2690 = vrcp.f32 %v1429_v25  ;;  %vm1549_vm14 = vmor %vm1547_vm13, %vm1548_vm12  ;;  %v1554_v46 = vor.u32 1.1754944e-38, %v1553_v44  ;;  %v1294_v57 = vadd.f32 %v3978_v45, %v1293_v16 }
 0x248   : > { %v1683_v52 = vmul.f32 %v1540_v40, %v4019_v23  ;;  %v1544_v2 = vsub.f32 1.0, %v1543_v38  ;;  %vm1552_vm15 = vcmp.eq.f32.partialorder %v1551_v5, 8.507059e+37  ;;  %vm1562_vm1 = vweird.f32 %v1429_v25 }
 0x249   : > { %v1355_v28 = vpop.f32.mrf.mxu3 }
 0x24a   : > { %v1545_v24 = vmul.f32 %v2687_v51, %v1544_v2  ;;  %v4048_v36 = vadd.f32 %v1355_v28, %v1291_v12  ;;  %1783 = vmatmul.f32.gmra.mxu0 %v1683_v52  ;;  %1848 = vmatmul.f32.gmra.mxu1 %v1683_v52  ;;  %v1568_v2 = vand.u32 2147483648, %v1429_v25 }
 0x24b   : > { %1913 = vmatmul.f32.gmra.mxu2 %v1683_v52  ;;  %v4055_v44 = vpop.f32.mrf.mxu1 }
 0x24c   : > { %v2689_v32 = vpop.eup %2688  ;;  %v1546_v13 = vadd.f32 %v2687_v51, %v1545_v24  ;;  %v2456_v30 = vmul.f32 -1.442695, %v4048_v36  ;;  %v1566_v24 = vand.u32 2147483647, %v1429_v25  ;;  %4640 = vst [vmem:[#allocation79_spill] sm:$0xff] %v4055_v44 }
 0x24d   : > { %v2691_v23 = vpop.eup %2690  ;;  %v1430_v0 = vadd.f32 1.0, %v2689_v32 }
 0x24e   : > { %v1550_v35 = vsel %vm1549_vm14, %v2687_v51, %v1546_v13  ;;  %v1558_v38 = vmul.f32 %v2691_v23, %v1429_v25  ;;  %2692 = vpow2.f32 %v2456_v30  ;;  %vm1563_vm0 = vweird.f32 %v2691_v23 }
 0x24f   : > { %v1555_v12 = vsel %vm1552_vm15, %v1554_v46, %v1550_v35  ;;  %2694 = vrcp.f32 %v1430_v0  ;;  %vm1564_vm2 = vmor %vm1562_vm1, %vm1563_vm0  ;;  %v1297_v30 = vadd.f32 %v3978_v45, %v1296_v41  ;;  %vm1567_vm3 = vcmp.eq.f32.partialorder %v1566_v24, 8.507059e+37  ;;  %v1299_v35 = vpop.f32.mrf.mxu2 }
 0x250   : > { %v1684_v40 = vmul.f32 %v1555_v12, %v4027_v59  ;;  %v1559_v52 = vsub.f32 1.0, %v1558_v38  ;;  %v1569_v59 = vor.u32 1.1754944e-38, %v1568_v2  ;;  %vm1577_vm5 = vweird.f32 %v1430_v0 }
 0x251   : > { %v1358_v8 = vpop.f32.mrf.mxu3 }
 0x252   : > { %v1560_v28 = vmul.f32 %v2691_v23, %v1559_v52  ;;  %v4053_v61 = vadd.f32 %v1358_v8, %v1294_v57  ;;  %1786 = vmatmul.f32.gmra.mxu0 %v1684_v40  ;;  %1851 = vmatmul.f32.gmra.mxu1 %v1684_v40  ;;  %v1583_v52 = vand.u32 2147483648, %v1430_v0 }
 0x253   : > { %1916 = vmatmul.f32.gmra.mxu2 %v1684_v40 }
 0x254   : > { %v2693_v16 = vpop.eup %2692  ;;  %v1561_v51 = vadd.f32 %v2691_v23, %v1560_v28  ;;  %v2457_v5 = vmul.f32 -1.442695, %v4053_v61  ;;  %v1581_v28 = vand.u32 2147483647, %v1430_v0 }
 0x255   : > { %v2695_v32 = vpop.eup %2694  ;;  %v1431_v13 = vadd.f32 1.0, %v2693_v16  ;;  %v4063_v16 = vpop.f32.mrf.mxu1 }
 0x256   : > { %v1565_v46 = vsel %vm1564_vm2, %v2691_v23, %v1561_v51  ;;  %v1573_v57 = vmul.f32 %v2695_v32, %v1430_v0  ;;  %2696 = vpow2.f32 %v2457_v5  ;;  %vm1578_vm4 = vweird.f32 %v2695_v32  ;;  %4641 = vst [vmem:[#allocation80_spill] sm:$0xff] %v4063_v16 }
 0x257   : > { %v1570_v38 = vsel %vm1567_vm3, %v1569_v59, %v1565_v46  ;;  %2698 = vrcp.f32 %v1431_v13  ;;  %vm1579_vm6 = vmor %vm1577_vm5, %vm1578_vm4  ;;  %v1300_v5 = vadd.f32 %v3978_v45, %v1299_v35  ;;  %vm1582_vm7 = vcmp.eq.f32.partialorder %v1581_v28, 8.507059e+37  ;;  %v1302_v0 = vpop.f32.mrf.mxu2 }
 0x258   : > { %v1685_v12 = vmul.f32 %v1570_v38, %v4034_v3  ;;  %v1574_v40 = vsub.f32 1.0, %v1573_v57  ;;  %v1584_v3 = vor.u32 1.1754944e-38, %v1583_v52  ;;  %vm1592_vm9 = vweird.f32 %v1431_v13 }
 0x259   : > { %v1361_v25 = vpop.f32.mrf.mxu3 }
 0x25a   : > { %v1575_v8 = vmul.f32 %v2695_v32, %v1574_v40  ;;  %v4060_v44 = vadd.f32 %v1361_v25, %v1297_v30  ;;  %1789 = vmatmul.f32.gmra.mxu0 %v1685_v12  ;;  %1854 = vmatmul.f32.gmra.mxu1 %v1685_v12 }
 0x25b   : > { %1919 = vmatmul.f32.gmra.mxu2 %v1685_v12  ;;  %v1598_v12 = vand.u32 2147483648, %v1431_v13 }
 0x25c   : > { %v2697_v41 = vpop.eup %2696  ;;  %v1576_v23 = vadd.f32 %v2695_v32, %v1575_v8  ;;  %v2458_v2 = vmul.f32 -1.442695, %v4060_v44  ;;  %v1596_v8 = vand.u32 2147483647, %v1431_v13 }
 0x25d   : > { %v2699_v24 = vpop.eup %2698  ;;  %v1432_v51 = vadd.f32 1.0, %v2697_v41 }
 0x25e   : > { %v1580_v59 = vsel %vm1579_vm6, %v2695_v32, %v1576_v23  ;;  %v1588_v30 = vmul.f32 %v2699_v24, %v1431_v13  ;;  %2700 = vpow2.f32 %v2458_v2  ;;  %vm1593_vm8 = vweird.f32 %v2699_v24 }
 0x25f   : > { %v1585_v46 = vsel %vm1582_vm7, %v1584_v3, %v1580_v59  ;;  %2702 = vrcp.f32 %v1432_v51  ;;  %vm1594_vm10 = vmor %vm1592_vm9, %vm1593_vm8  ;;  %v1303_v23 = vadd.f32 %v3978_v45, %v1302_v0  ;;  %vm1597_vm11 = vcmp.eq.f32.partialorder %v1596_v8, 8.507059e+37 }
 0x260   : > { %v1686_v57 = vmul.f32 %v1585_v46, %v4041_v39  ;;  %v1589_v38 = vsub.f32 1.0, %v1588_v30  ;;  %v1599_v39 = vor.u32 1.1754944e-38, %v1598_v12  ;;  %v1613_v13 = vand.u32 2147483648, %v1432_v51 }
 0x261   : > { %v1364_v40 = vpop.f32.mrf.mxu3  ;;  %vm1607_vm13 = vweird.f32 %v1432_v51 }
 0x262   : > { %v1590_v25 = vmul.f32 %v2699_v24, %v1589_v38  ;;  %v4067_v16 = vadd.f32 %v1364_v40, %v1300_v5  ;;  %1792 = vmatmul.f32.gmra.mxu0 %v1686_v57  ;;  %1857 = vmatmul.f32.gmra.mxu1 %v1686_v57  ;;  %v4071_v5 = vpop.f32.mrf.mxu1  ;;  %v1611_v40 = vand.u32 2147483647, %v1432_v51 }
 0x263   : > { %1922 = vmatmul.f32.gmra.mxu2 %v1686_v57 }
 0x264   : > { %v2701_v32 = vpop.eup %2700  ;;  %v1591_v35 = vadd.f32 %v2699_v24, %v1590_v25  ;;  %v2459_v52 = vmul.f32 -1.442695, %v4067_v16  ;;  %vm1612_vm15 = vcmp.eq.f32.partialorder %v1611_v40, 8.507059e+37 }
 0x265   : > { %v2703_v28 = vpop.eup %2702  ;;  %v1433_v41 = vadd.f32 1.0, %v2701_v32 }
 0x266   : > { %v1595_v2 = vsel %vm1594_vm10, %v2699_v24, %v1591_v35  ;;  %v1603_v3 = vmul.f32 %v2703_v28, %v1432_v51  ;;  %2704 = vpow2.f32 %v2459_v52  ;;  %vm1608_vm12 = vweird.f32 %v2703_v28  ;;  %v1305_v24 = vpop.f32.mrf.mxu2 }
 0x267   : > { %v1600_v59 = vsel %vm1597_vm11, %v1599_v39, %v1595_v2  ;;  %2706 = vrcp.f32 %v1433_v41  ;;  %vm1609_vm14 = vmor %vm1607_vm13, %vm1608_vm12  ;;  %v1306_v52 = vadd.f32 %v3978_v45, %v1305_v24  ;;  %v1628_v51 = vand.u32 2147483648, %v1433_v41 }
 0x268   : > { %v1687_v30 = vmul.f32 %v1600_v59, %v4048_v36  ;;  %v1604_v46 = vsub.f32 1.0, %v1603_v3  ;;  %v1614_v36 = vor.u32 1.1754944e-38, %v1613_v13  ;;  %vm1622_vm1 = vweird.f32 %v1433_v41 }
 0x269   : > { %v1367_v57 = vpop.f32.mrf.mxu3 }
 0x26a   : > { %v1605_v38 = vmul.f32 %v2703_v28, %v1604_v46  ;;  %v4074_v12 = vadd.f32 %v1367_v57, %v1303_v23  ;;  %1795 = vmatmul.f32.gmra.mxu0 %v1687_v30  ;;  %1860 = vmatmul.f32.gmra.mxu1 %v1687_v30 }
 0x26b   : > { %1925 = vmatmul.f32.gmra.mxu2 %v1687_v30  ;;  %v4079_v30 = vpop.f32.mrf.mxu1 }
 0x26c   : > { %v2705_v0 = vpop.eup %2704  ;;  %v1606_v25 = vadd.f32 %v2703_v28, %v1605_v38  ;;  %v2460_v8 = vmul.f32 -1.442695, %v4074_v12  ;;  %v1626_v38 = vand.u32 2147483647, %v1433_v41 }
 0x26d   : > { %v2707_v32 = vpop.eup %2706  ;;  %v1434_v35 = vadd.f32 1.0, %v2705_v0 }
 0x26e   : > { %v1610_v39 = vsel %vm1609_vm14, %v2703_v28, %v1606_v25  ;;  %v1618_v2 = vmul.f32 %v2707_v32, %v1433_v41  ;;  %2708 = vpow2.f32 %v2460_v8  ;;  %vm1623_vm0 = vweird.f32 %v2707_v32 }
 0x26f   : > { %v1615_v23 = vsel %vm1612_vm15, %v1614_v36, %v1610_v39  ;;  %2710 = vrcp.f32 %v1434_v35  ;;  %vm1624_vm2 = vmor %vm1622_vm1, %vm1623_vm0  ;;  %vm1627_vm3 = vcmp.eq.f32.partialorder %v1626_v38, 8.507059e+37  ;;  %vm1637_vm5 = vweird.f32 %v1434_v35 }
 0x270   : > { %v1688_v3 = vmul.f32 %v1615_v23, %v4053_v61  ;;  %v1619_v59 = vsub.f32 1.0, %v1618_v2  ;;  %v1629_v61 = vor.u32 1.1754944e-38, %v1628_v51  ;;  %v1643_v2 = vand.u32 2147483648, %v1434_v35 }
 0x271   : > { %v1370_v46 = vpop.f32.mrf.mxu3 }
 0x272   : > { %v1620_v57 = vmul.f32 %v2707_v32, %v1619_v59  ;;  %v4081_v13 = vadd.f32 %v1370_v46, %v1306_v52  ;;  %1798 = vmatmul.f32.gmra.mxu0 %v1688_v3  ;;  %1863 = vmatmul.f32.gmra.mxu1 %v1688_v3  ;;  %v1644_v46 = vor.u32 1.1754944e-38, %v1643_v2 }
 0x273   : > { %1928 = vmatmul.f32.gmra.mxu2 %v1688_v3  ;;  %v1641_v3 = vand.u32 2147483647, %v1434_v35  ;;  %v4085_v41 = vpop.f32.mrf.mxu1 }
 0x274   : > { %v2709_v45 = vpop.eup %2708  ;;  %v1621_v28 = vadd.f32 %v2707_v32, %v1620_v57  ;;  %v2461_v40 = vmul.f32 -1.442695, %v4081_v13 }
 0x275   : > { %v2711_v24 = vpop.eup %2710  ;;  %v1435_v0 = vadd.f32 1.0, %v2709_v45  ;;  %vm1642_vm7 = vcmp.eq.f32.partialorder %v1641_v3, 8.507059e+37 }
 0x276   : > { %v1625_v25 = vsel %vm1624_vm2, %v2707_v32, %v1621_v28  ;;  %v1633_v8 = vmul.f32 %v2711_v24, %v1434_v35  ;;  %2712 = vpow2.f32 %v2461_v40  ;;  %vm1638_vm4 = vweird.f32 %v2711_v24 }
 0x277   : > { %v1630_v36 = vsel %vm1627_vm3, %v1629_v61, %v1625_v25  ;;  %2714 = vrcp.f32 %v1435_v0  ;;  %vm1639_vm6 = vmor %vm1637_vm5, %vm1638_vm4  ;;  %v1658_v61 = vand.u32 2147483648, %v1435_v0  ;;  %vm1652_vm9 = vweird.f32 %v1435_v0 }
 0x278   : > { %v1689_v52 = vmul.f32 %v1630_v36, %v4060_v44  ;;  %v1634_v39 = vsub.f32 1.0, %v1633_v8  ;;  %v1656_v8 = vand.u32 2147483647, %v1435_v0 }
 0x27a   : > { %v1635_v23 = vmul.f32 %v2711_v24, %v1634_v39  ;;  %1801 = vmatmul.f32.gmra.mxu0 %v1689_v52  ;;  %1866 = vmatmul.f32.gmra.mxu1 %v1689_v52  ;;  %vm1657_vm11 = vcmp.eq.f32.partialorder %v1656_v8, 8.507059e+37 }
 0x27b   : > { %1931 = vmatmul.f32.gmra.mxu2 %v1689_v52  ;;  %v4088_v52 = vpop.f32.mrf.mxu1 }
 0x27c   : > { %v2713_v59 = vpop.eup %2712  ;;  %v1636_v51 = vadd.f32 %v2711_v24, %v1635_v23 }
 0x27d   : > { %v2715_v32 = vpop.eup %2714  ;;  %v1436_v57 = vadd.f32 1.0, %v2713_v59 }
 0x27e   : > { %v1640_v38 = vsel %vm1639_vm6, %v2711_v24, %v1636_v51  ;;  %v1648_v44 = vmul.f32 %v2715_v32, %v1435_v0  ;;  %vm1653_vm8 = vweird.f32 %v2715_v32  ;;  %v1659_v24 = vor.u32 1.1754944e-38, %v1658_v61 }
 0x27f   : > { %v1645_v45 = vsel %vm1642_vm7, %v1644_v46, %v1640_v38  ;;  %2716 = vrcp.f32 %v1436_v57  ;;  %vm1654_vm10 = vmor %vm1652_vm9, %vm1653_vm8  ;;  %v1673_v59 = vand.u32 2147483648, %v1436_v57  ;;  %v1671_v46 = vand.u32 2147483647, %v1436_v57 }
 0x280   : > { %v1690_v28 = vmul.f32 %v1645_v45, %v4067_v16  ;;  %v1649_v40 = vsub.f32 1.0, %v1648_v44  ;;  %vm1667_vm13 = vweird.f32 %v1436_v57 }
 0x281   : > { %v1674_v38 = vor.u32 1.1754944e-38, %v1673_v59  ;;  %vm1672_vm15 = vcmp.eq.f32.partialorder %v1671_v46, 8.507059e+37 }
 0x282   : > { %v1650_v25 = vmul.f32 %v2715_v32, %v1649_v40  ;;  %1804 = vmatmul.f32.gmra.mxu0 %v1690_v28  ;;  %1869 = vmatmul.f32.gmra.mxu1 %v1690_v28 }
 0x283   : > { %1934 = vmatmul.f32.gmra.mxu2 %v1690_v28 }
 0x284   : > { %v1651_v35 = vadd.f32 %v2715_v32, %v1650_v25 }
 0x285   : > { %v2717_v36 = vpop.eup %2716 }
 0x286   : > { %v1655_v39 = vsel %vm1654_vm10, %v2715_v32, %v1651_v35  ;;  %v1663_v2 = vmul.f32 %v2717_v36, %v1436_v57  ;;  %vm1668_vm12 = vweird.f32 %v2717_v36  ;;  %v4091_v32 = vpop.f32.mrf.mxu1  ;;  %v1960_v57 = vmul.f32 %v3667_v33, %v3621_v56  ;;  %v2718_v56 = vld [vmem:[%s3265_s25] sm:$0xff] }
 0x287   : > { %v1660_v23 = vsel %vm1657_vm11, %v1659_v24, %v1655_v39  ;;  %vm1669_vm14 = vmor %vm1667_vm13, %vm1668_vm12 }
 0x288   : > { %v1691_v16 = vmul.f32 %v1660_v23, %v4074_v12  ;;  %v1664_v3 = vsub.f32 1.0, %v1663_v2  ;;  %v1741_v12 = vld [vmem:[%s4497_s6] sm:$0x7] }
 0x289   : > { %v4097_v40 = vperm.slane %v1741_v12, 1  ;;  %v4104_v35 = vperm.slane %v1741_v12, 0  ;;  %v4109_v23 = vperm.slane %v1741_v12, 2  ;;  %v2721_v12 = vld [vmem:[%s3255_s22] sm:$0xff] }
 0x28a   : > { %v1665_v51 = vmul.f32 %v2717_v36, %v1664_v3  ;;  %1807 = vmatmul.f32.gmra.mxu0 %v1691_v16  ;;  %1872 = vmatmul.f32.gmra.mxu1 %v1691_v16  ;;  %v2719_v3 = vld [vmem:[%s3265_s25 + $0x8] sm:$0xff] }
 0x28b   : > { %1937 = vmatmul.f32.gmra.mxu2 %v1691_v16 }
 0x28c   : > { %v1666_v0 = vadd.f32 %v2717_v36, %v1665_v51  ;;  %v2720_v51 = vld [vmem:[%s3265_s25 + $0x10] sm:$0xff] }
 0x28e   : > { %v1670_v44 = vsel %vm1669_vm14, %v2717_v36, %v1666_v0 }
 0x28f   : > { %v1675_v45 = vsel %vm1672_vm15, %v1674_v38, %v1670_v44 }
 0x290   : > { %v1692_v28 = vmul.f32 %v1675_v45, %v4081_v13  ;;  %v1944_v13 = vmul.f32 %v3595_v31, %v3571_v10  ;;  %v1992_v10 = vmul.f32 %v3981_v43, %v3656_v19 }
 0x292   : > { %1810 = vmatmul.f32.gmra.mxu0 %v1692_v28  ;;  %1875 = vmatmul.f32.gmra.mxu1 %v1692_v28  ;;  %v1976_v2 = vadd.f32 %v1960_v57, %v1944_v13 }
 0x293   : > { %1940 = vmatmul.f32.gmra.mxu2 %v1692_v28  ;;  %v1945_v28 = vmul.f32 %v3601_v37, %v3577_v15  ;;  %v2724_v15 = vld [vmem:[%s3265_s25 + $0x28] sm:$0xff] }
 0x294   : > { %v2008_v44 = vadd.f32 %v1992_v10, %v1976_v2  ;;  %v2723_v2 = vld [vmem:[%s3265_s25 + $0x20] sm:$0xff] }
 0x297   : > { %v1766_v61 = vpop.f32.mrf.mxu0  ;;  %v1831_v25 = vpop.f32.mrf.mxu1 }
 0x298   : > { %v1832_v8 = vadd.f32 %v1831_v25, %v4097_v40  ;;  %v1767_v0 = vadd.f32 %v1766_v61, %v4104_v35 }
 0x29a   : > { %v2088_v36 = vmul.f32 %v1832_v8, %v3595_v31  ;;  %v2136_v24 = vmul.f32 %v1832_v8, %v3667_v33  ;;  %v2184_v39 = vmul.f32 %v1832_v8, %v3981_v43  ;;  %v1961_v33 = vmul.f32 %v3680_v53, %v3627_v62 }
 0x29b   : > { %v2024_v57 = vadd.f32 %v2721_v12, %v1767_v0  ;;  %v1946_v0 = vmul.f32 %v3607_v42, %v3583_v21  ;;  %v2728_v21 = vld [vmem:[%s3265_s25 + $0x40] sm:$0xff] }
 0x29c   : > { %v2104_v16 = vadd.f32 %v2718_v56, %v2088_v36  ;;  %v2152_v59 = vadd.f32 %v2719_v3, %v2136_v24  ;;  %v2200_v46 = vadd.f32 %v2720_v51, %v2184_v39  ;;  %v1977_v13 = vadd.f32 %v1961_v33, %v1945_v28  ;;  %v2722_v24 = vld [vmem:[%s3265_s25 + $0x18] sm:$0xff]  ;;  %v2726_v28 = vld [vmem:[%s3265_s25 + $0x30] sm:$0xff] }
 0x29d   : > { %v1993_v3 = vmul.f32 %v3986_v54, %v3669_v34 }
 0x29e   : > { %2120 = vst [vmem:[%s4119_s26] sm:$0xff] %v2104_v16  ;;  %v1896_v31 = vpop.f32.mrf.mxu2 }
 0x29f   : > { %2168 = vst [vmem:[%s4119_s26 + $0x8] sm:$0xff] %v2152_v59  ;;  %v1897_v38 = vadd.f32 %v1896_v31, %v4109_v23  ;;  %v1769_v19 = vpop.f32.mrf.mxu0  ;;  %v1834_v43 = vpop.f32.mrf.mxu1  ;;  %v1962_v59 = vmul.f32 %v3693_v22, %v3635_v4  ;;  %v2725_v31 = vld [vmem:[%s3255_s22 + $0x8] sm:$0xff] }
 0x2a0   : > { %2216 = vst [vmem:[%s4119_s26 + $0x10] sm:$0xff] %v2200_v46  ;;  %v1835_v45 = vadd.f32 %v1834_v43, %v4097_v40  ;;  %v2009_v46 = vadd.f32 %v1993_v3, %v1977_v13 }
 0x2a1   : > { %v2040_v61 = vmul.f32 %v2008_v44, %v1897_v38  ;;  %v1978_v43 = vadd.f32 %v1962_v59, %v1946_v0  ;;  %v2730_v59 = vld [vmem:[%s3265_s25 + $0x48] sm:$0xff]  ;;  %v1964_v0 = vmul.f32 %v3731_v60, %v3661_v27 }
 0x2a2   : > { %v2089_v62 = vmul.f32 %v1835_v45, %v3601_v37  ;;  %v2137_v25 = vmul.f32 %v1835_v45, %v3680_v53  ;;  %v2185_v8 = vmul.f32 %v1835_v45, %v3986_v54  ;;  %v1770_v37 = vadd.f32 %v1769_v19, %v4104_v35 }
 0x2a3   : > { %v2056_v36 = vadd.f32 %v2040_v61, %v2024_v57  ;;  %v2727_v57 = vld [vmem:[%s3265_s25 + $0x38] sm:$0xff] }
 0x2a4   : > { %v2105_v39 = vadd.f32 %v2722_v24, %v2089_v62  ;;  %v2153_v56 = vadd.f32 %v2723_v2, %v2137_v25  ;;  %v2201_v16 = vadd.f32 %v2724_v15, %v2185_v8  ;;  %v2025_v33 = vadd.f32 %v2725_v31, %v1770_v37  ;;  %v2729_v2 = vld [vmem:[%s3255_s22 + $0x10] sm:$0xff] }
 0x2a5   : > { %2072 = vst [vmem:[%s4141_s18] sm:$0xff] %v2056_v36  ;;  %v1994_v25 = vmul.f32 %v3993_v9, %v3682_v58  ;;  %v1963_v8 = vmul.f32 %v3710_v29, %v3643_v11 }
 0x2a6   : > { %2121 = vst [vmem:[%s4119_s26 + $0x18] sm:$0xff] %v2105_v39  ;;  %v1899_v53 = vpop.f32.mrf.mxu2 }
 0x2a7   : > { %2169 = vst [vmem:[%s4119_s26 + $0x20] sm:$0xff] %v2153_v56  ;;  %v1900_v51 = vadd.f32 %v1899_v53, %v4109_v23  ;;  %v1772_v10 = vpop.f32.mrf.mxu0  ;;  %v1837_v34 = vpop.f32.mrf.mxu1  ;;  %v2010_v36 = vadd.f32 %v1994_v25, %v1978_v43 }
 0x2a8   : > { %2217 = vst [vmem:[%s4119_s26 + $0x28] sm:$0xff] %v2201_v16  ;;  %v1838_v54 = vadd.f32 %v1837_v34, %v4097_v40 }
 0x2a9   : > { %v2041_v4 = vmul.f32 %v2009_v46, %v1900_v51  ;;  %v2731_v46 = vld [vmem:[%s3265_s25 + $0x50] sm:$0xff] }
 0x2aa   : > { %v2090_v38 = vmul.f32 %v1838_v54, %v3607_v42  ;;  %v2138_v44 = vmul.f32 %v1838_v54, %v3693_v22  ;;  %v2186_v19 = vmul.f32 %v1838_v54, %v3993_v9  ;;  %v1773_v42 = vadd.f32 %v1772_v10, %v4104_v35 }
 0x2ab   : > { %v2057_v45 = vadd.f32 %v2041_v4, %v2025_v33  ;;  %v1947_v9 = vmul.f32 %v3613_v47, %v3589_v26  ;;  %v2732_v26 = vld [vmem:[%s3265_s25 + $0x58] sm:$0xff]  ;;  %v1995_v54 = vmul.f32 %v4002_v18, %v3698_v63 }
 0x2ac   : > { %v2106_v12 = vadd.f32 %v2726_v28, %v2090_v38  ;;  %v2154_v61 = vadd.f32 %v2727_v57, %v2138_v44  ;;  %v2202_v62 = vadd.f32 %v2728_v21, %v2186_v19  ;;  %v2026_v56 = vadd.f32 %v2729_v2, %v1773_v42  ;;  %v2733_v44 = vld [vmem:[%s3255_s22 + $0x18] sm:$0xff] }
 0x2ad   : > { %2073 = vst [vmem:[%s4141_s18 + $0x8] sm:$0xff] %v2057_v45  ;;  %v1979_v37 = vadd.f32 %v1963_v8, %v1947_v9  ;;  %v1965_v8 = vmul.f32 %v3759_v50, %v3676_v48 }
 0x2ae   : > { %2122 = vst [vmem:[%s4119_s26 + $0x30] sm:$0xff] %v2106_v12  ;;  %v1902_v22 = vpop.f32.mrf.mxu2 }
 0x2af   : > { %2170 = vst [vmem:[%s4119_s26 + $0x38] sm:$0xff] %v2154_v61  ;;  %v1903_v13 = vadd.f32 %v1902_v22, %v4109_v23  ;;  %v1775_v24 = vpop.f32.mrf.mxu0  ;;  %v1840_v39 = vpop.f32.mrf.mxu1  ;;  %v2011_v33 = vadd.f32 %v1995_v54, %v1979_v37  ;;  %v2734_v61 = vld [vmem:[%s3265_s25 + $0x60] sm:$0xff]  ;;  %v1996_v22 = vmul.f32 %v4011_v55, %v3713_v6 }
 0x2b0   : > { %2218 = vst [vmem:[%s4119_s26 + $0x40] sm:$0xff] %v2202_v62  ;;  %v1841_v58 = vadd.f32 %v1840_v39, %v4097_v40  ;;  %v2735_v62 = vld [vmem:[%s3265_s25 + $0x68] sm:$0xff] }
 0x2b1   : > { %v2042_v11 = vmul.f32 %v2010_v36, %v1903_v13 }
 0x2b2   : > { %v2091_v15 = vmul.f32 %v1841_v58, %v3613_v47  ;;  %v2139_v16 = vmul.f32 %v1841_v58, %v3710_v29  ;;  %v2187_v3 = vmul.f32 %v1841_v58, %v4002_v18  ;;  %v1776_v47 = vadd.f32 %v1775_v24, %v4104_v35  ;;  %v2737_v58 = vld [vmem:[%s3255_s22 + $0x20] sm:$0xff] }
 0x2b3   : > { %v2058_v53 = vadd.f32 %v2042_v11, %v2026_v56  ;;  %v1948_v18 = vmul.f32 %v3617_v49, %v3575_v14  ;;  %v2736_v14 = vld [vmem:[%s3265_s25 + $0x70] sm:$0xff] }
 0x2b4   : > { %v2107_v51 = vadd.f32 %v2730_v59, %v2091_v15  ;;  %v2155_v10 = vadd.f32 %v2731_v46, %v2139_v16  ;;  %v2203_v34 = vadd.f32 %v2732_v26, %v2187_v3  ;;  %v2027_v19 = vadd.f32 %v2733_v44, %v1776_v47  ;;  %v2738_v3 = vld [vmem:[%s3265_s25 + $0x78] sm:$0xff]  ;;  %v4642_v46 = vld [vmem:[#allocation40_spill] sm:$0xff]  ;;  %v4643_v26 = vld [vmem:[#allocation38_spill] sm:$0xff] }
 0x2b5   : > { %2074 = vst [vmem:[%s4141_s18 + $0x10] sm:$0xff] %v2058_v53  ;;  %v1980_v12 = vadd.f32 %v1964_v0, %v1948_v18  ;;  %v2739_v53 = vld [vmem:[%s3265_s25 + $0x80] sm:$0xff] }
 0x2b6   : > { %2123 = vst [vmem:[%s4119_s26 + $0x48] sm:$0xff] %v2107_v51  ;;  %v1905_v29 = vpop.f32.mrf.mxu2 }
 0x2b7   : > { %2171 = vst [vmem:[%s4119_s26 + $0x50] sm:$0xff] %v2155_v10  ;;  %v1906_v31 = vadd.f32 %v1905_v29, %v4109_v23  ;;  %v1778_v4 = vpop.f32.mrf.mxu0  ;;  %v1843_v38 = vpop.f32.mrf.mxu1  ;;  %v2012_v36 = vadd.f32 %v1996_v22, %v1980_v12  ;;  %v1997_v10 = vmul.f32 %v4021_v7, %v4642_v46  ;;  %v2747_v46 = vld [vmem:[%s3265_s25 + $0xb0] sm:$0xff] }
 0x2b8   : > { %2219 = vst [vmem:[%s4119_s26 + $0x58] sm:$0xff] %v2203_v34  ;;  %v1844_v63 = vadd.f32 %v1843_v38, %v4097_v40  ;;  %v4644_v34 = vld [vmem:[#allocation45_spill] sm:$0xff] }
 0x2b9   : > { %v2043_v27 = vmul.f32 %v2011_v33, %v1906_v31  ;;  %v1966_v54 = vmul.f32 %v4644_v34, %v4643_v26  ;;  %v4645_v33 = vld [vmem:[#allocation26_spill] sm:$0xff]  ;;  %v4653_v26 = vld [vmem:[#allocation44_spill] sm:$0xff] }
 0x2ba   : > { %v2092_v43 = vmul.f32 %v1844_v63, %v3617_v49  ;;  %v2140_v45 = vmul.f32 %v1844_v63, %v3731_v60  ;;  %v2188_v28 = vmul.f32 %v1844_v63, %v4011_v55  ;;  %v1779_v49 = vadd.f32 %v1778_v4, %v4104_v35  ;;  %v4646_v4 = vld [vmem:[#allocation34_spill] sm:$0xff]  ;;  %v2741_v63 = vld [vmem:[%s3255_s22 + $0x28] sm:$0xff] }
 0x2bb   : > { %v2059_v57 = vadd.f32 %v2043_v27, %v2027_v19  ;;  %v1949_v55 = vmul.f32 %v3630_v1, %v3581_v20  ;;  %v2740_v20 = vld [vmem:[%s3265_s25 + $0x88] sm:$0xff]  ;;  %v1950_v38 = vmul.f32 %v4646_v4, %v4645_v33 }
 0x2bc   : > { %v2108_v21 = vadd.f32 %v2734_v61, %v2092_v43  ;;  %v2156_v25 = vadd.f32 %v2735_v62, %v2140_v45  ;;  %v2204_v42 = vadd.f32 %v2736_v14, %v2188_v28  ;;  %v2028_v9 = vadd.f32 %v2737_v58, %v1779_v49  ;;  %v4647_v43 = vld [vmem:[#allocation77_spill] sm:$0xff] }
 0x2bd   : > { %2075 = vst [vmem:[%s4141_s18 + $0x18] sm:$0xff] %v2059_v57  ;;  %v1981_v15 = vadd.f32 %v1965_v8, %v1949_v55  ;;  %v1982_v28 = vadd.f32 %v1966_v54, %v1950_v38  ;;  %v2742_v57 = vld [vmem:[%s3265_s25 + $0x90] sm:$0xff]  ;;  %v4649_v8 = vld [vmem:[#allocation39_spill] sm:$0xff] }
 0x2be   : > { %2124 = vst [vmem:[%s4119_s26 + $0x60] sm:$0xff] %v2108_v21  ;;  %v1908_v60 = vpop.f32.mrf.mxu2  ;;  %v2743_v21 = vld [vmem:[%s3265_s25 + $0x98] sm:$0xff] }
 0x2bf   : > { %2172 = vst [vmem:[%s4119_s26 + $0x68] sm:$0xff] %v2156_v25  ;;  %v1909_v13 = vadd.f32 %v1908_v60, %v4109_v23  ;;  %v1781_v24 = vpop.f32.mrf.mxu0  ;;  %v1846_v39 = vpop.f32.mrf.mxu1  ;;  %v2013_v29 = vadd.f32 %v1997_v10, %v1981_v15  ;;  %v2744_v25 = vld [vmem:[%s3265_s25 + $0xa0] sm:$0xff] }
 0x2c0   : > { %2220 = vst [vmem:[%s4119_s26 + $0x70] sm:$0xff] %v2204_v42  ;;  %v1847_v6 = vadd.f32 %v1846_v39, %v4097_v40  ;;  %v4648_v42 = vld [vmem:[#allocation42_spill] sm:$0xff] }
 0x2c1   : > { %v2044_v48 = vmul.f32 %v2012_v36, %v1909_v13  ;;  %v1998_v22 = vmul.f32 %v4647_v43, %v4648_v42  ;;  %v4650_v13 = vld [vmem:[#allocation48_spill] sm:$0xff] }
 0x2c2   : > { %v2093_v2 = vmul.f32 %v1847_v6, %v3630_v1  ;;  %v2141_v56 = vmul.f32 %v1847_v6, %v3759_v50  ;;  %v2189_v11 = vmul.f32 %v1847_v6, %v4021_v7  ;;  %v1782_v1 = vadd.f32 %v1781_v24, %v4104_v35 }
 0x2c3   : > { %v2060_v16 = vadd.f32 %v2044_v48, %v2028_v9  ;;  %v1967_v36 = vmul.f32 %v4650_v13, %v4649_v8  ;;  %v2014_v39 = vadd.f32 %v1998_v22, %v1982_v28  ;;  %v4651_v9 = vld [vmem:[#allocation27_spill] sm:$0xff]  ;;  %v4652_v48 = vld [vmem:[#allocation36_spill] sm:$0xff] }
 0x2c4   : > { %v2109_v37 = vadd.f32 %v2738_v3, %v2093_v2  ;;  %v2157_v59 = vadd.f32 %v2739_v53, %v2141_v56  ;;  %v2205_v51 = vadd.f32 %v2740_v20, %v2189_v11  ;;  %v2029_v18 = vadd.f32 %v2741_v63, %v1782_v1  ;;  %v2745_v56 = vld [vmem:[%s3255_s22 + $0x30] sm:$0xff]  ;;  %v2746_v20 = vld [vmem:[%s3265_s25 + $0xa8] sm:$0xff]  ;;  %v2748_v1 = vld [vmem:[%s3265_s25 + $0xb8] sm:$0xff] }
 0x2c5   : > { %2076 = vst [vmem:[%s4141_s18 + $0x20] sm:$0xff] %v2060_v16  ;;  %v1951_v2 = vmul.f32 %v4652_v48, %v4651_v9  ;;  %v4656_v63 = vld [vmem:[#allocation28_spill] sm:$0xff] }
 0x2c6   : > { %2125 = vst [vmem:[%s4119_s26 + $0x78] sm:$0xff] %v2109_v37  ;;  %v1911_v50 = vpop.f32.mrf.mxu2  ;;  %v2752_v22 = vld [vmem:[%s3265_s25 + $0xd0] sm:$0xff] }
 0x2c7   : > { %2173 = vst [vmem:[%s4119_s26 + $0x80] sm:$0xff] %v2157_v59  ;;  %v1912_v47 = vadd.f32 %v1911_v50, %v4109_v23  ;;  %v1784_v0 = vpop.f32.mrf.mxu0  ;;  %v1849_v31 = vpop.f32.mrf.mxu1  ;;  %v1983_v53 = vadd.f32 %v1967_v36, %v1951_v2 }
 0x2c8   : > { %2221 = vst [vmem:[%s4119_s26 + $0x88] sm:$0xff] %v2205_v51  ;;  %v1850_v7 = vadd.f32 %v1849_v31, %v4097_v40  ;;  %v1785_v49 = vadd.f32 %v1784_v0, %v4104_v35  ;;  %v4655_v0 = vld [vmem:[#allocation53_spill] sm:$0xff] }
 0x2c9   : > { %v2045_v44 = vmul.f32 %v2013_v29, %v1912_v47  ;;  %v4654_v29 = vld [vmem:[#allocation41_spill] sm:$0xff] }
 0x2ca   : > { %v2094_v19 = vmul.f32 %v1850_v7, %v4646_v4  ;;  %v2142_v27 = vmul.f32 %v1850_v7, %v4644_v34  ;;  %v2190_v45 = vmul.f32 %v1850_v7, %v4647_v43  ;;  %v2030_v11 = vadd.f32 %v2745_v56, %v1785_v49  ;;  %v4662_v56 = vld [vmem:[#allocation29_spill] sm:$0xff] }
 0x2cb   : > { %v2061_v12 = vadd.f32 %v2045_v44, %v2029_v18  ;;  %v1999_v34 = vmul.f32 %v4038_v17, %v4653_v26  ;;  %v1968_v31 = vmul.f32 %v4655_v0, %v4654_v29  ;;  %v4657_v18 = vld [vmem:[#allocation51_spill] sm:$0xff]  ;;  %v2755_v26 = vld [vmem:[%s3265_s25 + $0xe0] sm:$0xff]  ;;  %v4665_v29 = vld [vmem:[#allocation49_spill] sm:$0xff] }
 0x2cc   : > { %v2110_v61 = vadd.f32 %v2742_v57, %v2094_v19  ;;  %v2158_v62 = vadd.f32 %v2743_v21, %v2142_v27  ;;  %v2206_v14 = vadd.f32 %v2744_v25, %v2190_v45  ;;  %v1952_v44 = vmul.f32 %v4657_v18, %v4656_v63  ;;  %v2749_v19 = vld [vmem:[%s3255_s22 + $0x38] sm:$0xff] }
 0x2cd   : > { %2077 = vst [vmem:[%s4141_s18 + $0x28] sm:$0xff] %v2061_v12  ;;  %v2015_v33 = vadd.f32 %v1999_v34, %v1983_v53  ;;  %v4658_v12 = vld [vmem:[#allocation78_spill] sm:$0xff] }
 0x2ce   : > { %2126 = vst [vmem:[%s4119_s26 + $0x90] sm:$0xff] %v2110_v61  ;;  %v1914_v60 = vpop.f32.mrf.mxu2  ;;  %v1984_v61 = vadd.f32 %v1968_v31, %v1952_v44 }
 0x2cf   : > { %2174 = vst [vmem:[%s4119_s26 + $0x98] sm:$0xff] %v2158_v62  ;;  %v1915_v24 = vadd.f32 %v1914_v60, %v4109_v23  ;;  %v1787_v6 = vpop.f32.mrf.mxu0  ;;  %v1852_v55 = vpop.f32.mrf.mxu1  ;;  %v2750_v62 = vld [vmem:[%s3265_s25 + $0xc0] sm:$0xff]  ;;  %v4659_v60 = vld [vmem:[#allocation47_spill] sm:$0xff] }
 0x2d0   : > { %2222 = vst [vmem:[%s4119_s26 + $0xa0] sm:$0xff] %v2206_v14  ;;  %v1853_v58 = vadd.f32 %v1852_v55, %v4097_v40  ;;  %v1788_v54 = vadd.f32 %v1787_v6, %v4104_v35  ;;  %v2751_v14 = vld [vmem:[%s3265_s25 + $0xc8] sm:$0xff]  ;;  %v2000_v8 = vmul.f32 %v4658_v12, %v4659_v60  ;;  %v2759_v60 = vld [vmem:[%s3265_s25 + $0xf8] sm:$0xff] }
 0x2d1   : > { %v2046_v15 = vmul.f32 %v2014_v39, %v1915_v24  ;;  %v4660_v24 = vld [vmem:[#allocation43_spill] sm:$0xff]  ;;  %v4661_v39 = vld [vmem:[#allocation57_spill] sm:$0xff] }
 0x2d2   : > { %v2095_v16 = vmul.f32 %v1853_v58, %v4652_v48  ;;  %v2143_v3 = vmul.f32 %v1853_v58, %v4650_v13  ;;  %v2191_v37 = vmul.f32 %v1853_v58, %v4038_v17  ;;  %v2031_v27 = vadd.f32 %v2749_v19, %v1788_v54  ;;  %v2756_v54 = vld [vmem:[%s3265_s25 + $0xe8] sm:$0xff] }
 0x2d3   : > { %v2062_v59 = vadd.f32 %v2046_v15, %v2030_v11  ;;  %v1969_v6 = vmul.f32 %v4661_v39, %v4660_v24  ;;  %v2016_v58 = vadd.f32 %v2000_v8, %v1984_v61  ;;  %v4663_v11 = vld [vmem:[#allocation56_spill] sm:$0xff] }
 0x2d4   : > { %v2111_v51 = vadd.f32 %v2746_v20, %v2095_v16  ;;  %v2159_v10 = vadd.f32 %v2747_v46, %v2143_v3  ;;  %v2207_v50 = vadd.f32 %v2748_v1, %v2191_v37  ;;  %v1953_v15 = vmul.f32 %v4663_v11, %v4662_v56  ;;  %v2753_v16 = vld [vmem:[%s3255_s22 + $0x40] sm:$0xff]  ;;  %v4664_v20 = vld [vmem:[#allocation79_spill] sm:$0xff]  ;;  %v2754_v1 = vld [vmem:[%s3265_s25 + $0xd8] sm:$0xff] }
 0x2d5   : > { %2078 = vst [vmem:[%s4141_s18 + $0x30] sm:$0xff] %v2062_v59  ;;  %v4671_v24 = vld [vmem:[#allocation52_spill] sm:$0xff] }
 0x2d6   : > { %2127 = vst [vmem:[%s4119_s26 + $0xa8] sm:$0xff] %v2111_v51  ;;  %v1917_v47 = vpop.f32.mrf.mxu2  ;;  %v1985_v46 = vadd.f32 %v1969_v6, %v1953_v15 }
 0x2d7   : > { %2175 = vst [vmem:[%s4119_s26 + $0xb0] sm:$0xff] %v2159_v10  ;;  %v1918_v7 = vadd.f32 %v1917_v47, %v4109_v23  ;;  %v1790_v4 = vpop.f32.mrf.mxu0  ;;  %v1855_v38 = vpop.f32.mrf.mxu1 }
 0x2d8   : > { %2223 = vst [vmem:[%s4119_s26 + $0xb8] sm:$0xff] %v2207_v50  ;;  %v1856_v17 = vadd.f32 %v1855_v38, %v4097_v40  ;;  %v1791_v13 = vadd.f32 %v1790_v4, %v4104_v35  ;;  %v4667_v4 = vld [vmem:[#allocation61_spill] sm:$0xff] }
 0x2d9   : > { %v2047_v43 = vmul.f32 %v2015_v33, %v1918_v7  ;;  %v4666_v33 = vld [vmem:[#allocation46_spill] sm:$0xff] }
 0x2da   : > { %v2096_v45 = vmul.f32 %v1856_v17, %v4657_v18  ;;  %v2144_v28 = vmul.f32 %v1856_v17, %v4655_v0  ;;  %v2192_v57 = vmul.f32 %v1856_v17, %v4658_v12  ;;  %v2032_v3 = vadd.f32 %v2753_v16, %v1791_v13  ;;  %v2760_v13 = vld [vmem:[%s3265_s25 + $0x100] sm:$0xff] }
 0x2db   : > { %v2063_v21 = vadd.f32 %v2047_v43, %v2031_v27  ;;  %v2001_v0 = vmul.f32 %v4664_v20, %v4665_v29  ;;  %v1970_v38 = vmul.f32 %v4667_v4, %v4666_v33  ;;  %v4668_v27 = vld [vmem:[#allocation30_spill] sm:$0xff]  ;;  %v4669_v43 = vld [vmem:[#allocation60_spill] sm:$0xff] }
 0x2dc   : > { %v2112_v25 = vadd.f32 %v2750_v62, %v2096_v45  ;;  %v2160_v42 = vadd.f32 %v2751_v14, %v2144_v28  ;;  %v2208_v49 = vadd.f32 %v2752_v22, %v2192_v57  ;;  %v1954_v45 = vmul.f32 %v4669_v43, %v4668_v27  ;;  %v2757_v28 = vld [vmem:[%s3255_s22 + $0x48] sm:$0xff]  ;;  %v4670_v62 = vld [vmem:[#allocation80_spill] sm:$0xff] }
 0x2dd   : > { %2079 = vst [vmem:[%s4141_s18 + $0x38] sm:$0xff] %v2063_v21  ;;  %v2017_v63 = vadd.f32 %v2001_v0, %v1985_v46  ;;  %v2758_v22 = vld [vmem:[%s3265_s25 + $0xf0] sm:$0xff]  ;;  %v2764_v0 = vld [vmem:[%s3265_s25 + $0x118] sm:$0xff] }
 0x2de   : > { %2128 = vst [vmem:[%s4119_s26 + $0xc0] sm:$0xff] %v2112_v25  ;;  %v1920_v36 = vpop.f32.mrf.mxu2  ;;  %v1986_v14 = vadd.f32 %v1970_v38, %v1954_v45  ;;  %v4679_v45 = vld [vmem:[#allocation32_spill] sm:$0xff] }
 0x2df   : > { %2176 = vst [vmem:[%s4119_s26 + $0xc8] sm:$0xff] %v2160_v42  ;;  %v1921_v55 = vadd.f32 %v1920_v36, %v4109_v23  ;;  %v1793_v9 = vpop.f32.mrf.mxu0  ;;  %v1858_v48 = vpop.f32.mrf.mxu1 }
 0x2e0   : > { %2224 = vst [vmem:[%s4119_s26 + $0xd0] sm:$0xff] %v2208_v49  ;;  %v1859_v2 = vadd.f32 %v1858_v48, %v4097_v40  ;;  %v1794_v31 = vadd.f32 %v1793_v9, %v4104_v35  ;;  %v4673_v9 = vld [vmem:[#allocation65_spill] sm:$0xff] }
 0x2e1   : > { %v2048_v37 = vmul.f32 %v2016_v58, %v1921_v55  ;;  %v4672_v58 = vld [vmem:[#allocation50_spill] sm:$0xff] }
 0x2e2   : > { %v2097_v53 = vmul.f32 %v1859_v2, %v4663_v11  ;;  %v2145_v59 = vmul.f32 %v1859_v2, %v4661_v39  ;;  %v2193_v51 = vmul.f32 %v1859_v2, %v4664_v20  ;;  %v2033_v12 = vadd.f32 %v2757_v28, %v1794_v31  ;;  %v4680_v28 = vld [vmem:[#allocation68_spill] sm:$0xff] }
 0x2e3   : > { %v2064_v10 = vadd.f32 %v2048_v37, %v2032_v3  ;;  %v2002_v39 = vmul.f32 %v4670_v62, %v4671_v24  ;;  %v1971_v48 = vmul.f32 %v4673_v9, %v4672_v58  ;;  %v4674_v3 = vld [vmem:[#allocation31_spill] sm:$0xff]  ;;  %v4675_v37 = vld [vmem:[#allocation64_spill] sm:$0xff] }
 0x2e4   : > { %v2113_v50 = vadd.f32 %v2754_v1, %v2097_v53  ;;  %v2161_v34 = vadd.f32 %v2755_v26, %v2145_v59  ;;  %v2209_v47 = vadd.f32 %v2756_v54, %v2193_v51  ;;  %v1955_v53 = vmul.f32 %v4675_v37, %v4674_v3  ;;  %v2761_v59 = vld [vmem:[%s3255_s22 + $0x50] sm:$0xff]  ;;  %v4684_v3 = vld [vmem:[#allocation33_spill] sm:$0xff] }
 0x2e5   : > { %2080 = vst [vmem:[%s4141_s18 + $0x40] sm:$0xff] %v2064_v10  ;;  %v2018_v56 = vadd.f32 %v2002_v39, %v1986_v14  ;;  %v4681_v39 = vld [vmem:[#allocation59_spill] sm:$0xff] }
 0x2e6   : > { %2129 = vst [vmem:[%s4119_s26 + $0xd8] sm:$0xff] %v2113_v50  ;;  %v1923_v7 = vpop.f32.mrf.mxu2  ;;  %v1987_v50 = vadd.f32 %v1971_v48, %v1955_v53  ;;  %v4683_v48 = vld [vmem:[#allocation72_spill] sm:$0xff] }
 0x2e7   : > { %2177 = vst [vmem:[%s4119_s26 + $0xe0] sm:$0xff] %v2161_v34  ;;  %v1924_v17 = vadd.f32 %v1923_v7, %v4109_v23  ;;  %v1796_v18 = vpop.f32.mrf.mxu0  ;;  %v1861_v44 = vpop.f32.mrf.mxu1  ;;  %v2762_v34 = vld [vmem:[%s3265_s25 + $0x108] sm:$0xff] }
 0x2e8   : > { %2225 = vst [vmem:[%s4119_s26 + $0xe8] sm:$0xff] %v2209_v47  ;;  %v1862_v19 = vadd.f32 %v1861_v44, %v4097_v40  ;;  %v1797_v6 = vadd.f32 %v1796_v18, %v4104_v35  ;;  %v2763_v47 = vld [vmem:[%s3265_s25 + $0x110] sm:$0xff]  ;;  %v4676_v7 = vld [vmem:[#allocation55_spill] sm:$0xff] }
 0x2e9   : > { %v2049_v57 = vmul.f32 %v2017_v63, %v1924_v17  ;;  %v2003_v33 = vmul.f32 %v4071_v5, %v4676_v7  ;;  %v4677_v17 = vld [vmem:[#allocation54_spill] sm:$0xff]  ;;  %v4686_v7 = vld [vmem:[#allocation63_spill] sm:$0xff] }
 0x2ea   : > { %v2098_v61 = vmul.f32 %v1862_v19, %v4669_v43  ;;  %v2146_v21 = vmul.f32 %v1862_v19, %v4667_v4  ;;  %v2194_v25 = vmul.f32 %v1862_v19, %v4670_v62  ;;  %v2034_v20 = vadd.f32 %v2761_v59, %v1797_v6  ;;  %v4678_v63 = vld [vmem:[#allocation70_spill] sm:$0xff] }
 0x2eb   : > { %v2065_v42 = vadd.f32 %v2049_v57, %v2033_v12  ;;  %v1972_v18 = vmul.f32 %v4678_v63, %v4677_v17  ;;  %v2019_v19 = vadd.f32 %v2003_v33, %v1987_v50  ;;  %v1956_v12 = vmul.f32 %v4680_v28, %v4679_v45  ;;  %v2765_v57 = vld [vmem:[%s3255_s22 + $0x58] sm:$0xff]  ;;  %v2769_v59 = vld [vmem:[%s3255_s22 + $0x60] sm:$0xff] }
 0x2ec   : > { %v2114_v49 = vadd.f32 %v2758_v22, %v2098_v61  ;;  %v2162_v8 = vadd.f32 %v2759_v60, %v2146_v21  ;;  %v2210_v36 = vadd.f32 %v2760_v13, %v2194_v25  ;;  %v2004_v6 = vmul.f32 %v4079_v30, %v4681_v39  ;;  %v4687_v17 = vld [vmem:[#allocation62_spill] sm:$0xff]  ;;  %v4690_v45 = vld [vmem:[#allocation73_spill] sm:$0xff] }
 0x2ed   : > { %2081 = vst [vmem:[%s4141_s18 + $0x48] sm:$0xff] %v2065_v42  ;;  %v1988_v42 = vadd.f32 %v1972_v18, %v1956_v12  ;;  %v2005_v33 = vmul.f32 %v4085_v41, %v4686_v7  ;;  %v2773_v12 = vld [vmem:[%s3255_s22 + $0x68] sm:$0xff] }
 0x2ee   : > { %2130 = vst [vmem:[%s4119_s26 + $0xf0] sm:$0xff] %v2114_v49  ;;  %v1926_v55 = vpop.f32.mrf.mxu2  ;;  %v2766_v49 = vld [vmem:[%s3265_s25 + $0x120] sm:$0xff] }
 0x2ef   : > { %2178 = vst [vmem:[%s4119_s26 + $0xf8] sm:$0xff] %v2162_v8  ;;  %v1927_v2 = vadd.f32 %v1926_v55, %v4109_v23  ;;  %v1799_v11 = vpop.f32.mrf.mxu0  ;;  %v1864_v15 = vpop.f32.mrf.mxu1  ;;  %v2767_v8 = vld [vmem:[%s3265_s25 + $0x128] sm:$0xff] }
 0x2f0   : > { %2226 = vst [vmem:[%s4119_s26 + $0x100] sm:$0xff] %v2210_v36  ;;  %v1865_v16 = vadd.f32 %v1864_v15, %v4097_v40  ;;  %v1800_v4 = vadd.f32 %v1799_v11, %v4104_v35  ;;  %v2768_v36 = vld [vmem:[%s3265_s25 + $0x130] sm:$0xff]  ;;  %v2020_v11 = vadd.f32 %v2004_v6, %v1988_v42 }
 0x2f1   : > { %v2050_v51 = vmul.f32 %v2018_v56, %v1927_v2 }
 0x2f2   : > { %v2099_v46 = vmul.f32 %v1865_v16, %v4675_v37  ;;  %v2147_v10 = vmul.f32 %v1865_v16, %v4673_v9  ;;  %v2195_v1 = vmul.f32 %v1865_v16, %v4071_v5  ;;  %v2035_v61 = vadd.f32 %v2765_v57, %v1800_v4  ;;  %v4682_v9 = vld [vmem:[#allocation58_spill] sm:$0xff]  ;;  %v4685_v37 = vld [vmem:[#allocation71_spill] sm:$0xff] }
 0x2f3   : > { %v2066_v26 = vadd.f32 %v2050_v51, %v2034_v20  ;;  %v1973_v2 = vmul.f32 %v4683_v48, %v4682_v9  ;;  %v1957_v53 = vmul.f32 %v4685_v37, %v4684_v3  ;;  %v4693_v9 = vld [vmem:[#allocation76_spill] sm:$0xff] }
 0x2f4   : > { %v2115_v54 = vadd.f32 %v2762_v34, %v2099_v46  ;;  %v2163_v29 = vadd.f32 %v2763_v47, %v2147_v10  ;;  %v2211_v31 = vadd.f32 %v2764_v0, %v2195_v1  ;;  %v2770_v34 = vld [vmem:[%s3265_s25 + $0x138] sm:$0xff]  ;;  %v2771_v47 = vld [vmem:[%s3265_s25 + $0x140] sm:$0xff]  ;;  %v2772_v0 = vld [vmem:[%s3265_s25 + $0x148] sm:$0xff] }
 0x2f5   : > { %2082 = vst [vmem:[%s4141_s18 + $0x50] sm:$0xff] %v2066_v26  ;;  %v1989_v50 = vadd.f32 %v1973_v2, %v1957_v53  ;;  %v2777_v3 = vld [vmem:[%s3255_s22 + $0x70] sm:$0xff] }
 0x2f6   : > { %2131 = vst [vmem:[%s4119_s26 + $0x108] sm:$0xff] %v2115_v54  ;;  %v1929_v38 = vpop.f32.mrf.mxu2 }
 0x2f7   : > { %2179 = vst [vmem:[%s4119_s26 + $0x110] sm:$0xff] %v2163_v29  ;;  %v1930_v44 = vadd.f32 %v1929_v38, %v4109_v23  ;;  %v1802_v27 = vpop.f32.mrf.mxu0  ;;  %v1867_v43 = vpop.f32.mrf.mxu1 }
 0x2f8   : > { %2227 = vst [vmem:[%s4119_s26 + $0x118] sm:$0xff] %v2211_v31  ;;  %v1868_v5 = vadd.f32 %v1867_v43, %v4097_v40  ;;  %v1803_v55 = vadd.f32 %v1802_v27, %v4104_v35 }
 0x2f9   : > { %v2051_v21 = vmul.f32 %v2019_v19, %v1930_v44  ;;  %v2021_v19 = vadd.f32 %v2005_v33, %v1989_v50 }
 0x2fa   : > { %v2100_v62 = vmul.f32 %v1868_v5, %v4680_v28  ;;  %v2148_v25 = vmul.f32 %v1868_v5, %v4678_v63  ;;  %v2196_v14 = vmul.f32 %v1868_v5, %v4079_v30  ;;  %v2036_v20 = vadd.f32 %v2769_v59, %v1803_v55  ;;  %v4688_v63 = vld [vmem:[#allocation74_spill] sm:$0xff]  ;;  %v4689_v5 = vld [vmem:[#allocation35_spill] sm:$0xff] }
 0x2fb   : > { %v2067_v22 = vadd.f32 %v2051_v21, %v2035_v61  ;;  %v1974_v18 = vmul.f32 %v4688_v63, %v4687_v17  ;;  %v1958_v28 = vmul.f32 %v4690_v45, %v4689_v5 }
 0x2fc   : > { %v2116_v60 = vadd.f32 %v2766_v49, %v2100_v62  ;;  %v2164_v13 = vadd.f32 %v2767_v8, %v2148_v25  ;;  %v2212_v24 = vadd.f32 %v2768_v36, %v2196_v14 }
 0x2fd   : > { %2083 = vst [vmem:[%s4141_s18 + $0x58] sm:$0xff] %v2067_v22  ;;  %v1990_v14 = vadd.f32 %v1974_v18, %v1958_v28  ;;  %v2774_v22 = vld [vmem:[%s3265_s25 + $0x150] sm:$0xff] }
 0x2fe   : > { %2132 = vst [vmem:[%s4119_s26 + $0x120] sm:$0xff] %v2116_v60  ;;  %v1932_v58 = vpop.f32.mrf.mxu2  ;;  %v2775_v60 = vld [vmem:[%s3265_s25 + $0x158] sm:$0xff] }
 0x2ff   : > { %2180 = vst [vmem:[%s4119_s26 + $0x128] sm:$0xff] %v2164_v13  ;;  %v1933_v56 = vadd.f32 %v1932_v58, %v4109_v23  ;;  %v1805_v15 = vpop.f32.mrf.mxu0  ;;  %v1870_v16 = vpop.f32.mrf.mxu1  ;;  %v2776_v13 = vld [vmem:[%s3265_s25 + $0x160] sm:$0xff]  ;;  %v4692_v58 = vld [vmem:[#allocation67_spill] sm:$0xff] }
 0x300   : > { %2228 = vst [vmem:[%s4119_s26 + $0x130] sm:$0xff] %v2212_v24  ;;  %v1871_v30 = vadd.f32 %v1870_v16, %v4097_v40  ;;  %v1806_v4 = vadd.f32 %v1805_v15, %v4104_v35  ;;  %v4691_v24 = vld [vmem:[#allocation66_spill] sm:$0xff]  ;;  %v4694_v15 = vld [vmem:[#allocation37_spill] sm:$0xff]  ;;  %v4695_v16 = vld [vmem:[#allocation75_spill] sm:$0xff] }
 0x301   : > { %v2052_v51 = vmul.f32 %v2020_v11, %v1933_v56  ;;  %v2006_v39 = vmul.f32 %v4088_v52, %v4691_v24 }
 0x302   : > { %v2101_v46 = vmul.f32 %v1871_v30, %v4685_v37  ;;  %v2149_v10 = vmul.f32 %v1871_v30, %v4683_v48  ;;  %v2197_v1 = vmul.f32 %v1871_v30, %v4085_v41  ;;  %v2037_v57 = vadd.f32 %v2773_v12, %v1806_v4 }
 0x303   : > { %v2068_v26 = vadd.f32 %v2052_v51, %v2036_v20  ;;  %v1975_v48 = vmul.f32 %v4693_v9, %v4692_v58  ;;  %v2022_v56 = vadd.f32 %v2006_v39, %v1990_v14  ;;  %v1959_v30 = vmul.f32 %v4695_v16, %v4694_v15 }
 0x304   : > { %v2117_v54 = vadd.f32 %v2770_v34, %v2101_v46  ;;  %v2165_v29 = vadd.f32 %v2771_v47, %v2149_v10  ;;  %v2213_v31 = vadd.f32 %v2772_v0, %v2197_v1  ;;  %v2778_v1 = vld [vmem:[%s3265_s25 + $0x168] sm:$0xff] }
 0x305   : > { %2084 = vst [vmem:[%s4141_s18 + $0x60] sm:$0xff] %v2068_v26  ;;  %v2779_v26 = vld [vmem:[%s3265_s25 + $0x170] sm:$0xff] }
 0x306   : > { %2133 = vst [vmem:[%s4119_s26 + $0x138] sm:$0xff] %v2117_v54  ;;  %v1935_v38 = vpop.f32.mrf.mxu2  ;;  %v2780_v54 = vld [vmem:[%s3265_s25 + $0x178] sm:$0xff]  ;;  %s2948_s25 = scalar_lea.hbm %s2947_s10, 384 }
 0x307   : > { %2181 = vst [vmem:[%s4119_s26 + $0x140] sm:$0xff] %v2165_v29  ;;  %v1936_v44 = vadd.f32 %v1935_v38, %v4109_v23  ;;  %v1873_v27 = vpop.f32.mrf.mxu1  ;;  %v1808_v43 = vpop.f32.mrf.mxu0  ;;  %v4696_v29 = vld [vmem:[#allocation69_spill] sm:$0xff]  ;;  %p2949_p1 = scmp.ne.s32.totalorder %s2947_s10, %s2948_s25  ;;  %p2954_p10 = scmp.lt.s32.totalorder %s2952_s17, %s2948_s25 }
 0x308   : > { %2229 = vst [vmem:[%s4119_s26 + $0x148] sm:$0xff] %v2213_v31  ;;  %v1874_v41 = vadd.f32 %v1873_v27, %v4097_v40  ;;  %v1809_v6 = vadd.f32 %v1808_v43, %v4104_v35  ;;  %v2007_v0 = vmul.f32 %v4091_v32, %v4696_v29 }
 0x309   : > { %v2053_v61 = vmul.f32 %v2021_v19, %v1936_v44  ;;  %p2950_p4 = pnand %p2949_p1, %p3191_p7  ;;  %p2955_p11 = por %p2954_p10, %p2953_p2 }
 0x30a   : > { %v2102_v21 = vmul.f32 %v1874_v41, %v4690_v45  ;;  %v2150_v62 = vmul.f32 %v1874_v41, %v4688_v63  ;;  %v2198_v25 = vmul.f32 %v1874_v41, %v4088_v52  ;;  %v2038_v37 = vadd.f32 %v2777_v3, %v1809_v6 }
 0x30b   : > { %v2069_v42 = vadd.f32 %v2053_v61, %v2037_v57  ;;  %p2951_p8 = pneg %p2950_p4 }
 0x30c   : > { %v2118_v49 = vadd.f32 %v2774_v22, %v2102_v21  ;;  %v2166_v8 = vadd.f32 %v2775_v60, %v2150_v62  ;;  %v2214_v36 = vadd.f32 %v2776_v13, %v2198_v25 }
 0x30d   : > { %2085 = vst [vmem:[%s4141_s18 + $0x68] sm:$0xff] %v2069_v42  ;;  %p2956_p9 = pnand %p2955_p11, %p2951_p8 }
 0x30e   : > { %2134 = vst [vmem:[%s4119_s26 + $0x150] sm:$0xff] %v2118_v49  ;;  %v1938_v55 = vpop.f32.mrf.mxu2 }
 0x30f   : > { %2182 = vst [vmem:[%s4119_s26 + $0x158] sm:$0xff] %v2166_v8  ;;  %v1939_v2 = vadd.f32 %v1938_v55, %v4109_v23  ;;  %v1876_v11 = vpop.f32.mrf.mxu1  ;;  %v1811_v59 = vpop.f32.mrf.mxu0 }
 0x310   : > { %2230 = vst [vmem:[%s4119_s26 + $0x160] sm:$0xff] %v2214_v36  ;;  %v1877_v52 = vadd.f32 %v1876_v11, %v4097_v40  ;;  %v1991_v40 = vadd.f32 %v1975_v48, %v1959_v30  ;;  %v1812_v31 = vadd.f32 %v1811_v59, %v4104_v35 }
 0x311   : > { %v2054_v53 = vmul.f32 %v2022_v56, %v1939_v2 }
 0x312   : > { %v2103_v20 = vmul.f32 %v1877_v52, %v4695_v16  ;;  %v2151_v51 = vmul.f32 %v1877_v52, %v4693_v9  ;;  %v2199_v46 = vmul.f32 %v1877_v52, %v4091_v32  ;;  %v2023_v4 = vadd.f32 %v2007_v0, %v1991_v40  ;;  %v2781_v32 = vld [vmem:[%s3255_s22 + $0x78] sm:$0xff] }
 0x313   : > { %v2070_v10 = vadd.f32 %v2054_v53, %v2038_v37  ;;  %v2039_v38 = vadd.f32 %v2781_v32, %v1812_v31 }
 0x314   : > { %v2119_v50 = vadd.f32 %v2778_v1, %v2103_v20  ;;  %v2167_v34 = vadd.f32 %v2779_v26, %v2151_v51  ;;  %v2215_v47 = vadd.f32 %v2780_v54, %v2199_v46 }
 0x315   : > { %2086 = vst [vmem:[%s4141_s18 + $0x70] sm:$0xff] %v2070_v10 }
 0x316   : > { %2135 = vst [vmem:[%s4119_s26 + $0x168] sm:$0xff] %v2119_v50  ;;  %v1941_v7 = vpop.f32.mrf.mxu2 }
 0x317   : > { %2183 = vst [vmem:[%s4119_s26 + $0x170] sm:$0xff] %v2167_v34  ;;  %v1942_v33 = vadd.f32 %v1941_v7, %v4109_v23 }
 0x318   : > { %2231 = vst [vmem:[%s4119_s26 + $0x178] sm:$0xff] %v2215_v47 }
 0x319   : > { %v2055_v17 = vmul.f32 %v2023_v4, %v1942_v33 }
 0x31a   : > { %2959 = shalt.err (!%p2956_p9)
}
 0x31b   : > { %s3053_s22 = smov 384   ;;  %s3054_s26 = smov 24   ;;  %v2071_v35 = vadd.f32 %v2055_v17, %v2039_v38 }
 0x31c   : > { %2541 = dma.vmem_to_hbm [thread:$0]  (%p3191_p7), %s4436_s3, 6144, %s4438_s2, %s2238_s16, %s3053_s22, %s3053_s22, %s3054_s26  }
 0x31d   : > { %2087 = vst [vmem:[%s4141_s18 + $0x78] sm:$0xff] %v2071_v35  ;;  %s2233_s24 = scalar_lea.sflag [#allocation4], %s3249_s13  ;;  %s2974_s5 = sshra.s32 %s2253_s27, 4  ;;  %s2975_s5 = int_to_ptr.hbm [resolvable:$true] %s2974_s5 }
 0x31e   : > { %s2976_s29 = scalar_lea.hbm %s2975_s5, 128  ;;  %s2980_s12 = scalar_lea.hbm %s4498_s7, 256 }
 0x31f   : > { %p2977_p12 = scmp.ne.s32.totalorder %s2975_s5, %s2976_s29  ;;  %p2981_p3 = scmp.lt.s32.totalorder %s2975_s5, %s4498_s7 }
 0x320   : > { %p2982_p5 = scmp.lt.s32.totalorder %s2980_s12, %s2976_s29 }
 0x321   : > { %p2978_p13 = pnand %p2977_p12, %p3191_p7 }
 0x322   : > { %p2983_p1 = por %p2982_p5, %p2981_p3 }
 0x323   : > { %p2979_p0 = pneg %p2978_p13 }
 0x325   : > { %p2984_p4 = pnand %p2983_p1, %p2979_p0 }
 0x327   : > { %2987 = shalt.err (!%p2984_p4)
}
 0x328   : > { %s3055_s13 = smov 128   ;;  %s3056_s18 = smov 8  }
 0x329   : > { %2540 = dma.vmem_to_hbm [thread:$0]  (%p3191_p7), %s2251_s23, 2048, %s2253_s27, %s2233_s24, %s3055_s13, %s3055_s13, %s3056_s18  }
 0x32a PF: > { %s4697_s3 = sld [smem:[#allocation20_spill]] }
 0x32b   : > { %s4699_s16 = sld [smem:[#allocation22_spill]] }
 0x330   : > { %s2285_s25 = sand.u32 1, %s4697_s3  }
 0x331   : > { %p4700_p8 = scmp.ge.s32.totalorder %s4699_s16, 2  ;;  %s2286_s11 = scalar_lea.sflag [#allocation4], %s2285_s25 }
 0x333   : > { %p2562_p2 = pnand %p4700_p8, %p3137_p6 }
 0x335   : > { %p2563_p10 = pneg %p2562_p2 }
 0x337   : > { %3021 = dma.done.wait (%p2563_p10), %s2286_s11, 2048  }
 0x338   : > { %3023 = vsyncadd (%p2563_p10), %s2286_s11, 4294965248  ;;  %s2296_s14 = scalar_lea.sflag [#allocation13], %s2285_s25 }
 0x339   : > { %3025 = dma.done.wait (%p2563_p10), %s2296_s14, 6144  }
 0x33a   : > { %3027 = vsyncadd (%p2563_p10), %s2296_s14, 4294961152  ;;  %s4701_s30 = sld [smem:[#allocation24_spill]]  ;;  %s4704_s27 = smov %s3034_s28 }
 0x33b   : > { %s4702_s17 = sld [smem:[#allocation21_spill]] }
 0x33c   : > { %s4703_s29 = sld [smem:[#allocation25_spill]] }
 0x340   : > { %p29_p7 = scmp.ge.s32.totalorder %s4701_s30, 4  }
 0x341   : > { %s4705_s28 = smov %s4702_s17 }
 0x342   :  { %31 = sbr.rel (!%p29_p7) target bundleno = 14 (0xe), region = 135 }
 0x347   :  { %2302 = vsyncpa [#allocation3], 1 }
 0x348   :  { %2304 = vsyncpa [#allocation3 + $0x1], 1 }
 0x349   :  { %2305 = vsyncpa [#allocation6], 1 }
 0x34a   :  { %2307 = vsyncpa [#allocation6 + $0x1], 1 }
 0x34b   :  { %2308 = vsyncpa [#allocation9], 1 }
 0x34c   :  { %2309 = vsyncpa [#allocation4], 1 }
 0x34d   :  { %2311 = vsyncpa [#allocation4 + $0x1], 1 }
 0x34e   :  { %2312 = vsyncpa [#allocation13], 1 }
 0x34f   :  { %2314 = vsyncpa [#allocation13 + $0x1], 1 }

</bundles_post_ra>
